<compile_context>
chip_gen: v6e
topology: v6e:2x2x1
jax: 0.10.0
libtpu: 0.0.40
codegen_flags: <defaults>
</compile_context>

<pallas_src>
import functools

import jax
import jax.numpy as jnp
from jax.experimental import pallas as pl
from jax.experimental.pallas import tpu as pltpu


def spatial_attention_kernel(x_ref, t_ref, o_ref,
                             sum_acc, max_acc, pad_a, pad_m,
                             *, c_total, h, w, ksize, pad):
    c_idx = pl.program_id(1)
    n_c = pl.num_programs(1)
    tile_c = x_ref.shape[1]

    # ---- init accumulators on the first channel tile ----
    @pl.when(c_idx == 0)
    def _init():
        sum_acc[...] = jnp.zeros_like(sum_acc)
        max_acc[...] = jnp.full(max_acc.shape, -jnp.inf, dtype=max_acc.dtype)

    # ---- fused sum + max over this lane-dense channel tile (f32 accum) ----
    x = x_ref[0].astype(jnp.float32)                       # (tile_c, H*W)
    if c_total % tile_c != 0:
        # Last tile is partial: mask out-of-range channels (grid = cdiv(C, tile)).
        ch = (c_idx * tile_c
              + jax.lax.broadcasted_iota(jnp.int32, (tile_c, 1), 0))
        valid = ch < c_total                               # (tile_c, 1)
        x_sum = jnp.where(valid, x, 0.0)
        x_max = jnp.where(valid, x, -jnp.inf)
    else:
        x_sum = x
        x_max = x

    sum_acc[...] = sum_acc[...] + jnp.sum(x_sum, axis=0, keepdims=True)
    max_acc[...] = jnp.maximum(max_acc[...],
                               jnp.max(x_max, axis=0, keepdims=True))

    # ---- finalize: unflatten + zero-pad, banded-Toeplitz conv on MXU, sigmoid ----
    @pl.when(c_idx == n_c - 1)
    def _finalize():
        avg_flat = sum_acc[...] * (1.0 / c_total)          # (1, H*W) f32
        max_flat = max_acc[...]                            # (1, H*W) f32

        pad_a[...] = jnp.zeros_like(pad_a)
        pad_m[...] = jnp.zeros_like(pad_m)
        # Row-wise unflatten of the lane-dense maps into the zero-padded
        # (H+2p, W+2p) scratch (static slices; runs once per batch element).
        for r in range(h):
            pad_a[pad + r:pad + r + 1, pad:pad + w] = avg_flat[:, r * w:(r + 1) * w]
            pad_m[pad + r:pad + r + 1, pad:pad + w] = max_flat[:, r * w:(r + 1) * w]

        # 7x7 conv as 2*k small matmuls: out += pad[dh:dh+H, :] @ T[c, dh],
        # where T[c, dh] is the (W+2p, W) banded Toeplitz of row dh of the
        # conv weights (built in the wrapper).  Runs on the otherwise-idle MXU.
        acc = jnp.zeros((h, w), jnp.float32)
        for dh in range(ksize):
            acc = acc + jnp.dot(pad_a[dh:dh + h, :], t_ref[0, dh],
                                precision=jax.lax.Precision.HIGHEST,
                                preferred_element_type=jnp.float32)
            acc = acc + jnp.dot(pad_m[dh:dh + h, :], t_ref[1, dh],
                                precision=jax.lax.Precision.HIGHEST,
                                preferred_element_type=jnp.float32)

        o_ref[0, 0] = jax.nn.sigmoid(acc).astype(o_ref.dtype)


def _pick_channel_tile(c, hw, itemsize, budget_bytes):
    """Channel tile: full C if it fits the per-step budget, else a multiple of 8."""
    per_channel_bytes = max(1, hw * itemsize)
    max_tc = max(1, budget_bytes // per_channel_bytes)
    if max_tc >= c:
        return c
    return max(8, (max_tc // 8) * 8)


def _conv_band_matrices(conv_w, w_dim):
    """(1,2,k,k) OIHW conv weights -> (2, k, W+2p, W) banded Toeplitz matrices.

    T[c, i, u, v] = conv_w[0, c, i, u - v] if 0 <= u - v < k else 0, so that
    (padded_band_i @ T[c, i])[h, v] = sum_j padded[h+i, v+j] * w[c, i, j].
    """
    k = conv_w.shape[-1]
    p = k // 2
    wk = conv_w.reshape(2, k, k).astype(jnp.float32)        # [c, kh, kw]
    u = jnp.arange(w_dim + 2 * p)[:, None]                   # (W+2p, 1)
    v = jnp.arange(w_dim)[None, :]                            # (1, W)
    j = u - v                                                 # (W+2p, W)
    valid = (j >= 0) & (j < k)
    jc = jnp.clip(j, 0, k - 1)
    t = wk[:, :, jc]                                          # (2, k, W+2p, W)
    return jnp.where(valid[None, None], t, 0.0)


def spatial_attention(x, conv_w, *, channel_tile=None,
                      tile_budget_bytes=8 * 1024 * 1024):
    """x: (B, C, H, W) NCHW; conv_w: (1, 2, k, k) OIHW (bias-free, odd k).

    Returns (B, 1, H, W), matching the PyTorch SpatialAttention forward.
    """
    B, C, H, W = x.shape
    k = conv_w.shape[-1]
    p = k // 2                      # NOTE: matches PyTorch SAME only for odd k.
    HW = H * W

    # Metadata-only for contiguous NCHW: lane-dense minor dim for the reduction.
    x_flat = x.reshape(B, C, HW)

    if channel_tile is None:
        channel_tile = _pick_channel_tile(C, HW, jnp.dtype(x.dtype).itemsize,
                                          tile_budget_bytes)
    channel_tile = int(channel_tile)
    if channel_tile >= C:
        channel_tile = C
    elif channel_tile % 8 != 0:     # keep the block's sublane dim aligned
        channel_tile = min(C, ((channel_tile + 7) // 8) * 8)
    n_c = pl.cdiv(C, channel_tile)

    t_mats = _conv_band_matrices(conv_w, W)                   # (2, k, W+2p, W)

    kernel = functools.partial(
        spatial_attention_kernel, c_total=C, h=H, w=W, ksize=k, pad=p)

    itemsize = jnp.dtype(x.dtype).itemsize
    cost = pl.CostEstimate(
        flops=2 * B * C * HW + B * 2 * k * (2 * H * (W + 2 * p) * W),
        transcendentals=B * HW,
        bytes_accessed=B * C * HW * itemsize + B * HW * itemsize
                       + 2 * k * (W + 2 * p) * W * 4)

    return pl.pallas_call(
        kernel,
        out_shape=jax.ShapeDtypeStruct((B, 1, H, W), x.dtype),
        grid_spec=pltpu.PrefetchScalarGridSpec(
            num_scalar_prefetch=0,
            grid=(B, n_c),                                  # reduction axis last
            in_specs=[
                pl.BlockSpec((1, channel_tile, HW), lambda b, c: (b, c, 0)),
                pl.BlockSpec((2, k, W + 2 * p, W), lambda b, c: (0, 0, 0, 0)),
            ],
            out_specs=pl.BlockSpec((1, 1, H, W), lambda b, c: (b, 0, 0, 0)),
            scratch_shapes=[
                pltpu.VMEM((1, HW), jnp.float32),                     # running sum
                pltpu.VMEM((1, HW), jnp.float32),                     # running max
                pltpu.VMEM((H + 2 * p, W + 2 * p), jnp.float32),      # padded avg
                pltpu.VMEM((H + 2 * p, W + 2 * p), jnp.float32),      # padded max
            ]),
        compiler_params=pltpu.CompilerParams(
            dimension_semantics=("parallel", "arbitrary"),
            vmem_limit_bytes=48 * 1024 * 1024),
        cost_estimate=cost,
    )(x_flat, t_mats)


def spatial_attention_ref(x, conv_w):
    """Pure-JAX reference mirroring the PyTorch forward."""
    xf = x.astype(jnp.float32)
    avg = jnp.mean(xf, axis=1, keepdims=True)
    mx = jnp.max(xf, axis=1, keepdims=True)
    cat = jnp.concatenate([avg, mx], axis=1)                  # (B, 2, H, W)
    out = jax.lax.conv_general_dilated(
        cat, conv_w.astype(jnp.float32),
        window_strides=(1, 1), padding="SAME",
        dimension_numbers=("NCHW", "OIHW", "NCHW"),
        precision=jax.lax.Precision.HIGHEST)
    return jax.nn.sigmoid(out).astype(x.dtype)


if __name__ == "__main__":
    KSIZE = 7
    key = jax.random.PRNGKey(0)
    kx, kw, kx2 = jax.random.split(key, 3)

    conv_w = jax.random.normal(kw, (1, 2, KSIZE, KSIZE), dtype=jnp.float32) * 0.1

    # Case 1: C divisible by the channel tile -> two clean reduction steps.
    B, C, H, W = 2, 16, 16, 16
    x = jax.random.normal(kx, (B, C, H, W), dtype=jnp.float32)
    out = jax.block_until_ready(spatial_attention(x, conv_w, channel_tile=8))
    ref = spatial_attention_ref(x, conv_w)
    assert out.shape == (B, 1, H, W)
    assert jnp.allclose(out, ref, atol=2e-3, rtol=2e-3), "mismatch vs reference"

    # Case 2: ragged C (not a multiple of the tile) -> exercises the masked tail.
    C2 = 12
    x2 = jax.random.normal(kx2, (B, C2, H, W), dtype=jnp.float32)
    out2 = jax.block_until_ready(spatial_attention(x2, conv_w, channel_tile=8))
    ref2 = spatial_attention_ref(x2, conv_w)
    assert jnp.allclose(out2, ref2, atol=2e-3, rtol=2e-3), "mismatch (ragged C)"

    print("KERNEL_OK")
</pallas_src>

<mosaic_0001>
module attributes {stable_mosaic.version = 11 : i64} {
  func.func @spatial_attention_kernel(%arg0: i32, %arg1: i32, %arg2: memref<1x8x256xf32, #tpu.memory_space<vmem>>, %arg3: memref<2x7x22x16xf32, #tpu.memory_space<vmem>>, %arg4: memref<1x1x16x16xf32, #tpu.memory_space<vmem>>, %arg5: memref<1x256xf32, #tpu.memory_space<vmem>>, %arg6: memref<1x256xf32, #tpu.memory_space<vmem>>, %arg7: memref<22x22xf32, #tpu.memory_space<vmem>>, %arg8: memref<22x22xf32, #tpu.memory_space<vmem>>) attributes {dimension_semantics = [#tpu.dimension_semantics<parallel>, #tpu.dimension_semantics<arbitrary>], iteration_bounds = array<i64: 2, 2>, scalar_prefetch = 0 : i64, scratch_operands = 4 : i64, tpu.core_type = #tpu.core_type<tc>, window_params = [{transform_indices = @transform_0, window_bounds = array<i64: 1, 8, 256>}, {pipeline_mode = #tpu.pipeline_mode<synchronous>, transform_indices = @transform_1, window_bounds = array<i64: 2, 7, 22, 16>}, {transform_indices = @transform_2, window_bounds = array<i64: 1, 1, 16, 16>}]} {
    %c0_i32 = arith.constant 0 : i32
    %0 = arith.cmpi eq, %arg1, %c0_i32 : i32
    %1 = arith.extui %0 : i1 to i32
    %c0_i32_0 = arith.constant 0 : i32
    %2 = arith.cmpi ne, %1, %c0_i32_0 : i32
    scf.if %2 {
      %cst_13 = arith.constant 0.000000e+00 : f32
      %18 = vector.broadcast %cst_13 : f32 to vector<1x256xf32>
      %c0_14 = arith.constant 0 : index
      %c0_15 = arith.constant 0 : index
      %19 = vector.load %arg5[%c0_14, %c0_15] : memref<1x256xf32, #tpu.memory_space<vmem>>, vector<1x256xf32>
      tpu.vector_store %arg5[%c0_14, %c0_15], %18 {strides = array<i32>} : memref<1x256xf32, #tpu.memory_space<vmem>>, vector<1x256xf32>,
      %cst_16 = arith.constant 0xFF800000 : f32
      %20 = vector.broadcast %cst_16 : f32 to vector<1x256xf32>
      %c0_17 = arith.constant 0 : index
      %c0_18 = arith.constant 0 : index
      %21 = vector.load %arg6[%c0_17, %c0_18] : memref<1x256xf32, #tpu.memory_space<vmem>>, vector<1x256xf32>
      tpu.vector_store %arg6[%c0_17, %c0_18], %20 {strides = array<i32>} : memref<1x256xf32, #tpu.memory_space<vmem>>, vector<1x256xf32>,
    } else {
    }
    %c0 = arith.constant 0 : index
    %c0_1 = arith.constant 0 : index
    %c0_2 = arith.constant 0 : index
    %3 = vector.load %arg2[%c0, %c0_1, %c0_2] : memref<1x8x256xf32, #tpu.memory_space<vmem>>, vector<1x8x256xf32>
    %4 = vector.shape_cast %3 : vector<1x8x256xf32> to vector<8x256xf32>
    %c0_3 = arith.constant 0 : index
    %c0_4 = arith.constant 0 : index
    %5 = vector.load %arg5[%c0_3, %c0_4] : memref<1x256xf32, #tpu.memory_space<vmem>>, vector<1x256xf32>
    %cst = arith.constant dense<0.000000e+00> : vector<256xf32>
    %6 = vector.multi_reduction <add>, %4, %cst [0] : vector<8x256xf32> to vector<256xf32>
    %7 = vector.shape_cast %6 : vector<256xf32> to vector<1x256xf32>
    %8 = arith.addf %5, %7 : vector<1x256xf32>
    %c0_5 = arith.constant 0 : index
    %c0_6 = arith.constant 0 : index
    %9 = vector.load %arg5[%c0_5, %c0_6] : memref<1x256xf32, #tpu.memory_space<vmem>>, vector<1x256xf32>
    tpu.vector_store %arg5[%c0_5, %c0_6], %8 {strides = array<i32>} : memref<1x256xf32, #tpu.memory_space<vmem>>, vector<1x256xf32>,
    %c0_7 = arith.constant 0 : index
    %c0_8 = arith.constant 0 : index
    %10 = vector.load %arg6[%c0_7, %c0_8] : memref<1x256xf32, #tpu.memory_space<vmem>>, vector<1x256xf32>
    %cst_9 = arith.constant dense<0xFF800000> : vector<256xf32>
    %11 = vector.multi_reduction <maximumf>, %4, %cst_9 [0] : vector<8x256xf32> to vector<256xf32>
    %12 = vector.shape_cast %11 : vector<256xf32> to vector<1x256xf32>
    %13 = arith.maximumf %10, %12 : vector<1x256xf32>
    %c0_10 = arith.constant 0 : index
    %c0_11 = arith.constant 0 : index
    %14 = vector.load %arg6[%c0_10, %c0_11] : memref<1x256xf32, #tpu.memory_space<vmem>>, vector<1x256xf32>
    tpu.vector_store %arg6[%c0_10, %c0_11], %13 {strides = array<i32>} : memref<1x256xf32, #tpu.memory_space<vmem>>, vector<1x256xf32>,
    %c1_i32 = arith.constant 1 : i32
    %15 = arith.cmpi eq, %arg1, %c1_i32 : i32
    %16 = arith.extui %15 : i1 to i32
    %c0_i32_12 = arith.constant 0 : i32
    %17 = arith.cmpi ne, %16, %c0_i32_12 : i32
    scf.if %17 {
      %c0_13 = arith.constant 0 : index
      %c0_14 = arith.constant 0 : index
      %18 = vector.load %arg5[%c0_13, %c0_14] : memref<1x256xf32, #tpu.memory_space<vmem>>, vector<1x256xf32>
      %cst_15 = arith.constant 6.250000e-02 : f32
      %19 = vector.broadcast %cst_15 : f32 to vector<1x256xf32>
      %20 = arith.mulf %18, %19 : vector<1x256xf32>
      %c0_16 = arith.constant 0 : index
      %c0_17 = arith.constant 0 : index
      %21 = vector.load %arg6[%c0_16, %c0_17] : memref<1x256xf32, #tpu.memory_space<vmem>>, vector<1x256xf32>
      %cst_18 = arith.constant 0.000000e+00 : f32
      %22 = vector.broadcast %cst_18 : f32 to vector<22x22xf32>
      %c0_19 = arith.constant 0 : index
      %c0_20 = arith.constant 0 : index
      %23 = vector.load %arg7[%c0_19, %c0_20] : memref<22x22xf32, #tpu.memory_space<vmem>>, vector<22x22xf32>
      tpu.vector_store %arg7[%c0_19, %c0_20], %22 {strides = array<i32>} : memref<22x22xf32, #tpu.memory_space<vmem>>, vector<22x22xf32>,
      %cst_21 = arith.constant 0.000000e+00 : f32
      %24 = vector.broadcast %cst_21 : f32 to vector<22x22xf32>
      %c0_22 = arith.constant 0 : index
      %c0_23 = arith.constant 0 : index
      %25 = vector.load %arg8[%c0_22, %c0_23] : memref<22x22xf32, #tpu.memory_space<vmem>>, vector<22x22xf32>
      tpu.vector_store %arg8[%c0_22, %c0_23], %24 {strides = array<i32>} : memref<22x22xf32, #tpu.memory_space<vmem>>, vector<22x22xf32>,
      %26 = vector.extract_strided_slice %20 {offsets = [0, 0], sizes = [1, 16], strides = [1, 1]} : vector<1x256xf32> to vector<1x16xf32>
      %c3 = arith.constant 3 : index
      %c3_24 = arith.constant 3 : index
      %27 = vector.load %arg7[%c3, %c3_24] : memref<22x22xf32, #tpu.memory_space<vmem>>, vector<1x16xf32>
      tpu.vector_store %arg7[%c3, %c3_24], %26 {strides = array<i32>} : memref<22x22xf32, #tpu.memory_space<vmem>>, vector<1x16xf32>,
      %28 = vector.extract_strided_slice %21 {offsets = [0, 0], sizes = [1, 16], strides = [1, 1]} : vector<1x256xf32> to vector<1x16xf32>
      %c3_25 = arith.constant 3 : index
      %c3_26 = arith.constant 3 : index
      %29 = vector.load %arg8[%c3_25, %c3_26] : memref<22x22xf32, #tpu.memory_space<vmem>>, vector<1x16xf32>
      tpu.vector_store %arg8[%c3_25, %c3_26], %28 {strides = array<i32>} : memref<22x22xf32, #tpu.memory_space<vmem>>, vector<1x16xf32>,
      %30 = vector.extract_strided_slice %20 {offsets = [0, 16], sizes = [1, 16], strides = [1, 1]} : vector<1x256xf32> to vector<1x16xf32>
      %c4 = arith.constant 4 : index
      %c3_27 = arith.constant 3 : index
      %31 = vector.load %arg7[%c4, %c3_27] : memref<22x22xf32, #tpu.memory_space<vmem>>, vector<1x16xf32>
      tpu.vector_store %arg7[%c4, %c3_27], %30 {strides = array<i32>} : memref<22x22xf32, #tpu.memory_space<vmem>>, vector<1x16xf32>,
      %32 = vector.extract_strided_slice %21 {offsets = [0, 16], sizes = [1, 16], strides = [1, 1]} : vector<1x256xf32> to vector<1x16xf32>
      %c4_28 = arith.constant 4 : index
      %c3_29 = arith.constant 3 : index
      %33 = vector.load %arg8[%c4_28, %c3_29] : memref<22x22xf32, #tpu.memory_space<vmem>>, vector<1x16xf32>
      tpu.vector_store %arg8[%c4_28, %c3_29], %32 {strides = array<i32>} : memref<22x22xf32, #tpu.memory_space<vmem>>, vector<1x16xf32>,
      %34 = vector.extract_strided_slice %20 {offsets = [0, 32], sizes = [1, 16], strides = [1, 1]} : vector<1x256xf32> to vector<1x16xf32>
      %c5 = arith.constant 5 : index
      %c3_30 = arith.constant 3 : index
      %35 = vector.load %arg7[%c5, %c3_30] : memref<22x22xf32, #tpu.memory_space<vmem>>, vector<1x16xf32>
      tpu.vector_store %arg7[%c5, %c3_30], %34 {strides = array<i32>} : memref<22x22xf32, #tpu.memory_space<vmem>>, vector<1x16xf32>,
      %36 = vector.extract_strided_slice %21 {offsets = [0, 32], sizes = [1, 16], strides = [1, 1]} : vector<1x256xf32> to vector<1x16xf32>
      %c5_31 = arith.constant 5 : index
      %c3_32 = arith.constant 3 : index
      %37 = vector.load %arg8[%c5_31, %c3_32] : memref<22x22xf32, #tpu.memory_space<vmem>>, vector<1x16xf32>
      tpu.vector_store %arg8[%c5_31, %c3_32], %36 {strides = array<i32>} : memref<22x22xf32, #tpu.memory_space<vmem>>, vector<1x16xf32>,
      %38 = vector.extract_strided_slice %20 {offsets = [0, 48], sizes = [1, 16], strides = [1, 1]} : vector<1x256xf32> to vector<1x16xf32>
      %c6 = arith.constant 6 : index
      %c3_33 = arith.constant 3 : index
      %39 = vector.load %arg7[%c6, %c3_33] : memref<22x22xf32, #tpu.memory_space<vmem>>, vector<1x16xf32>
      tpu.vector_store %arg7[%c6, %c3_33], %38 {strides = array<i32>} : memref<22x22xf32, #tpu.memory_space<vmem>>, vector<1x16xf32>,
      %40 = vector.extract_strided_slice %21 {offsets = [0, 48], sizes = [1, 16], strides = [1, 1]} : vector<1x256xf32> to vector<1x16xf32>
      %c6_34 = arith.constant 6 : index
      %c3_35 = arith.constant 3 : index
      %41 = vector.load %arg8[%c6_34, %c3_35] : memref<22x22xf32, #tpu.memory_space<vmem>>, vector<1x16xf32>
      tpu.vector_store %arg8[%c6_34, %c3_35], %40 {strides = array<i32>} : memref<22x22xf32, #tpu.memory_space<vmem>>, vector<1x16xf32>,
      %42 = vector.extract_strided_slice %20 {offsets = [0, 64], sizes = [1, 16], strides = [1, 1]} : vector<1x256xf32> to vector<1x16xf32>
      %c7 = arith.constant 7 : index
      %c3_36 = arith.constant 3 : index
      %43 = vector.load %arg7[%c7, %c3_36] : memref<22x22xf32, #tpu.memory_space<vmem>>, vector<1x16xf32>
      tpu.vector_store %arg7[%c7, %c3_36], %42 {strides = array<i32>} : memref<22x22xf32, #tpu.memory_space<vmem>>, vector<1x16xf32>,
      %44 = vector.extract_strided_slice %21 {offsets = [0, 64], sizes = [1, 16], strides = [1, 1]} : vector<1x256xf32> to vector<1x16xf32>
      %c7_37 = arith.constant 7 : index
      %c3_38 = arith.constant 3 : index
      %45 = vector.load %arg8[%c7_37, %c3_38] : memref<22x22xf32, #tpu.memory_space<vmem>>, vector<1x16xf32>
      tpu.vector_store %arg8[%c7_37, %c3_38], %44 {strides = array<i32>} : memref<22x22xf32, #tpu.memory_space<vmem>>, vector<1x16xf32>,
      %46 = vector.extract_strided_slice %20 {offsets = [0, 80], sizes = [1, 16], strides = [1, 1]} : vector<1x256xf32> to vector<1x16xf32>
      %c8 = arith.constant 8 : index
      %c3_39 = arith.constant 3 : index
      %47 = vector.load %arg7[%c8, %c3_39] : memref<22x22xf32, #tpu.memory_space<vmem>>, vector<1x16xf32>
      tpu.vector_store %arg7[%c8, %c3_39], %46 {strides = array<i32>} : memref<22x22xf32, #tpu.memory_space<vmem>>, vector<1x16xf32>,
      %48 = vector.extract_strided_slice %21 {offsets = [0, 80], sizes = [1, 16], strides = [1, 1]} : vector<1x256xf32> to vector<1x16xf32>
      %c8_40 = arith.constant 8 : index
      %c3_41 = arith.constant 3 : index
      %49 = vector.load %arg8[%c8_40, %c3_41] : memref<22x22xf32, #tpu.memory_space<vmem>>, vector<1x16xf32>
      tpu.vector_store %arg8[%c8_40, %c3_41], %48 {strides = array<i32>} : memref<22x22xf32, #tpu.memory_space<vmem>>, vector<1x16xf32>,
      %50 = vector.extract_strided_slice %20 {offsets = [0, 96], sizes = [1, 16], strides = [1, 1]} : vector<1x256xf32> to vector<1x16xf32>
      %c9 = arith.constant 9 : index
      %c3_42 = arith.constant 3 : index
      %51 = vector.load %arg7[%c9, %c3_42] : memref<22x22xf32, #tpu.memory_space<vmem>>, vector<1x16xf32>
      tpu.vector_store %arg7[%c9, %c3_42], %50 {strides = array<i32>} : memref<22x22xf32, #tpu.memory_space<vmem>>, vector<1x16xf32>,
      %52 = vector.extract_strided_slice %21 {offsets = [0, 96], sizes = [1, 16], strides = [1, 1]} : vector<1x256xf32> to vector<1x16xf32>
      %c9_43 = arith.constant 9 : index
      %c3_44 = arith.constant 3 : index
      %53 = vector.load %arg8[%c9_43, %c3_44] : memref<22x22xf32, #tpu.memory_space<vmem>>, vector<1x16xf32>
      tpu.vector_store %arg8[%c9_43, %c3_44], %52 {strides = array<i32>} : memref<22x22xf32, #tpu.memory_space<vmem>>, vector<1x16xf32>,
      %54 = vector.extract_strided_slice %20 {offsets = [0, 112], sizes = [1, 16], strides = [1, 1]} : vector<1x256xf32> to vector<1x16xf32>
      %c10 = arith.constant 10 : index
      %c3_45 = arith.constant 3 : index
      %55 = vector.load %arg7[%c10, %c3_45] : memref<22x22xf32, #tpu.memory_space<vmem>>, vector<1x16xf32>
      tpu.vector_store %arg7[%c10, %c3_45], %54 {strides = array<i32>} : memref<22x22xf32, #tpu.memory_space<vmem>>, vector<1x16xf32>,
      %56 = vector.extract_strided_slice %21 {offsets = [0, 112], sizes = [1, 16], strides = [1, 1]} : vector<1x256xf32> to vector<1x16xf32>
      %c10_46 = arith.constant 10 : index
      %c3_47 = arith.constant 3 : index
      %57 = vector.load %arg8[%c10_46, %c3_47] : memref<22x22xf32, #tpu.memory_space<vmem>>, vector<1x16xf32>
      tpu.vector_store %arg8[%c10_46, %c3_47], %56 {strides = array<i32>} : memref<22x22xf32, #tpu.memory_space<vmem>>, vector<1x16xf32>,
      %58 = vector.extract_strided_slice %20 {offsets = [0, 128], sizes = [1, 16], strides = [1, 1]} : vector<1x256xf32> to vector<1x16xf32>
      %c11 = arith.constant 11 : index
      %c3_48 = arith.constant 3 : index
      %59 = vector.load %arg7[%c11, %c3_48] : memref<22x22xf32, #tpu.memory_space<vmem>>, vector<1x16xf32>
      tpu.vector_store %arg7[%c11, %c3_48], %58 {strides = array<i32>} : memref<22x22xf32, #tpu.memory_space<vmem>>, vector<1x16xf32>,
      %60 = vector.extract_strided_slice %21 {offsets = [0, 128], sizes = [1, 16], strides = [1, 1]} : vector<1x256xf32> to vector<1x16xf32>
      %c11_49 = arith.constant 11 : index
      %c3_50 = arith.constant 3 : index
      %61 = vector.load %arg8[%c11_49, %c3_50] : memref<22x22xf32, #tpu.memory_space<vmem>>, vector<1x16xf32>
      tpu.vector_store %arg8[%c11_49, %c3_50], %60 {strides = array<i32>} : memref<22x22xf32, #tpu.memory_space<vmem>>, vector<1x16xf32>,
      %62 = vector.extract_strided_slice %20 {offsets = [0, 144], sizes = [1, 16], strides = [1, 1]} : vector<1x256xf32> to vector<1x16xf32>
      %c12 = arith.constant 12 : index
      %c3_51 = arith.constant 3 : index
      %63 = vector.load %arg7[%c12, %c3_51] : memref<22x22xf32, #tpu.memory_space<vmem>>, vector<1x16xf32>
      tpu.vector_store %arg7[%c12, %c3_51], %62 {strides = array<i32>} : memref<22x22xf32, #tpu.memory_space<vmem>>, vector<1x16xf32>,
      %64 = vector.extract_strided_slice %21 {offsets = [0, 144], sizes = [1, 16], strides = [1, 1]} : vector<1x256xf32> to vector<1x16xf32>
      %c12_52 = arith.constant 12 : index
      %c3_53 = arith.constant 3 : index
      %65 = vector.load %arg8[%c12_52, %c3_53] : memref<22x22xf32, #tpu.memory_space<vmem>>, vector<1x16xf32>
      tpu.vector_store %arg8[%c12_52, %c3_53], %64 {strides = array<i32>} : memref<22x22xf32, #tpu.memory_space<vmem>>, vector<1x16xf32>,
      %66 = vector.extract_strided_slice %20 {offsets = [0, 160], sizes = [1, 16], strides = [1, 1]} : vector<1x256xf32> to vector<1x16xf32>
      %c13 = arith.constant 13 : index
      %c3_54 = arith.constant 3 : index
      %67 = vector.load %arg7[%c13, %c3_54] : memref<22x22xf32, #tpu.memory_space<vmem>>, vector<1x16xf32>
      tpu.vector_store %arg7[%c13, %c3_54], %66 {strides = array<i32>} : memref<22x22xf32, #tpu.memory_space<vmem>>, vector<1x16xf32>,
      %68 = vector.extract_strided_slice %21 {offsets = [0, 160], sizes = [1, 16], strides = [1, 1]} : vector<1x256xf32> to vector<1x16xf32>
      %c13_55 = arith.constant 13 : index
      %c3_56 = arith.constant 3 : index
      %69 = vector.load %arg8[%c13_55, %c3_56] : memref<22x22xf32, #tpu.memory_space<vmem>>, vector<1x16xf32>
      tpu.vector_store %arg8[%c13_55, %c3_56], %68 {strides = array<i32>} : memref<22x22xf32, #tpu.memory_space<vmem>>, vector<1x16xf32>,
      %70 = vector.extract_strided_slice %20 {offsets = [0, 176], sizes = [1, 16], strides = [1, 1]} : vector<1x256xf32> to vector<1x16xf32>
      %c14 = arith.constant 14 : index
      %c3_57 = arith.constant 3 : index
      %71 = vector.load %arg7[%c14, %c3_57] : memref<22x22xf32, #tpu.memory_space<vmem>>, vector<1x16xf32>
      tpu.vector_store %arg7[%c14, %c3_57], %70 {strides = array<i32>} : memref<22x22xf32, #tpu.memory_space<vmem>>, vector<1x16xf32>,
      %72 = vector.extract_strided_slice %21 {offsets = [0, 176], sizes = [1, 16], strides = [1, 1]} : vector<1x256xf32> to vector<1x16xf32>
      %c14_58 = arith.constant 14 : index
      %c3_59 = arith.constant 3 : index
      %73 = vector.load %arg8[%c14_58, %c3_59] : memref<22x22xf32, #tpu.memory_space<vmem>>, vector<1x16xf32>
      tpu.vector_store %arg8[%c14_58, %c3_59], %72 {strides = array<i32>} : memref<22x22xf32, #tpu.memory_space<vmem>>, vector<1x16xf32>,
      %74 = vector.extract_strided_slice %20 {offsets = [0, 192], sizes = [1, 16], strides = [1, 1]} : vector<1x256xf32> to vector<1x16xf32>
      %c15 = arith.constant 15 : index
      %c3_60 = arith.constant 3 : index
      %75 = vector.load %arg7[%c15, %c3_60] : memref<22x22xf32, #tpu.memory_space<vmem>>, vector<1x16xf32>
      tpu.vector_store %arg7[%c15, %c3_60], %74 {strides = array<i32>} : memref<22x22xf32, #tpu.memory_space<vmem>>, vector<1x16xf32>,
      %76 = vector.extract_strided_slice %21 {offsets = [0, 192], sizes = [1, 16], strides = [1, 1]} : vector<1x256xf32> to vector<1x16xf32>
      %c15_61 = arith.constant 15 : index
      %c3_62 = arith.constant 3 : index
      %77 = vector.load %arg8[%c15_61, %c3_62] : memref<22x22xf32, #tpu.memory_space<vmem>>, vector<1x16xf32>
      tpu.vector_store %arg8[%c15_61, %c3_62], %76 {strides = array<i32>} : memref<22x22xf32, #tpu.memory_space<vmem>>, vector<1x16xf32>,
      %78 = vector.extract_strided_slice %20 {offsets = [0, 208], sizes = [1, 16], strides = [1, 1]} : vector<1x256xf32> to vector<1x16xf32>
      %c16 = arith.constant 16 : index
      %c3_63 = arith.constant 3 : index
      %79 = vector.load %arg7[%c16, %c3_63] : memref<22x22xf32, #tpu.memory_space<vmem>>, vector<1x16xf32>
      tpu.vector_store %arg7[%c16, %c3_63], %78 {strides = array<i32>} : memref<22x22xf32, #tpu.memory_space<vmem>>, vector<1x16xf32>,
      %80 = vector.extract_strided_slice %21 {offsets = [0, 208], sizes = [1, 16], strides = [1, 1]} : vector<1x256xf32> to vector<1x16xf32>
      %c16_64 = arith.constant 16 : index
      %c3_65 = arith.constant 3 : index
      %81 = vector.load %arg8[%c16_64, %c3_65] : memref<22x22xf32, #tpu.memory_space<vmem>>, vector<1x16xf32>
      tpu.vector_store %arg8[%c16_64, %c3_65], %80 {strides = array<i32>} : memref<22x22xf32, #tpu.memory_space<vmem>>, vector<1x16xf32>,
      %82 = vector.extract_strided_slice %20 {offsets = [0, 224], sizes = [1, 16], strides = [1, 1]} : vector<1x256xf32> to vector<1x16xf32>
      %c17 = arith.constant 17 : index
      %c3_66 = arith.constant 3 : index
      %83 = vector.load %arg7[%c17, %c3_66] : memref<22x22xf32, #tpu.memory_space<vmem>>, vector<1x16xf32>
      tpu.vector_store %arg7[%c17, %c3_66], %82 {strides = array<i32>} : memref<22x22xf32, #tpu.memory_space<vmem>>, vector<1x16xf32>,
      %84 = vector.extract_strided_slice %21 {offsets = [0, 224], sizes = [1, 16], strides = [1, 1]} : vector<1x256xf32> to vector<1x16xf32>
      %c17_67 = arith.constant 17 : index
      %c3_68 = arith.constant 3 : index
      %85 = vector.load %arg8[%c17_67, %c3_68] : memref<22x22xf32, #tpu.memory_space<vmem>>, vector<1x16xf32>
      tpu.vector_store %arg8[%c17_67, %c3_68], %84 {strides = array<i32>} : memref<22x22xf32, #tpu.memory_space<vmem>>, vector<1x16xf32>,
      %86 = vector.extract_strided_slice %20 {offsets = [0, 240], sizes = [1, 16], strides = [1, 1]} : vector<1x256xf32> to vector<1x16xf32>
      %c18 = arith.constant 18 : index
      %c3_69 = arith.constant 3 : index
      %87 = vector.load %arg7[%c18, %c3_69] : memref<22x22xf32, #tpu.memory_space<vmem>>, vector<1x16xf32>
      tpu.vector_store %arg7[%c18, %c3_69], %86 {strides = array<i32>} : memref<22x22xf32, #tpu.memory_space<vmem>>, vector<1x16xf32>,
      %88 = vector.extract_strided_slice %21 {offsets = [0, 240], sizes = [1, 16], strides = [1, 1]} : vector<1x256xf32> to vector<1x16xf32>
      %c18_70 = arith.constant 18 : index
      %c3_71 = arith.constant 3 : index
      %89 = vector.load %arg8[%c18_70, %c3_71] : memref<22x22xf32, #tpu.memory_space<vmem>>, vector<1x16xf32>
      tpu.vector_store %arg8[%c18_70, %c3_71], %88 {strides = array<i32>} : memref<22x22xf32, #tpu.memory_space<vmem>>, vector<1x16xf32>,
      %cst_72 = arith.constant 0.000000e+00 : f32
      %90 = vector.broadcast %cst_72 : f32 to vector<16x16xf32>
      %c0_73 = arith.constant 0 : index
      %c0_74 = arith.constant 0 : index
      %91 = vector.load %arg7[%c0_73, %c0_74] : memref<22x22xf32, #tpu.memory_space<vmem>>, vector<16x22xf32>
      %c0_75 = arith.constant 0 : index
      %c0_76 = arith.constant 0 : index
      %c0_77 = arith.constant 0 : index
      %c0_78 = arith.constant 0 : index
      %92 = vector.load %arg3[%c0_75, %c0_76, %c0_77, %c0_78] : memref<2x7x22x16xf32, #tpu.memory_space<vmem>>, vector<1x1x22x16xf32>
      %93 = vector.shape_cast %92 : vector<1x1x22x16xf32> to vector<22x16xf32>
      %cst_79 = arith.constant dense<0.000000e+00> : vector<16x16xf32>
      %94 = tpu.matmul %91, %93, %cst_79 {dimension_numbers = #tpu.dot_dimension_numbers<[1], [0], [0], [1], [0, 0, 1, 1], [], []>, precision = #tpu.contract_precision<fp32>} : vector<16x22xf32>, vector<22x16xf32>, vector<16x16xf32> -> vector<16x16xf32>
      %95 = arith.addf %90, %94 : vector<16x16xf32>
      %c0_80 = arith.constant 0 : index
      %c0_81 = arith.constant 0 : index
      %96 = vector.load %arg8[%c0_80, %c0_81] : memref<22x22xf32, #tpu.memory_space<vmem>>, vector<16x22xf32>
      %c1 = arith.constant 1 : index
      %c0_82 = arith.constant 0 : index
      %c0_83 = arith.constant 0 : index
      %c0_84 = arith.constant 0 : index
      %97 = vector.load %arg3[%c1, %c0_82, %c0_83, %c0_84] : memref<2x7x22x16xf32, #tpu.memory_space<vmem>>, vector<1x1x22x16xf32>
      %98 = vector.shape_cast %97 : vector<1x1x22x16xf32> to vector<22x16xf32>
      %cst_85 = arith.constant dense<0.000000e+00> : vector<16x16xf32>
      %99 = tpu.matmul %96, %98, %cst_85 {dimension_numbers = #tpu.dot_dimension_numbers<[1], [0], [0], [1], [0, 0, 1, 1], [], []>, precision = #tpu.contract_precision<fp32>} : vector<16x22xf32>, vector<22x16xf32>, vector<16x16xf32> -> vector<16x16xf32>
      %100 = arith.addf %95, %99 : vector<16x16xf32>
      %c1_86 = arith.constant 1 : index
      %c0_87 = arith.constant 0 : index
      %101 = vector.load %arg7[%c1_86, %c0_87] : memref<22x22xf32, #tpu.memory_space<vmem>>, vector<16x22xf32>
      %c0_88 = arith.constant 0 : index
      %c1_89 = arith.constant 1 : index
      %c0_90 = arith.constant 0 : index
      %c0_91 = arith.constant 0 : index
      %102 = vector.load %arg3[%c0_88, %c1_89, %c0_90, %c0_91] : memref<2x7x22x16xf32, #tpu.memory_space<vmem>>, vector<1x1x22x16xf32>
      %103 = vector.shape_cast %102 : vector<1x1x22x16xf32> to vector<22x16xf32>
      %cst_92 = arith.constant dense<0.000000e+00> : vector<16x16xf32>
      %104 = tpu.matmul %101, %103, %cst_92 {dimension_numbers = #tpu.dot_dimension_numbers<[1], [0], [0], [1], [0, 0, 1, 1], [], []>, precision = #tpu.contract_precision<fp32>} : vector<16x22xf32>, vector<22x16xf32>, vector<16x16xf32> -> vector<16x16xf32>
      %105 = arith.addf %100, %104 : vector<16x16xf32>
      %c1_93 = arith.constant 1 : index
      %c0_94 = arith.constant 0 : index
      %106 = vector.load %arg8[%c1_93, %c0_94] : memref<22x22xf32, #tpu.memory_space<vmem>>, vector<16x22xf32>
      %c1_95 = arith.constant 1 : index
      %c1_96 = arith.constant 1 : index
      %c0_97 = arith.constant 0 : index
      %c0_98 = arith.constant 0 : index
      %107 = vector.load %arg3[%c1_95, %c1_96, %c0_97, %c0_98] : memref<2x7x22x16xf32, #tpu.memory_space<vmem>>, vector<1x1x22x16xf32>
      %108 = vector.shape_cast %107 : vector<1x1x22x16xf32> to vector<22x16xf32>
      %cst_99 = arith.constant dense<0.000000e+00> : vector<16x16xf32>
      %109 = tpu.matmul %106, %108, %cst_99 {dimension_numbers = #tpu.dot_dimension_numbers<[1], [0], [0], [1], [0, 0, 1, 1], [], []>, precision = #tpu.contract_precision<fp32>} : vector<16x22xf32>, vector<22x16xf32>, vector<16x16xf32> -> vector<16x16xf32>
      %110 = arith.addf %105, %109 : vector<16x16xf32>
      %c2 = arith.constant 2 : index
      %c0_100 = arith.constant 0 : index
      %111 = vector.load %arg7[%c2, %c0_100] : memref<22x22xf32, #tpu.memory_space<vmem>>, vector<16x22xf32>
      %c0_101 = arith.constant 0 : index
      %c2_102 = arith.constant 2 : index
      %c0_103 = arith.constant 0 : index
      %c0_104 = arith.constant 0 : index
      %112 = vector.load %arg3[%c0_101, %c2_102, %c0_103, %c0_104] : memref<2x7x22x16xf32, #tpu.memory_space<vmem>>, vector<1x1x22x16xf32>
      %113 = vector.shape_cast %112 : vector<1x1x22x16xf32> to vector<22x16xf32>
      %cst_105 = arith.constant dense<0.000000e+00> : vector<16x16xf32>
      %114 = tpu.matmul %111, %113, %cst_105 {dimension_numbers = #tpu.dot_dimension_numbers<[1], [0], [0], [1], [0, 0, 1, 1], [], []>, precision = #tpu.contract_precision<fp32>} : vector<16x22xf32>, vector<22x16xf32>, vector<16x16xf32> -> vector<16x16xf32>
      %115 = arith.addf %110, %114 : vector<16x16xf32>
      %c2_106 = arith.constant 2 : index
      %c0_107 = arith.constant 0 : index
      %116 = vector.load %arg8[%c2_106, %c0_107] : memref<22x22xf32, #tpu.memory_space<vmem>>, vector<16x22xf32>
      %c1_108 = arith.constant 1 : index
      %c2_109 = arith.constant 2 : index
      %c0_110 = arith.constant 0 : index
      %c0_111 = arith.constant 0 : index
      %117 = vector.load %arg3[%c1_108, %c2_109, %c0_110, %c0_111] : memref<2x7x22x16xf32, #tpu.memory_space<vmem>>, vector<1x1x22x16xf32>
      %118 = vector.shape_cast %117 : vector<1x1x22x16xf32> to vector<22x16xf32>
      %cst_112 = arith.constant dense<0.000000e+00> : vector<16x16xf32>
      %119 = tpu.matmul %116, %118, %cst_112 {dimension_numbers = #tpu.dot_dimension_numbers<[1], [0], [0], [1], [0, 0, 1, 1], [], []>, precision = #tpu.contract_precision<fp32>} : vector<16x22xf32>, vector<22x16xf32>, vector<16x16xf32> -> vector<16x16xf32>
      %120 = arith.addf %115, %119 : vector<16x16xf32>
      %c3_113 = arith.constant 3 : index
      %c0_114 = arith.constant 0 : index
      %121 = vector.load %arg7[%c3_113, %c0_114] : memref<22x22xf32, #tpu.memory_space<vmem>>, vector<16x22xf32>
      %c0_115 = arith.constant 0 : index
      %c3_116 = arith.constant 3 : index
      %c0_117 = arith.constant 0 : index
      %c0_118 = arith.constant 0 : index
      %122 = vector.load %arg3[%c0_115, %c3_116, %c0_117, %c0_118] : memref<2x7x22x16xf32, #tpu.memory_space<vmem>>, vector<1x1x22x16xf32>
      %123 = vector.shape_cast %122 : vector<1x1x22x16xf32> to vector<22x16xf32>
      %cst_119 = arith.constant dense<0.000000e+00> : vector<16x16xf32>
      %124 = tpu.matmul %121, %123, %cst_119 {dimension_numbers = #tpu.dot_dimension_numbers<[1], [0], [0], [1], [0, 0, 1, 1], [], []>, precision = #tpu.contract_precision<fp32>} : vector<16x22xf32>, vector<22x16xf32>, vector<16x16xf32> -> vector<16x16xf32>
      %125 = arith.addf %120, %124 : vector<16x16xf32>
      %c3_120 = arith.constant 3 : index
      %c0_121 = arith.constant 0 : index
      %126 = vector.load %arg8[%c3_120, %c0_121] : memref<22x22xf32, #tpu.memory_space<vmem>>, vector<16x22xf32>
      %c1_122 = arith.constant 1 : index
      %c3_123 = arith.constant 3 : index
      %c0_124 = arith.constant 0 : index
      %c0_125 = arith.constant 0 : index
      %127 = vector.load %arg3[%c1_122, %c3_123, %c0_124, %c0_125] : memref<2x7x22x16xf32, #tpu.memory_space<vmem>>, vector<1x1x22x16xf32>
      %128 = vector.shape_cast %127 : vector<1x1x22x16xf32> to vector<22x16xf32>
      %cst_126 = arith.constant dense<0.000000e+00> : vector<16x16xf32>
      %129 = tpu.matmul %126, %128, %cst_126 {dimension_numbers = #tpu.dot_dimension_numbers<[1], [0], [0], [1], [0, 0, 1, 1], [], []>, precision = #tpu.contract_precision<fp32>} : vector<16x22xf32>, vector<22x16xf32>, vector<16x16xf32> -> vector<16x16xf32>
      %130 = arith.addf %125, %129 : vector<16x16xf32>
      %c4_127 = arith.constant 4 : index
      %c0_128 = arith.constant 0 : index
      %131 = vector.load %arg7[%c4_127, %c0_128] : memref<22x22xf32, #tpu.memory_space<vmem>>, vector<16x22xf32>
      %c0_129 = arith.constant 0 : index
      %c4_130 = arith.constant 4 : index
      %c0_131 = arith.constant 0 : index
      %c0_132 = arith.constant 0 : index
      %132 = vector.load %arg3[%c0_129, %c4_130, %c0_131, %c0_132] : memref<2x7x22x16xf32, #tpu.memory_space<vmem>>, vector<1x1x22x16xf32>
      %133 = vector.shape_cast %132 : vector<1x1x22x16xf32> to vector<22x16xf32>
      %cst_133 = arith.constant dense<0.000000e+00> : vector<16x16xf32>
      %134 = tpu.matmul %131, %133, %cst_133 {dimension_numbers = #tpu.dot_dimension_numbers<[1], [0], [0], [1], [0, 0, 1, 1], [], []>, precision = #tpu.contract_precision<fp32>} : vector<16x22xf32>, vector<22x16xf32>, vector<16x16xf32> -> vector<16x16xf32>
      %135 = arith.addf %130, %134 : vector<16x16xf32>
      %c4_134 = arith.constant 4 : index
      %c0_135 = arith.constant 0 : index
      %136 = vector.load %arg8[%c4_134, %c0_135] : memref<22x22xf32, #tpu.memory_space<vmem>>, vector<16x22xf32>
      %c1_136 = arith.constant 1 : index
      %c4_137 = arith.constant 4 : index
      %c0_138 = arith.constant 0 : index
      %c0_139 = arith.constant 0 : index
      %137 = vector.load %arg3[%c1_136, %c4_137, %c0_138, %c0_139] : memref<2x7x22x16xf32, #tpu.memory_space<vmem>>, vector<1x1x22x16xf32>
      %138 = vector.shape_cast %137 : vector<1x1x22x16xf32> to vector<22x16xf32>
      %cst_140 = arith.constant dense<0.000000e+00> : vector<16x16xf32>
      %139 = tpu.matmul %136, %138, %cst_140 {dimension_numbers = #tpu.dot_dimension_numbers<[1], [0], [0], [1], [0, 0, 1, 1], [], []>, precision = #tpu.contract_precision<fp32>} : vector<16x22xf32>, vector<22x16xf32>, vector<16x16xf32> -> vector<16x16xf32>
      %140 = arith.addf %135, %139 : vector<16x16xf32>
      %c5_141 = arith.constant 5 : index
      %c0_142 = arith.constant 0 : index
      %141 = vector.load %arg7[%c5_141, %c0_142] : memref<22x22xf32, #tpu.memory_space<vmem>>, vector<16x22xf32>
      %c0_143 = arith.constant 0 : index
      %c5_144 = arith.constant 5 : index
      %c0_145 = arith.constant 0 : index
      %c0_146 = arith.constant 0 : index
      %142 = vector.load %arg3[%c0_143, %c5_144, %c0_145, %c0_146] : memref<2x7x22x16xf32, #tpu.memory_space<vmem>>, vector<1x1x22x16xf32>
      %143 = vector.shape_cast %142 : vector<1x1x22x16xf32> to vector<22x16xf32>
      %cst_147 = arith.constant dense<0.000000e+00> : vector<16x16xf32>
      %144 = tpu.matmul %141, %143, %cst_147 {dimension_numbers = #tpu.dot_dimension_numbers<[1], [0], [0], [1], [0, 0, 1, 1], [], []>, precision = #tpu.contract_precision<fp32>} : vector<16x22xf32>, vector<22x16xf32>, vector<16x16xf32> -> vector<16x16xf32>
      %145 = arith.addf %140, %144 : vector<16x16xf32>
      %c5_148 = arith.constant 5 : index
      %c0_149 = arith.constant 0 : index
      %146 = vector.load %arg8[%c5_148, %c0_149] : memref<22x22xf32, #tpu.memory_space<vmem>>, vector<16x22xf32>
      %c1_150 = arith.constant 1 : index
      %c5_151 = arith.constant 5 : index
      %c0_152 = arith.constant 0 : index
      %c0_153 = arith.constant 0 : index
      %147 = vector.load %arg3[%c1_150, %c5_151, %c0_152, %c0_153] : memref<2x7x22x16xf32, #tpu.memory_space<vmem>>, vector<1x1x22x16xf32>
      %148 = vector.shape_cast %147 : vector<1x1x22x16xf32> to vector<22x16xf32>
      %cst_154 = arith.constant dense<0.000000e+00> : vector<16x16xf32>
      %149 = tpu.matmul %146, %148, %cst_154 {dimension_numbers = #tpu.dot_dimension_numbers<[1], [0], [0], [1], [0, 0, 1, 1], [], []>, precision = #tpu.contract_precision<fp32>} : vector<16x22xf32>, vector<22x16xf32>, vector<16x16xf32> -> vector<16x16xf32>
      %150 = arith.addf %145, %149 : vector<16x16xf32>
      %c6_155 = arith.constant 6 : index
      %c0_156 = arith.constant 0 : index
      %151 = vector.load %arg7[%c6_155, %c0_156] : memref<22x22xf32, #tpu.memory_space<vmem>>, vector<16x22xf32>
      %c0_157 = arith.constant 0 : index
      %c6_158 = arith.constant 6 : index
      %c0_159 = arith.constant 0 : index
      %c0_160 = arith.constant 0 : index
      %152 = vector.load %arg3[%c0_157, %c6_158, %c0_159, %c0_160] : memref<2x7x22x16xf32, #tpu.memory_space<vmem>>, vector<1x1x22x16xf32>
      %153 = vector.shape_cast %152 : vector<1x1x22x16xf32> to vector<22x16xf32>
      %cst_161 = arith.constant dense<0.000000e+00> : vector<16x16xf32>
      %154 = tpu.matmul %151, %153, %cst_161 {dimension_numbers = #tpu.dot_dimension_numbers<[1], [0], [0], [1], [0, 0, 1, 1], [], []>, precision = #tpu.contract_precision<fp32>} : vector<16x22xf32>, vector<22x16xf32>, vector<16x16xf32> -> vector<16x16xf32>
      %155 = arith.addf %150, %154 : vector<16x16xf32>
      %c6_162 = arith.constant 6 : index
      %c0_163 = arith.constant 0 : index
      %156 = vector.load %arg8[%c6_162, %c0_163] : memref<22x22xf32, #tpu.memory_space<vmem>>, vector<16x22xf32>
      %c1_164 = arith.constant 1 : index
      %c6_165 = arith.constant 6 : index
      %c0_166 = arith.constant 0 : index
      %c0_167 = arith.constant 0 : index
      %157 = vector.load %arg3[%c1_164, %c6_165, %c0_166, %c0_167] : memref<2x7x22x16xf32, #tpu.memory_space<vmem>>, vector<1x1x22x16xf32>
      %158 = vector.shape_cast %157 : vector<1x1x22x16xf32> to vector<22x16xf32>
      %cst_168 = arith.constant dense<0.000000e+00> : vector<16x16xf32>
      %159 = tpu.matmul %156, %158, %cst_168 {dimension_numbers = #tpu.dot_dimension_numbers<[1], [0], [0], [1], [0, 0, 1, 1], [], []>, precision = #tpu.contract_precision<fp32>} : vector<16x22xf32>, vector<22x16xf32>, vector<16x16xf32> -> vector<16x16xf32>
      %160 = arith.addf %155, %159 : vector<16x16xf32>
      %161 = arith.negf %160 : vector<16x16xf32>
      %162 = math.exp %161 : vector<16x16xf32>
      %cst_169 = arith.constant 1.000000e+00 : f32
      %163 = vector.broadcast %cst_169 : f32 to vector<16x16xf32>
      %164 = arith.addf %163, %162 : vector<16x16xf32>
      %165 = arith.divf %163, %164 : vector<16x16xf32>
      %c0_170 = arith.constant 0 : index
      %c0_171 = arith.constant 0 : index
      %c0_172 = arith.constant 0 : index
      %c0_173 = arith.constant 0 : index
      %166 = vector.load %arg4[%c0_170, %c0_171, %c0_172, %c0_173] : memref<1x1x16x16xf32, #tpu.memory_space<vmem>>, vector<1x1x16x16xf32>
      %167 = vector.shape_cast %166 : vector<1x1x16x16xf32> to vector<16x16xf32>
      %168 = vector.shape_cast %165 : vector<16x16xf32> to vector<1x1x16x16xf32>
      tpu.vector_store %arg4[%c0_170, %c0_171, %c0_172, %c0_173], %168 {strides = array<i32>} : memref<1x1x16x16xf32, #tpu.memory_space<vmem>>, vector<1x1x16x16xf32>,
    } else {
    }
    return
  }
  func.func @transform_0(%arg0: i32, %arg1: i32) -> (i32, i32, i32) {
    %c0_i32 = arith.constant 0 : i32
    %c0_i32_0 = arith.constant 0 : i32
    return %arg0, %arg1, %c0_i32 : i32, i32, i32
  }
  func.func @transform_1(%arg0: i32, %arg1: i32) -> (i32, i32, i32, i32) {
    %c0_i32 = arith.constant 0 : i32
    %c0_i32_0 = arith.constant 0 : i32
    %c0_i32_1 = arith.constant 0 : i32
    %c0_i32_2 = arith.constant 0 : i32
    %c0_i32_3 = arith.constant 0 : i32
    return %c0_i32, %c0_i32_0, %c0_i32_1, %c0_i32_2 : i32, i32, i32, i32
  }
  func.func @transform_2(%arg0: i32, %arg1: i32) -> (i32, i32, i32, i32) {
    %c0_i32 = arith.constant 0 : i32
    %c0_i32_0 = arith.constant 0 : i32
    %c0_i32_1 = arith.constant 0 : i32
    %c0_i32_2 = arith.constant 0 : i32
    return %arg0, %c0_i32, %c0_i32_0, %c0_i32_1 : i32, i32, i32, i32
  }
}

</mosaic_0001>

<bundles_post_ra>
// kernel: tpu_custom_call.1
= control target key start
LH: loop header
LB: loop body
LE: loop exit
PB: predicated region body
PF: predicated region fallthrough
CT: control target
= control target key end

     0   :  { %7 = vsyncpa [#allocation7], 0  ;;  %s11074_s0 = inlined_call_operand.vmem [shape: f32[2,16,256], index: 0, kind: input, shape index: {}]   ;;  %s11075_s1 = inlined_call_operand.vmem [shape: f32[2,7,22,16], index: 1, kind: input, shape index: {}]   ;;  %s11076_s2 = inlined_call_operand.hbm [shape: f32[2,1,16,16], index: 2, kind: output, shape index: {}]  }
   0x1   :  { %9 = vsyncpa [#allocation7 + $0x1], 0  ;;  %s9418_s9 = smov 0   ;;  %s9420_s10 = smov 0  }
   0x2   :  { %s9422_s11 = smov 0   ;;  %s9424_s12 = smov 0  }
   0x3   :  { %s9426_s13 = smov 0   ;;  %s9428_s14 = smov 0  }
   0x4   :  { %s9430_s15 = smov 0   ;;  %s9432_s16 = smov 0  }
   0x5 LB: > { %s7967_s17 = sadd.s32 4294967295, %s9386_s16   ;;  %s7968_s18 = sadd.s32 4294967294, %s9386_s16   ;;  %s9386_s16 = sphi %s9432_s16, %s15_s16   ;;  %s9382_s15 = sphi %s9430_s15, %s11121_s15   ;;  %s9378_s14 = sphi %s9428_s14, %s11120_s14   ;;  %s9374_s13 = sphi %s9426_s13, %s11119_s13   ;;  %s9370_s12 = sphi %s9424_s12, %s11118_s12   ;;  %s9366_s11 = sphi %s9422_s11, %s11117_s11   ;;  %s9362_s10 = sphi %s9420_s10, %s11116_s10   ;;  %s9358_s9 = sphi %s9418_s9, %s11115_s9  }
   0x6   : > { %s24_s19 = sadd.s32 1, %s9378_s14  ;;  %s27_s20 = sadd.s32 1, %s9382_s15 }
   0x7   : > { %p25_p0 = scmp.ge.s32.totalorder %s24_s19, 2  ;;  %p93_p1 = scmp.ne.s32.totalorder %s9366_s11, %s9362_s10 }
   0x8   : > { %p94_p2 = scmp.eq.s32.totalorder %s7967_s17, 3  ;;  %p99_p4 = scmp.ne.s32.totalorder %s9362_s10, %s9358_s9 }
   0x9   : > { %s11123_s19 = smov (%p25_p0, %s24_s19), 0  ;;  %s11125_s20 = smov (!%p25_p0, %s27_s20), %s9382_s15 }
   0xa   : > { %p9467_p3 = por %p94_p2, %p93_p1  ;;  %p29_p5 = scmp.ge.s32.totalorder %s11125_s20, 2 }
   0xb   : > { %p100_p6 = scmp.eq.s32.totalorder %s7968_s18, 3  ;;  %p7971_p7 = scmp.ge.s32.totalorder %s9386_s16, 1 }
   0xc   : > { %p133_p8 = scmp.lt.s32.totalorder %s9386_s16, 5  ;;  %s11127_s20 = smov (%p29_p5, %s11125_s20), 0 }
   0xd   : > { %p9477_p9 = por %p100_p6, %p99_p4  ;;  %s80_s23 = ssub.s32 %s9382_s15, %s11127_s20 }
   0xe   : > { %p134_p10 = pnand %p7971_p7, %p133_p8  ;;  %s83_s24 = sadd.s32 1, %s9366_s11 }
   0xf   : > { %p81_p11 = scmp.eq.s32.totalorder %s80_s23, 0  ;;  %s156_s26 = sand.u32 (!%p134_p10), 1, %s9362_s10  }
  0x10   : > { %137 = sbr.rel (%p134_p10) target bundleno = 804 (0x324), region = 28  ;;  %p159_p12 = scmp.lt.s32.totalorder (!%p134_p10), %s9374_s13, 1 }
  0x11   : > { %s9485_s25 = scalar_select %p81_p11, %s9366_s11, %s83_s24  }
  0x12   : > { %s7972_s27 = sshll.u32 (!%p134_p10), %s156_s26, 4  ;;  %p161_p13 = scmp.lt.s32.totalorder (!%p134_p10), %s9370_s12, 1 }
  0x13   : > { %s9497_s17 = scalar_lea.vmem (!%p134_p10), [#allocation6], %s7972_s27  ;;  %p7976_p0 = scmp.ne.s32.totalorder (!%p134_p10), %s9370_s12, 0 }
  0x15   : > { %s160_s28 = scalar_select %p159_p12, %s9374_s13, 1 }
  0x16   : > { %s162_s29 = scalar_select %p161_p13, %s9370_s12, 1 }
  0x17   : > { %s7974_s30 = sshll.u32 %s160_s28, 2  ;;  %171 = sbr.rel (%p7976_p0) target bundleno = 32 (0x20), region = 32 }
  0x18   : > { %s7973_s3 = sshll.u32 %s162_s29, 1 }
  0x19   : > { %s165_s4 = sadd.s32 %s7974_s30, %s7973_s3 }
  0x1a   : > { %s7975_s5 = sshll.u32 %s165_s4, 3 }
  0x1b   : > { %s167_s8 = scalar_lea.vmem %s11074_s0, %s7975_s5 }
  0x1c   : > { %v172_v0 = vlaneseq  ;;  %v9388_v1 = vmov 0.0   ;;  %v9389_v2 = vmov -inf  }
  0x1e   : > { %vm174_vm0 = vcmp.lt.s32.totalorder %v172_v0, 256 }
  0x1f   : > { %176 = vst.msk [vmem:[#allocation2] sm:$0x3] %vm174_vm0, %v9388_v1  ;;  %177 = vst.msk [vmem:[#allocation3] sm:$0x3] %vm174_vm0, %v9389_v2 }
  0x20 PF: > { %v178_v3 = vld [vmem:[%s167_s8] sm:$0xff]  ;;  %v179_v4 = vld [vmem:[%s167_s8 + $0x8] sm:$0xff]  ;;  %v199_v7 = vlaneseq  ;;  %v9390_v10 = vmov 1966171168   ;;  %p7977_p1 = scmp.ne.s32.totalorder %s9370_s12, 1 }
  0x21   : > { %v181_v5 = vrot.slane %v178_v3, 4  ;;  %v187_v6 = vrot.slane %v179_v4, 4  ;;  %v197_v11 = vunpack.c.l.s4 %v9390_v10 }
  0x22   : > { %v9500_v17 = vshrl.u32 %v199_v7, 7  ;;  %vm214_vm1 = vcmp.lt.s32.totalorder %v199_v7, 256 }
  0x23   : > { %v182_v8 = vadd.f32 %v181_v5, %v178_v3  ;;  %v188_v9 = vadd.f32 %v187_v6, %v179_v4  ;;  %v219_v12 = vmax.f32 %v178_v3, %v181_v5  ;;  %v225_v13 = vmax.f32 %v179_v4, %v187_v6 }
  0x24   : > { %v198_v21 = vunpack.c.0.s8 %v197_v11 }
  0x25   : > { %v183_v14 = vrot.slane %v182_v8, 2  ;;  %v189_v15 = vrot.slane %v188_v9, 2  ;;  %v220_v16 = vrot.slane %v219_v12, 2  ;;  %v226_v18 = vrot.slane %v225_v13, 2 }
  0x26   : > { %v201_v30 = vsub.s32 %v198_v21, %v9500_v17  ;;  %v180_v36 = vld [vmem:[#allocation2] sm:$0x3]  ;;  %v217_v39 = vld [vmem:[#allocation3] sm:$0x3] }
  0x27   : > { %v184_v19 = vadd.f32 %v183_v14, %v182_v8  ;;  %v190_v20 = vadd.f32 %v189_v15, %v188_v9  ;;  %v221_v22 = vmax.f32 %v219_v12, %v220_v16  ;;  %v227_v23 = vmax.f32 %v225_v13, %v226_v18 }
  0x29   : > { %v185_v24 = vrot.slane %v184_v19, 1  ;;  %v191_v25 = vrot.slane %v190_v20, 1  ;;  %v222_v26 = vrot.slane %v221_v22, 1  ;;  %v228_v27 = vrot.slane %v227_v23, 1 }
  0x2b   : > { %v186_v28 = vadd.f32 %v185_v24, %v184_v19  ;;  %v192_v29 = vadd.f32 %v191_v25, %v190_v20  ;;  %v223_v31 = vmax.f32 %v221_v22, %v222_v26  ;;  %v229_v32 = vmax.f32 %v227_v23, %v228_v27 }
  0x2d   : > { %v195_v33 = vcombine.low %v186_v28, %v192_v29  ;;  %v232_v34 = vcombine.low %v223_v31, %v229_v32 }
  0x2f   : > { %v202_v35 = vrot.slane %v195_v33, %v201_v30  ;;  %v239_v37 = vrot.slane %v232_v34, %v201_v30 }
  0x31   : > { %v209_v38 = vrot.slane %v202_v35, %v201_v30  ;;  %v246_v40 = vrot.slane %v239_v37, %v201_v30  ;;  %253 = sbr.rel (%p7977_p1) target bundleno = 780 (0x30c), region = 36 }
  0x33   : > { %v211_v41 = vadd.f32 %v209_v38, %v180_v36  ;;  %v248_v42 = vmax.f32 %v217_v39, %v246_v40 }
  0x35   : > { %216 = vst.msk [vmem:[#allocation2] sm:$0x3] %vm214_vm1, %v211_v41  ;;  %249 = vst.msk [vmem:[#allocation3] sm:$0x3] %vm214_vm1, %v248_v42 }
  0x36   : > { %v268_v44 = vsub.s32 0, %v9500_v17  ;;  %vm257_vm2 = vcmask 179200   ;;  %v9391_v46 = vmov 0.0   ;;  %s9392_s12 = smov 99   ;;  %s9393_s18 = smov 3   ;;  %vm429_vm3 = vcmask 1045504  }
  0x37   : > { %262 = vst.msk [vmem:[#allocation5] sm:$0xff] %vm257_vm2, %v9391_v46  ;;  %258 = vst.msk [vmem:[#allocation4] sm:$0xff] %vm257_vm2, %v9391_v46  ;;  %v7980_v47 = vld [vmem:[%s11075_s1 + $0xb8] sm:$0x3f]  ;;  %s9394_s27 = smov 83   ;;  %s9395_s28 = smov 115  }
  0x38   : > { %259 = vst.msk [vmem:[#allocation4 + $0x8] sm:$0xff] %vm257_vm2, %v9391_v46  ;;  %263 = vst.msk [vmem:[#allocation5 + $0x8] sm:$0xff] %vm257_vm2, %v9391_v46  ;;  %v431_v48 = vsel %vm429_vm3, %v7980_v47, 0  ;;  %v7979_v50 = vld [vmem:[%s11075_s1 + $0xb0] sm:$0xff]  ;;  %s9396_s3 = smov 51   ;;  %s9397_s4 = smov 67  }
  0x39   : > { %v9523_v49 = vand.u32 4294901760, %v431_v48  ;;  %v9531_v52 = vand.u32 4294901760, %v7979_v50  ;;  %v342_v53 = vsub.s32 1, %v9500_v17  ;;  %v7978_v54 = vld [vmem:[%s11075_s1 + $0xa8] sm:$0xff]  ;;  %s9398_s7 = smov 19   ;;  %s9399_s8 = smov 35  }
  0x3a   : > { %v9546_v57 = vand.u32 4294901760, %v7978_v54  ;;  %vm260_vm4 = vcmask 177152   ;;  %vm273_vm5 = vcmask 147480   ;;  %v416_v29 = vld [vmem:[%s11075_s1 + $0x10] sm:$0x3f]  ;;  %v415_v33 = vld [vmem:[%s11075_s1 + $0x8] sm:$0xff] }
  0x3b   : > { %v9529_v51 = vsub.f32 %v431_v48, %v9523_v49  ;;  %8445 = vmatprep.subr.mxu0 %v9523_v49  ;;  %v9544_v56 = vsub.f32 %v7979_v50, %v9531_v52  ;;  %261 = vst.msk [vmem:[#allocation4 + $0x10] sm:$0x3f] %vm260_vm4, %v9391_v46  ;;  %264 = vst.msk [vmem:[#allocation5 + $0x10] sm:$0x3f] %vm260_vm4, %v9391_v46  ;;  %v955_v32 = vsel %vm429_vm3, %v416_v29, 0  ;;  %v414_v39 = vld [vmem:[%s11075_s1] sm:$0xff] }
  0x3c   : > { %v256_v43 = vld [vmem:[#allocation3] sm:$0x3]  ;;  %8446 = vmatpush3.msra.mxu0 %v9523_v49  ;;  %v9556_v60 = vsub.f32 %v7978_v54, %v9546_v57  ;;  %v254_v62 = vld [vmem:[#allocation2] sm:$0x3]  ;;  %v9632_v37 = vand.u32 4294901760, %v955_v32  ;;  %v9642_v41 = vand.u32 4294901760, %v415_v33 }
  0x3d   : > { %v279_v45 = vrot.slane %v256_v43, %v268_v44  ;;  %v9541_v55 = vand.u32 4294901760, %v9529_v51  ;;  %8447 = vmatprep.subr.mxu0 %v9531_v52  ;;  %v9553_v59 = vand.u32 4294901760, %v9544_v56  ;;  %v351_v61 = vrot.slane %v256_v43, %v342_v53 }
  0x3e   : > { %8448 = vmatpush3.msra.mxu0 %v9531_v52  ;;  %v9564_v1 = vand.u32 4294901760, %v9556_v60  ;;  %v255_v4 = vmul.f32 0.0625, %v254_v62  ;;  %v9649_v46 = vand.u32 4294901760, %v414_v39  ;;  %v9656_v48 = vsub.f32 %v415_v33, %v9642_v41 }
  0x3f   : > { %296 = vrot.lane.b32.xlu1 %v279_v45, %s9392_s12  ;;  %280 = vrot.lane.b32.xlu0 %v279_v45, %s9393_s18  ;;  %v551_v58 = vsub.f32 %v9529_v51, %v9541_v55  ;;  %v558_v0 = vsub.f32 %v9544_v56, %v9553_v59  ;;  %vm7868_vm6 = vcmask 130048  }
  0x40   : > { %8449 = vmatprep.subr.mxu0 %v9546_v57  ;;  %v565_v3 = vsub.f32 %v9556_v60, %v9564_v1  ;;  %v269_v6 = vrot.slane %v255_v4, %v268_v44  ;;  %v343_v7 = vrot.slane %v255_v4, %v342_v53  ;;  %v9664_v62 = vsub.f32 %v414_v39, %v9649_v46 }
  0x41   : > { %v552_v63 = vand.u32 4294901760, %v551_v58  ;;  %8450 = vmatpush3.msra.mxu0 %v9546_v57  ;;  %v559_v2 = vand.u32 4294901760, %v558_v0 }
  0x42   : > { %8463 = vmatprep.subr.mxu0 %v9529_v51  ;;  %v566_v5 = vand.u32 4294901760, %v565_v3  ;;  %v9674_v3 = vand.u32 4294901760, %v9656_v48 }
  0x43   : > { %304 = vrot.lane.b32.xlu1 %v279_v45, %s9394_s27  ;;  %288 = vrot.lane.b32.xlu0 %v279_v45, %s9395_s28 }
  0x44   : > { %8454 = vmatprep.subr.mxu1 %v552_v63 }
  0x45   : > { %8455 = vmatpush3.msra.mxu1 %v552_v63 }
  0x46   : > { %8456 = vmatprep.subr.mxu1 %v559_v2 }
  0x47   : > { %320 = vrot.lane.b32.xlu1 %v279_v45, %s9396_s3  ;;  %312 = vrot.lane.b32.xlu0 %v279_v45, %s9397_s4 }
  0x48   : > { %8457 = vmatpush3.msra.mxu1 %v559_v2 }
  0x49   : > { %8458 = vmatprep.subr.mxu1 %v566_v5 }
  0x4a   : > { %8459 = vmatpush3.msra.mxu1 %v566_v5 }
  0x4b   : > { %336 = vrot.lane.b32.xlu1 %v279_v45, %s9398_s7  ;;  %328 = vrot.lane.b32.xlu0 %v279_v45, %s9399_s8  ;;  %v9647_v45 = vsub.f32 %v955_v32, %v9632_v37 }
  0x4c   : > { %8472 = vmatprep.subr.mxu1 %v9523_v49 }
  0x4f   : > { %360 = vrot.lane.b32.xlu1 %v351_v61, %s9395_s28  ;;  %352 = vrot.lane.b32.xlu0 %v351_v61, %s9393_s18 }
  0x53   : > { %376 = vrot.lane.b32.xlu1 %v351_v61, %s9394_s27  ;;  %368 = vrot.lane.b32.xlu0 %v351_v61, %s9392_s12 }
  0x57   : > { %384 = vrot.lane.b32.xlu0 %v351_v61, %s9397_s4  ;;  %270 = vrot.lane.b32.xlu1 %v269_v6, %s9393_s18 }
  0x5b   : > { %284 = vrot.lane.b32.xlu0 %v269_v6, %s9395_s28  ;;  %292 = vrot.lane.b32.xlu1 %v269_v6, %s9392_s12 }
  0x5f   : > { %300 = vrot.lane.b32.xlu0 %v269_v6, %s9394_s27  ;;  %308 = vrot.lane.b32.xlu1 %v269_v6, %s9397_s4 }
  0x63   : > { %316 = vrot.lane.b32.xlu0 %v269_v6, %s9396_s3  ;;  %324 = vrot.lane.b32.xlu1 %v269_v6, %s9399_s8 }
  0x67   : > { %332 = vrot.lane.b32.xlu0 %v269_v6, %s9398_s7  ;;  %344 = vrot.lane.b32.xlu1 %v343_v7, %s9393_s18 }
  0x6b   : > { %356 = vrot.lane.b32.xlu0 %v343_v7, %s9395_s28  ;;  %364 = vrot.lane.b32.xlu1 %v343_v7, %s9392_s12 }
  0x6f   : > { %372 = vrot.lane.b32.xlu0 %v343_v7, %s9394_s27  ;;  %380 = vrot.lane.b32.xlu1 %v343_v7, %s9397_s4 }
  0x73   : > { %388 = vrot.lane.b32.xlu0 %v343_v7, %s9396_s3  ;;  %392 = vrot.lane.b32.xlu1 %v351_v61, %s9396_s3 }
  0x77   : > { %396 = vrot.lane.b32.xlu0 %v343_v7, %s9399_s8  ;;  %400 = vrot.lane.b32.xlu1 %v351_v61, %s9399_s8 }
  0x7b   : > { %404 = vrot.lane.b32.xlu0 %v343_v7, %s9398_s7  ;;  %408 = vrot.lane.b32.xlu1 %v351_v61, %s9398_s7  ;;  %v9661_v61 = vand.u32 4294901760, %v9647_v45 }
  0x7d   : > { %v1075_v6 = vsub.f32 %v9647_v45, %v9661_v61 }
  0xb1   : > { %v297_v8 = vpop.permute.xlu1 %296  ;;  %v281_v9 = vpop.permute.xlu0 %280 }
  0xb2   : > { %299 = vst.msk [vmem:[#allocation5 + $0x5] sm:$0x1] %vm273_vm5, %v297_v8  ;;  %283 = vst.msk [vmem:[#allocation5 + $0x3] sm:$0x1] %vm273_vm5, %v281_v9  ;;  %v9685_v8 = vand.u32 4294901760, %v9664_v62  ;;  %v1076_v9 = vand.u32 4294901760, %v1075_v6 }
  0xb5   : > { %v305_v10 = vpop.permute.xlu1 %304  ;;  %v289_v11 = vpop.permute.xlu0 %288 }
  0xb6   : > { %307 = vst.msk [vmem:[#allocation5 + $0x6] sm:$0x1] %vm273_vm5, %v305_v10  ;;  %291 = vst.msk [vmem:[#allocation5 + $0x4] sm:$0x1] %vm273_vm5, %v289_v11  ;;  %v1089_v11 = vsub.f32 %v9664_v62, %v9685_v8 }
  0xb9   : > { %v321_v12 = vpop.permute.xlu1 %320  ;;  %v313_v13 = vpop.permute.xlu0 %312 }
  0xba   : > { %323 = vst.msk [vmem:[#allocation5 + $0x8] sm:$0x1] %vm273_vm5, %v321_v12  ;;  %315 = vst.msk [vmem:[#allocation5 + $0x7] sm:$0x1] %vm273_vm5, %v313_v13  ;;  %v7983_v12 = vld [vmem:[%s11075_s1 + $0x28] sm:$0x3f] }
  0xbd   : > { %v337_v14 = vpop.permute.xlu1 %336  ;;  %v329_v15 = vpop.permute.xlu0 %328 }
  0xbe   : > { %339 = vst.msk [vmem:[#allocation5 + $0xa] sm:$0x1] %vm273_vm5, %v337_v14  ;;  %331 = vst.msk [vmem:[#allocation5 + $0x9] sm:$0x1] %vm273_vm5, %v329_v15  ;;  %v1090_v15 = vand.u32 4294901760, %v1089_v11 }
  0xc1   : > { %v361_v16 = vpop.permute.xlu1 %360  ;;  %v353_v17 = vpop.permute.xlu0 %352  ;;  %v417_v18 = vld [vmem:[#allocation5] sm:$0xff] }
  0xc2   : > { %363 = vst.msk [vmem:[#allocation5 + $0xc] sm:$0x1] %vm273_vm5, %v361_v16  ;;  %355 = vst.msk [vmem:[#allocation5 + $0xb] sm:$0x1] %vm273_vm5, %v353_v17  ;;  %v424_v19 = vsel %vm257_vm2, %v417_v18, 0 }
  0xc3   : > { %v9611_v20 = vand.u32 4294901760, %v424_v19 }
  0xc5   : > { %v377_v21 = vpop.permute.xlu1 %376  ;;  %8460 = vmatprep.mubr.f32.mxu1 %v9611_v20  ;;  %v369_v22 = vpop.permute.xlu0 %368  ;;  %v9615_v23 = vsub.f32 %v424_v19, %v9611_v20 }
  0xc6   : > { %379 = vst.msk [vmem:[#allocation5 + $0xe] sm:$0x1] %vm273_vm5, %v377_v21  ;;  %371 = vst.msk [vmem:[#allocation5 + $0xd] sm:$0x1] %vm273_vm5, %v369_v22 }
  0xc7   : > { %v503_v24 = vand.u32 4294901760, %v9615_v23 }
  0xc9   : > { %v385_v25 = vpop.permute.xlu0 %384  ;;  %v271_v26 = vpop.permute.xlu1 %270  ;;  %v504_v27 = vsub.f32 %v9615_v23, %v503_v24 }
  0xca   : > { %387 = vst.msk [vmem:[#allocation5 + $0xf] sm:$0x1] %vm273_vm5, %v385_v25  ;;  %274 = vst.msk [vmem:[#allocation4 + $0x3] sm:$0x1] %vm273_vm5, %v271_v26 }
  0xcb   : > { %v505_v28 = vand.u32 4294901760, %v504_v27 }
  0xcd   : > { %8451 = vmatprep.mubr.f32.mxu0 %v505_v28  ;;  %v285_v30 = vpop.permute.xlu0 %284  ;;  %v293_v31 = vpop.permute.xlu1 %292 }
  0xce   : > { %287 = vst.msk [vmem:[#allocation4 + $0x4] sm:$0x1] %vm273_vm5, %v285_v30  ;;  %295 = vst.msk [vmem:[#allocation4 + $0x5] sm:$0x1] %vm273_vm5, %v293_v31 }
  0xd1   : > { %v301_v34 = vpop.permute.xlu0 %300  ;;  %v309_v35 = vpop.permute.xlu1 %308  ;;  %v418_v36 = vld [vmem:[#allocation5 + $0x8] sm:$0xff] }
  0xd2   : > { %303 = vst.msk [vmem:[#allocation4 + $0x6] sm:$0x1] %vm273_vm5, %v301_v34  ;;  %311 = vst.msk [vmem:[#allocation4 + $0x7] sm:$0x1] %vm273_vm5, %v309_v35  ;;  %v427_v38 = vsel %vm257_vm2, %v418_v36, 0 }
  0xd3   : > { %v9640_v40 = vand.u32 4294901760, %v427_v38 }
  0xd5   : > { %v512_v42 = vsub.f32 %v427_v38, %v9640_v40  ;;  %8461 = vmatmul.mubr.f32.vlgmr.msra.gmra.mxu1 %v9640_v40  ;;  %v317_v43 = vpop.permute.xlu0 %316  ;;  %v325_v44 = vpop.permute.xlu1 %324 }
  0xd6   : > { %8473 = vmatpush3.msra.mxu1 %v9523_v49  ;;  %319 = vst.msk [vmem:[#allocation4 + $0x8] sm:$0x1] %vm273_vm5, %v317_v43  ;;  %327 = vst.msk [vmem:[#allocation4 + $0x9] sm:$0x1] %vm273_vm5, %v325_v44  ;;  %8478 = vmatprep.mubr.f32.mxu1 %v503_v24 }
  0xd7   : > { %8474 = vmatprep.subr.mxu1 %v9531_v52  ;;  %v513_v47 = vand.u32 4294901760, %v512_v42 }
  0xd8   : > { %8475 = vmatpush3.msra.mxu1 %v9531_v52 }
  0xd9   : > { %8476 = vmatprep.subr.mxu1 %v9546_v57  ;;  %v333_v50 = vpop.permute.xlu0 %332  ;;  %v345_v53 = vpop.permute.xlu1 %344  ;;  %v514_v54 = vsub.f32 %v512_v42, %v513_v47  ;;  %v412_v58 = vld [vmem:[#allocation4] sm:$0xff] }
  0xda   : > { %8477 = vmatpush3.msra.mxu1 %v9546_v57  ;;  %335 = vst.msk [vmem:[#allocation4 + $0xa] sm:$0x1] %vm273_vm5, %v333_v50  ;;  %347 = vst.msk [vmem:[#allocation4 + $0xb] sm:$0x1] %vm273_vm5, %v345_v53  ;;  %v949_v63 = vsel %vm257_vm2, %v412_v58, 0 }
  0xdb   : > { %8479 = vmatmul.mubr.f32.vlgmr.msra.gmra.mxu1 %v513_v47  ;;  %8490 = vmatprep.subr.mxu1 %v9523_v49  ;;  %v515_v0 = vand.u32 4294901760, %v514_v54  ;;  %v9671_v2 = vand.u32 4294901760, %v949_v63 }
  0xdc   : > { %8491 = vmatpush3.msra.mxu1 %v9523_v49  ;;  %8496 = vmatprep.mubr.f32.mxu1 %v9611_v20  ;;  %v1082_v49 = vsub.f32 %v9656_v48, %v9674_v3 }
  0xdd   : > { %8492 = vmatprep.subr.mxu1 %v9531_v52  ;;  %8452 = vmatmul.mubr.f32.vlgmr.msra.gmra.mxu0 %v515_v0  ;;  %v357_v4 = vpop.permute.xlu0 %356  ;;  %v365_v5 = vpop.permute.xlu1 %364  ;;  %v9682_v7 = vsub.f32 %v949_v63, %v9671_v2  ;;  %v1472_v31 = vld [vmem:[#allocation4 + $0x1] sm:$0xff] }
  0xde   : > { %8464 = vmatpush3.msra.mxu0 %v9529_v51  ;;  %8493 = vmatpush3.msra.mxu1 %v9531_v52  ;;  %359 = vst.msk [vmem:[#allocation4 + $0xc] sm:$0x1] %vm273_vm5, %v357_v4  ;;  %367 = vst.msk [vmem:[#allocation4 + $0xd] sm:$0x1] %vm273_vm5, %v365_v5  ;;  %v1479_v34 = vsel %vm257_vm2, %v1472_v31, 0  ;;  %v7985_v63 = vld [vmem:[%s11075_s1 + $0xc8] sm:$0xff] }
  0xdf   : > { %8465 = vmatprep.subr.mxu0 %v9544_v56  ;;  %8469 = vmatprep.mubr.f32.mxu0 %v9615_v23  ;;  %v1027_v10 = vand.u32 4294901760, %v9682_v7  ;;  %v7984_v0 = vld [vmem:[%s11075_s1 + $0xc0] sm:$0xff] }
  0xe0   : > { %8494 = vmatprep.subr.mxu1 %v9546_v57  ;;  %8466 = vmatpush3.msra.mxu0 %v9544_v56  ;;  %v1083_v56 = vand.u32 4294901760, %v1082_v49  ;;  %v9837_v5 = vand.u32 4294901760, %v7984_v0 }
  0xe1   : > { %8495 = vmatpush3.msra.mxu1 %v9546_v57  ;;  %8467 = vmatprep.subr.mxu0 %v9556_v60  ;;  %v373_v51 = vpop.permute.xlu0 %372  ;;  %v381_v52 = vpop.permute.xlu1 %380  ;;  %v1485_v57 = vsel %vm429_vm3, %v7983_v12, 0 }
  0xe2   : > { %8497 = vmatmul.mubr.f32.vlgmr.msra.gmra.mxu1 %v9640_v40  ;;  %8468 = vmatpush3.msra.mxu0 %v9556_v60  ;;  %375 = vst.msk [vmem:[#allocation4 + $0xe] sm:$0x1] %vm273_vm5, %v373_v51  ;;  %383 = vst.msk [vmem:[#allocation4 + $0xf] sm:$0x1] %vm273_vm5, %v381_v52  ;;  %v1028_v60 = vsub.f32 %v9682_v7, %v1027_v10  ;;  %v9719_v16 = vand.u32 4294901760, %v1485_v57  ;;  %v2004_v51 = vld [vmem:[#allocation5 + $0x1] sm:$0xff]  ;;  %v9854_v52 = vsub.f32 %v7984_v0, %v9837_v5 }
  0xe3   : > { %8514 = vmatprep.mubr.f32.mxu1 %v9671_v2  ;;  %8470 = vmatmul.mubr.f32.vlgmr.msra.gmra.mxu0 %v512_v42  ;;  %v7991_v0 = vld [vmem:[%s11075_s1 + $0xe0] sm:$0xff] }
  0xe4   : > { %8481 = vmatprep.subr.mxu0 %v9541_v55  ;;  %8487 = vmatprep.mubr.f32.mxu0 %v9611_v20  ;;  %v1029_v18 = vand.u32 4294901760, %v1028_v60  ;;  %v9739_v23 = vsub.f32 %v1485_v57, %v9719_v16 }
  0xe5   : > { %8482 = vmatpush3.msra.mxu0 %v9541_v55  ;;  %v389_v13 = vpop.permute.xlu0 %388  ;;  %v393_v14 = vpop.permute.xlu1 %392  ;;  %8508 = vmatprep.subr.mxu1 %v1076_v9  ;;  %v7982_v55 = vld [vmem:[%s11075_s1 + $0x20] sm:$0xff] }
  0xe6   : > { %8483 = vmatprep.subr.mxu0 %v9553_v59  ;;  %391 = vst.msk [vmem:[#allocation4 + $0x10] sm:$0x1] %vm273_vm5, %v389_v13  ;;  %395 = vst.msk [vmem:[#allocation5 + $0x10] sm:$0x1] %vm273_vm5, %v393_v14  ;;  %8509 = vmatpush3.msra.mxu1 %v1076_v9  ;;  %v9733_v22 = vand.u32 4294901760, %v7982_v55  ;;  %v9756_v30 = vand.u32 4294901760, %v9739_v23 }
  0xe7   : > { %8484 = vmatpush3.msra.mxu0 %v9553_v59  ;;  %8510 = vmatprep.subr.mxu1 %v1083_v56  ;;  %v7981_v59 = vld [vmem:[%s11075_s1 + $0x18] sm:$0xff]  ;;  %v2011_v9 = vsel %vm257_vm2, %v2004_v51, 0 }
  0xe8   : > { %8485 = vmatprep.subr.mxu0 %v9564_v1  ;;  %8511 = vmatpush3.msra.mxu1 %v1083_v56  ;;  %v9742_v24 = vand.u32 4294901760, %v7981_v59  ;;  %v9751_v28 = vsub.f32 %v7982_v55, %v9733_v22  ;;  %v1605_v38 = vsub.f32 %v9739_v23, %v9756_v30  ;;  %v9870_v56 = vand.u32 4294901760, %v9854_v52 }
  0xe9   : > { %8486 = vmatpush3.msra.mxu0 %v9564_v1  ;;  %v397_v17 = vpop.permute.xlu0 %396  ;;  %v401_v19 = vpop.permute.xlu1 %400  ;;  %8512 = vmatprep.subr.mxu1 %v1090_v15  ;;  %v413_v20 = vld [vmem:[#allocation4 + $0x8] sm:$0xff]  ;;  %v9873_v57 = vand.u32 4294901760, %v2011_v9 }
  0xea   : > { %8488 = vmatmul.mubr.f32.vlgmr.msra.gmra.mxu0 %v9640_v40  ;;  %399 = vst.msk [vmem:[#allocation4 + $0x11] sm:$0x1] %vm273_vm5, %v397_v17  ;;  %403 = vst.msk [vmem:[#allocation5 + $0x11] sm:$0x1] %vm273_vm5, %v401_v19  ;;  %8513 = vmatpush3.msra.mxu1 %v1090_v15  ;;  %v952_v21 = vsel %vm257_vm2, %v413_v20, 0  ;;  %v9761_v32 = vsub.f32 %v7981_v59, %v9742_v24  ;;  %v9769_v35 = vand.u32 4294901760, %v9751_v28 }
  0xeb   : > { %8505 = vmatprep.mubr.f32.mxu0 %v1029_v18  ;;  %8526 = vmatprep.subr.mxu1 %v9632_v37  ;;  %v9736_v1 = vand.u32 4294901760, %v952_v21  ;;  %v9781_v40 = vand.u32 4294901760, %v1479_v34  ;;  %v2151_v15 = vsub.f32 %v9854_v52, %v9870_v56  ;;  %v9889_v55 = vsub.f32 %v2011_v9, %v9873_v57  ;;  %v7989_v17 = vld [vmem:[%s11075_s1 + $0x40] sm:$0x3f] }
  0xec   : > { %8499 = vmatprep.subr.mxu0 %v9632_v37  ;;  %v9777_v39 = vand.u32 4294901760, %v9761_v32  ;;  %v1612_v43 = vsub.f32 %v9751_v28, %v9769_v35  ;;  %v2549_v59 = vsel %vm429_vm3, %v7989_v17, 0  ;;  %v3068_v9 = vld [vmem:[#allocation5 + $0x2] sm:$0xff] }
  0xed   : > { %v405_v25 = vpop.permute.xlu0 %404  ;;  %v1036_v26 = vsub.f32 %v952_v21, %v9736_v1  ;;  %8515 = vmatmul.mubr.f32.vlgmr.msra.gmra.mxu1 %v9736_v1  ;;  %v409_v27 = vpop.permute.xlu1 %408  ;;  %8500 = vmatpush3.msra.mxu0 %v9632_v37  ;;  %v1473_v42 = vld [vmem:[#allocation4 + $0x9] sm:$0xff]  ;;  %v2005_v13 = vld [vmem:[#allocation5 + $0x9] sm:$0xff]  ;;  %v2152_v20 = vand.u32 4294901760, %v2151_v15  ;;  %v2089_v21 = vand.u32 4294901760, %v9889_v55 }
  0xee   : > { %407 = vst.msk [vmem:[#allocation4 + $0x12] sm:$0x1] %vm273_vm5, %v405_v25  ;;  %8527 = vmatpush3.msra.mxu1 %v9632_v37  ;;  %411 = vst.msk [vmem:[#allocation5 + $0x12] sm:$0x1] %vm273_vm5, %v409_v27  ;;  %8532 = vmatprep.mubr.f32.mxu1 %v1027_v10  ;;  %v1619_v44 = vsub.f32 %v9761_v32, %v9777_v39  ;;  %v1482_v47 = vsel %vm257_vm2, %v1473_v42, 0  ;;  %v1613_v50 = vand.u32 4294901760, %v1612_v43 }
  0xef   : > { %8528 = vmatprep.subr.mxu1 %v9642_v41  ;;  %8501 = vmatprep.subr.mxu0 %v9642_v41  ;;  %v1037_v29 = vand.u32 4294901760, %v1036_v26  ;;  %v9804_v53 = vand.u32 4294901760, %v1482_v47  ;;  %v7987_v25 = vld [vmem:[%s11075_s1 + $0x30] sm:$0xff] }
  0xf0   : > { %8529 = vmatpush3.msra.mxu1 %v9642_v41  ;;  %8502 = vmatpush3.msra.mxu0 %v9642_v41 }
  0xf1   : > { %8530 = vmatprep.subr.mxu1 %v9649_v46  ;;  %8503 = vmatprep.subr.mxu0 %v9649_v46  ;;  %v1038_v33 = vsub.f32 %v1036_v26, %v1037_v29  ;;  %v9813_v58 = vsub.f32 %v1482_v47, %v9804_v53 }
  0xf2   : > { %8531 = vmatpush3.msra.mxu1 %v9649_v46  ;;  %8504 = vmatpush3.msra.mxu0 %v9649_v46 }
  0xf3   : > { %8533 = vmatmul.mubr.f32.vlgmr.msra.gmra.mxu1 %v1037_v29  ;;  %8544 = vmatprep.subr.mxu1 %v9632_v37  ;;  %v1039_v36 = vand.u32 4294901760, %v1038_v33  ;;  %v1567_v4 = vand.u32 4294901760, %v9813_v58  ;;  %v9931_v29 = vand.u32 4294901760, %v7987_v25 }
  0xf4   : > { %8545 = vmatpush3.msra.mxu1 %v9632_v37  ;;  %8550 = vmatprep.mubr.f32.mxu1 %v9671_v2  ;;  %v1606_v37 = vand.u32 4294901760, %v1605_v38 }
  0xf5   : > { %8517 = vmatprep.subr.mxu0 %v9647_v45  ;;  %8546 = vmatprep.subr.mxu1 %v9642_v41 }
  0xf6   : > { %8506 = vmatmul.mubr.f32.vlgmr.msra.gmra.mxu0 %v1039_v36  ;;  %8547 = vmatpush3.msra.mxu1 %v9642_v41  ;;  %v9796_v41 = vsub.f32 %v1479_v34, %v9781_v40  ;;  %v2536_v34 = vld [vmem:[#allocation4 + $0x2] sm:$0xff] }
  0xf7   : > { %8518 = vmatpush3.msra.mxu0 %v9647_v45  ;;  %8523 = vmatprep.mubr.f32.mxu0 %v9682_v7  ;;  %v7986_v45 = vld [vmem:[%s11075_s1 + $0xd0] sm:$0x3f]  ;;  %v2543_v36 = vsel %vm257_vm2, %v2536_v34, 0 }
  0xf8   : > { %8519 = vmatprep.subr.mxu0 %v9656_v48  ;;  %8548 = vmatprep.subr.mxu1 %v9649_v46  ;;  %v1557_v54 = vand.u32 4294901760, %v9796_v41  ;;  %v9967_v43 = vand.u32 4294901760, %v2543_v36 }
  0xf9   : > { %8520 = vmatpush3.msra.mxu0 %v9656_v48  ;;  %8549 = vmatpush3.msra.mxu1 %v9649_v46  ;;  %v1620_v46 = vand.u32 4294901760, %v1619_v44  ;;  %v2017_v48 = vsel %vm429_vm3, %v7986_v45, 0 }
  0xfa   : > { %8521 = vmatprep.subr.mxu0 %v9664_v62  ;;  %8551 = vmatmul.mubr.f32.vlgmr.msra.gmra.mxu1 %v9736_v1 }
  0xfb   : > { %8562 = vmatprep.subr.mxu1 %v1606_v37  ;;  %8522 = vmatpush3.msra.mxu0 %v9664_v62  ;;  %v9815_v62 = vand.u32 4294901760, %v2017_v48 }
  0xfc   : > { %8563 = vmatpush3.msra.mxu1 %v1606_v37  ;;  %8568 = vmatprep.mubr.f32.mxu1 %v9781_v40  ;;  %v2537_v37 = vld [vmem:[#allocation4 + $0xa] sm:$0xff] }
  0xfd   : > { %8524 = vmatmul.mubr.f32.vlgmr.msra.gmra.mxu0 %v1036_v26  ;;  %8535 = vmatprep.subr.mxu0 %v9661_v61  ;;  %v2546_v45 = vsel %vm257_vm2, %v2537_v37, 0 }
  0xfe   : > { %8564 = vmatprep.subr.mxu1 %v1613_v50  ;;  %8536 = vmatpush3.msra.mxu0 %v9661_v61  ;;  %v1558_v61 = vsub.f32 %v9796_v41, %v1557_v54 }
  0xff   : > { %8541 = vmatprep.mubr.f32.mxu0 %v9671_v2  ;;  %8565 = vmatpush3.msra.mxu1 %v1613_v50  ;;  %v9828_v2 = vand.u32 4294901760, %v7985_v63  ;;  %v9983_v50 = vsub.f32 %v2543_v36, %v9967_v43  ;;  %v3600_v36 = vld [vmem:[#allocation4 + $0x3] sm:$0xff] }
 0x100   : > { %8537 = vmatprep.subr.mxu0 %v9674_v3  ;;  %8566 = vmatprep.subr.mxu1 %v1620_v46  ;;  %v1559_v6 = vand.u32 4294901760, %v1558_v61 }
 0x101   : > { %8538 = vmatpush3.msra.mxu0 %v9674_v3  ;;  %8567 = vmatpush3.msra.mxu1 %v1620_v46  ;;  %v9834_v3 = vsub.f32 %v2017_v48, %v9815_v62  ;;  %v9844_v7 = vsub.f32 %v7985_v63, %v9828_v2  ;;  %v9991_v48 = vand.u32 4294901760, %v2546_v45 }
 0x102   : > { %8539 = vmatprep.subr.mxu0 %v9685_v8  ;;  %8569 = vmatmul.mubr.f32.vlgmr.msra.gmra.mxu1 %v9804_v53 }
 0x103   : > { %8580 = vmatprep.subr.mxu1 %v9719_v16  ;;  %8540 = vmatpush3.msra.mxu0 %v9685_v8  ;;  %v1568_v8 = vsub.f32 %v9813_v58, %v1567_v4  ;;  %v9849_v49 = vand.u32 4294901760, %v9834_v3  ;;  %v9861_v10 = vand.u32 4294901760, %v9844_v7  ;;  %v10001_v63 = vsub.f32 %v2546_v45, %v9991_v48 }
 0x104   : > { %8581 = vmatpush3.msra.mxu1 %v9719_v16  ;;  %8586 = vmatprep.mubr.f32.mxu1 %v1557_v54 }
 0x105   : > { %8542 = vmatmul.mubr.f32.vlgmr.msra.gmra.mxu0 %v9736_v1  ;;  %8553 = vmatprep.subr.mxu0 %v9719_v16  ;;  %v1569_v11 = vand.u32 4294901760, %v1568_v8  ;;  %v2137_v12 = vsub.f32 %v9834_v3, %v9849_v49  ;;  %v2144_v14 = vsub.f32 %v9844_v7, %v9861_v10  ;;  %v9909_v1 = vand.u32 4294901760, %v2549_v59 }
 0x106   : > { %8582 = vmatprep.subr.mxu1 %v9733_v22  ;;  %8554 = vmatpush3.msra.mxu0 %v9719_v16 }
 0x107   : > { %8559 = vmatprep.mubr.f32.mxu0 %v1559_v6  ;;  %8583 = vmatpush3.msra.mxu1 %v9733_v22  ;;  %v2138_v60 = vand.u32 4294901760, %v2137_v12  ;;  %v2145_v18 = vand.u32 4294901760, %v2144_v14 }
 0x108   : > { %8555 = vmatprep.subr.mxu0 %v9733_v22  ;;  %8584 = vmatprep.subr.mxu1 %v9742_v24 }
 0x109   : > { %8556 = vmatpush3.msra.mxu0 %v9733_v22  ;;  %8585 = vmatpush3.msra.mxu1 %v9742_v24 }
 0x10a   : > { %8557 = vmatprep.subr.mxu0 %v9742_v24  ;;  %8587 = vmatmul.mubr.f32.vlgmr.msra.gmra.mxu1 %v1567_v4  ;;  %v7990_v4 = vld [vmem:[%s11075_s1 + $0xd8] sm:$0xff] }
 0x10b   : > { %8598 = vmatprep.subr.mxu1 %v9719_v16  ;;  %8558 = vmatpush3.msra.mxu0 %v9742_v24 }
 0x10c   : > { %8599 = vmatpush3.msra.mxu1 %v9719_v16  ;;  %8604 = vmatprep.mubr.f32.mxu1 %v9781_v40  ;;  %v2014_v16 = vsel %vm257_vm2, %v2005_v13, 0 }
 0x10d   : > { %8560 = vmatmul.mubr.f32.vlgmr.msra.gmra.mxu0 %v1569_v11  ;;  %8571 = vmatprep.subr.mxu0 %v9739_v23  ;;  %v9897_v19 = vand.u32 4294901760, %v2014_v16  ;;  %v3075_v11 = vsel %vm257_vm2, %v3068_v9, 0 }
 0x10e   : > { %8600 = vmatprep.subr.mxu1 %v9733_v22  ;;  %8572 = vmatpush3.msra.mxu0 %v9739_v23  ;;  %v7988_v23 = vld [vmem:[%s11075_s1 + $0x38] sm:$0xff]  ;;  %v10061_v14 = vand.u32 4294901760, %v3075_v11 }
 0x10f   : > { %8577 = vmatprep.mubr.f32.mxu0 %v9796_v41  ;;  %8601 = vmatpush3.msra.mxu1 %v9733_v22  ;;  %v9907_v22 = vsub.f32 %v2014_v16, %v9897_v19  ;;  %v9922_v26 = vand.u32 4294901760, %v7988_v23 }
 0x110   : > { %8573 = vmatprep.subr.mxu0 %v9751_v28  ;;  %8602 = vmatprep.subr.mxu1 %v9742_v24 }
 0x111   : > { %8574 = vmatpush3.msra.mxu0 %v9751_v28  ;;  %8603 = vmatpush3.msra.mxu1 %v9742_v24  ;;  %v2090_v24 = vsub.f32 %v9889_v55, %v2089_v21  ;;  %v2099_v27 = vand.u32 4294901760, %v9907_v22  ;;  %v9928_v28 = vsub.f32 %v2549_v59, %v9909_v1  ;;  %v9938_v31 = vsub.f32 %v7988_v23, %v9922_v26 }
 0x112   : > { %8575 = vmatprep.subr.mxu0 %v9761_v32  ;;  %8605 = vmatmul.mubr.f32.vlgmr.msra.gmra.mxu1 %v9804_v53 }
 0x113   : > { %8616 = vmatprep.subr.mxu1 %v2138_v60  ;;  %8576 = vmatpush3.msra.mxu0 %v9761_v32  ;;  %v2100_v32 = vsub.f32 %v9907_v22, %v2099_v27  ;;  %v9943_v33 = vand.u32 4294901760, %v9928_v28  ;;  %v9955_v38 = vand.u32 4294901760, %v9938_v31 }
 0x114   : > { %8617 = vmatpush3.msra.mxu1 %v2138_v60  ;;  %8622 = vmatprep.mubr.f32.mxu1 %v9873_v57  ;;  %v3069_v60 = vld [vmem:[#allocation5 + $0xa] sm:$0xff] }
 0x115   : > { %8578 = vmatmul.mubr.f32.vlgmr.msra.gmra.mxu0 %v9813_v58  ;;  %8589 = vmatprep.subr.mxu0 %v9756_v30  ;;  %v2676_v44 = vsub.f32 %v9938_v31, %v9955_v38  ;;  %v3078_v17 = vsel %vm257_vm2, %v3069_v60, 0 }
 0x116   : > { %8618 = vmatprep.subr.mxu1 %v2145_v18  ;;  %8590 = vmatpush3.msra.mxu0 %v9756_v30  ;;  %v2091_v30 = vand.u32 4294901760, %v2090_v24  ;;  %v10085_v59 = vand.u32 4294901760, %v3078_v17 }
 0x117   : > { %8595 = vmatprep.mubr.f32.mxu0 %v9781_v40  ;;  %8619 = vmatpush3.msra.mxu1 %v2145_v18  ;;  %v2669_v40 = vsub.f32 %v9928_v28, %v9943_v33  ;;  %v2677_v46 = vand.u32 4294901760, %v2676_v44  ;;  %v10077_v18 = vsub.f32 %v3075_v11, %v10061_v14  ;;  %v4132_v11 = vld [vmem:[#allocation5 + $0x3] sm:$0xff] }
 0x118   : > { %8591 = vmatprep.subr.mxu0 %v9769_v35  ;;  %8620 = vmatprep.subr.mxu1 %v2152_v20  ;;  %v10095_v23 = vsub.f32 %v3078_v17, %v10085_v59 }
 0x119   : > { %8592 = vmatpush3.msra.mxu0 %v9769_v35  ;;  %8621 = vmatpush3.msra.mxu1 %v2152_v20  ;;  %v9948_v35 = vsub.f32 %v7987_v25, %v9931_v29  ;;  %v2670_v47 = vand.u32 4294901760, %v2669_v40  ;;  %v7994_v25 = vld [vmem:[%s11075_s1 + $0x50] sm:$0xff] }
 0x11a   : > { %8593 = vmatprep.subr.mxu0 %v9777_v39  ;;  %8623 = vmatmul.mubr.f32.vlgmr.msra.gmra.mxu1 %v9897_v19 }
 0x11b   : > { %8634 = vmatprep.subr.mxu1 %v9815_v62  ;;  %8594 = vmatpush3.msra.mxu0 %v9777_v39  ;;  %v2101_v39 = vand.u32 4294901760, %v2100_v32  ;;  %v9964_v42 = vand.u32 4294901760, %v9948_v35 }
 0x11c   : > { %8635 = vmatpush3.msra.mxu1 %v9815_v62  ;;  %8640 = vmatprep.mubr.f32.mxu1 %v2089_v21 }
 0x11d   : > { %8596 = vmatmul.mubr.f32.vlgmr.msra.gmra.mxu0 %v9804_v53  ;;  %8607 = vmatprep.subr.mxu0 %v9815_v62  ;;  %v2683_v41 = vsub.f32 %v9948_v35, %v9964_v42  ;;  %v7992_v53 = vld [vmem:[%s11075_s1 + $0xe8] sm:$0x3f] }
 0x11e   : > { %8636 = vmatprep.subr.mxu1 %v9828_v2  ;;  %8608 = vmatpush3.msra.mxu0 %v9815_v62  ;;  %v3081_v58 = vsel %vm429_vm3, %v7992_v53, 0 }
 0x11f   : > { %8613 = vmatprep.mubr.f32.mxu0 %v2091_v30  ;;  %8637 = vmatpush3.msra.mxu1 %v9828_v2  ;;  %v2684_v54 = vand.u32 4294901760, %v2683_v41  ;;  %v10003_v61 = vand.u32 4294901760, %v3081_v58 }
 0x120   : > { %8609 = vmatprep.subr.mxu0 %v9828_v2  ;;  %8638 = vmatprep.subr.mxu1 %v9837_v5 }
 0x121   : > { %8610 = vmatpush3.msra.mxu0 %v9828_v2  ;;  %8639 = vmatpush3.msra.mxu1 %v9837_v5  ;;  %v10022_v6 = vsub.f32 %v3081_v58, %v10003_v61 }
 0x122   : > { %8611 = vmatprep.subr.mxu0 %v9837_v5  ;;  %8641 = vmatmul.mubr.f32.vlgmr.msra.gmra.mxu1 %v2099_v27  ;;  %v7993_v27 = vld [vmem:[%s11075_s1 + $0x48] sm:$0xff] }
 0x123   : > { %8652 = vmatprep.subr.mxu1 %v9815_v62  ;;  %8612 = vmatpush3.msra.mxu0 %v9837_v5 }
 0x124   : > { %8653 = vmatpush3.msra.mxu1 %v9815_v62  ;;  %8658 = vmatprep.mubr.f32.mxu1 %v9873_v57  ;;  %v2621_v62 = vand.u32 4294901760, %v9983_v50 }
 0x125   : > { %8614 = vmatmul.mubr.f32.vlgmr.msra.gmra.mxu0 %v2101_v39  ;;  %8625 = vmatprep.subr.mxu0 %v9834_v3  ;;  %v3607_v39 = vsel %vm257_vm2, %v3600_v36, 0 }
 0x126   : > { %8654 = vmatprep.subr.mxu1 %v9828_v2  ;;  %8626 = vmatpush3.msra.mxu0 %v9834_v3  ;;  %v10016_v3 = vand.u32 4294901760, %v7991_v0  ;;  %v10155_v44 = vand.u32 4294901760, %v3607_v39 }
 0x127   : > { %8631 = vmatprep.mubr.f32.mxu0 %v9889_v55  ;;  %8655 = vmatpush3.msra.mxu1 %v9828_v2  ;;  %v2622_v2 = vsub.f32 %v9983_v50, %v2621_v62 }
 0x128   : > { %8627 = vmatprep.subr.mxu0 %v9844_v7  ;;  %8656 = vmatprep.subr.mxu1 %v9837_v5 }
 0x129   : > { %8628 = vmatpush3.msra.mxu0 %v9844_v7  ;;  %8657 = vmatpush3.msra.mxu1 %v9837_v5  ;;  %v2631_v5 = vand.u32 4294901760, %v10001_v63  ;;  %v10025_v7 = vand.u32 4294901760, %v7990_v4  ;;  %v2623_v8 = vand.u32 4294901760, %v2622_v2 }
 0x12a   : > { %8629 = vmatprep.subr.mxu0 %v9854_v52  ;;  %8659 = vmatmul.mubr.f32.vlgmr.msra.gmra.mxu1 %v9897_v19 }
 0x12b   : > { %8670 = vmatprep.subr.mxu1 %v2670_v47  ;;  %8630 = vmatpush3.msra.mxu0 %v9854_v52  ;;  %v2632_v51 = vsub.f32 %v10001_v63, %v2631_v5  ;;  %v10037_v52 = vand.u32 4294901760, %v10022_v6 }
 0x12c   : > { %8671 = vmatpush3.msra.mxu1 %v2670_v47  ;;  %8676 = vmatprep.mubr.f32.mxu1 %v9967_v43  ;;  %v3601_v47 = vld [vmem:[#allocation4 + $0xb] sm:$0xff] }
 0x12d   : > { %8632 = vmatmul.mubr.f32.vlgmr.msra.gmra.mxu0 %v9907_v22  ;;  %8643 = vmatprep.subr.mxu0 %v9849_v49  ;;  %v3610_v53 = vsel %vm257_vm2, %v3601_v47, 0 }
 0x12e   : > { %8672 = vmatprep.subr.mxu1 %v2677_v46  ;;  %8644 = vmatpush3.msra.mxu0 %v9849_v49  ;;  %v10032_v49 = vsub.f32 %v7991_v0, %v10016_v3  ;;  %v10179_v58 = vand.u32 4294901760, %v3610_v53 }
 0x12f   : > { %8649 = vmatprep.mubr.f32.mxu0 %v9873_v57  ;;  %8673 = vmatpush3.msra.mxu1 %v2677_v46  ;;  %v3201_v57 = vsub.f32 %v10022_v6, %v10037_v52  ;;  %v10171_v46 = vsub.f32 %v3607_v39, %v10155_v44  ;;  %v4664_v39 = vld [vmem:[#allocation4 + $0x4] sm:$0xff] }
 0x130   : > { %8645 = vmatprep.subr.mxu0 %v9861_v10  ;;  %8674 = vmatprep.subr.mxu1 %v2684_v54  ;;  %v10049_v12 = vand.u32 4294901760, %v10032_v49  ;;  %v10189_v0 = vsub.f32 %v3610_v53, %v10179_v58 }
 0x131   : > { %8646 = vmatpush3.msra.mxu0 %v9861_v10  ;;  %8675 = vmatpush3.msra.mxu1 %v2684_v54  ;;  %v10042_v10 = vsub.f32 %v7990_v4, %v10025_v7  ;;  %v3202_v16 = vand.u32 4294901760, %v3201_v57  ;;  %v7997_v4 = vld [vmem:[%s11075_s1 + $0xf8] sm:$0xff] }
 0x132   : > { %8647 = vmatprep.subr.mxu0 %v9870_v56  ;;  %8677 = vmatmul.mubr.f32.vlgmr.msra.gmra.mxu1 %v9991_v48  ;;  %v3208_v15 = vsub.f32 %v10032_v49, %v10049_v12 }
 0x133   : > { %8688 = vmatprep.subr.mxu1 %v9909_v1  ;;  %8648 = vmatpush3.msra.mxu0 %v9870_v56  ;;  %v2633_v56 = vand.u32 4294901760, %v2632_v51  ;;  %v10058_v13 = vand.u32 4294901760, %v10042_v10 }
 0x134   : > { %8689 = vmatpush3.msra.mxu1 %v9909_v1  ;;  %8694 = vmatprep.mubr.f32.mxu1 %v2621_v62  ;;  %v3209_v20 = vand.u32 4294901760, %v3208_v15 }
 0x135   : > { %8650 = vmatmul.mubr.f32.vlgmr.msra.gmra.mxu0 %v9897_v19  ;;  %8661 = vmatprep.subr.mxu0 %v9909_v1  ;;  %v3215_v55 = vsub.f32 %v10042_v10, %v10058_v13  ;;  %v7995_v19 = vld [vmem:[%s11075_s1 + $0x58] sm:$0x3f] }
 0x136   : > { %8690 = vmatprep.subr.mxu1 %v9922_v26  ;;  %8662 = vmatpush3.msra.mxu0 %v9909_v1  ;;  %v3613_v22 = vsel %vm429_vm3, %v7995_v19, 0 }
 0x137   : > { %8667 = vmatprep.mubr.f32.mxu0 %v2623_v8  ;;  %8691 = vmatpush3.msra.mxu1 %v9922_v26  ;;  %v3216_v21 = vand.u32 4294901760, %v3215_v55  ;;  %v10097_v24 = vand.u32 4294901760, %v3613_v22 }
 0x138   : > { %8663 = vmatprep.subr.mxu0 %v9922_v26  ;;  %8692 = vmatprep.subr.mxu1 %v9931_v29 }
 0x139   : > { %8664 = vmatpush3.msra.mxu0 %v9922_v26  ;;  %8693 = vmatpush3.msra.mxu1 %v9931_v29  ;;  %v10116_v30 = vsub.f32 %v3613_v22, %v10097_v24 }
 0x13a   : > { %8665 = vmatprep.subr.mxu0 %v9931_v29  ;;  %8695 = vmatmul.mubr.f32.vlgmr.msra.gmra.mxu1 %v2631_v5  ;;  %v7996_v5 = vld [vmem:[%s11075_s1 + $0xf0] sm:$0xff] }
 0x13b   : > { %8706 = vmatprep.subr.mxu1 %v9909_v1  ;;  %8666 = vmatpush3.msra.mxu0 %v9931_v29 }
 0x13c   : > { %8707 = vmatpush3.msra.mxu1 %v9909_v1  ;;  %8712 = vmatprep.mubr.f32.mxu1 %v9967_v43  ;;  %v3153_v1 = vand.u32 4294901760, %v10077_v18 }
 0x13d   : > { %8668 = vmatmul.mubr.f32.vlgmr.msra.gmra.mxu0 %v2633_v56  ;;  %8679 = vmatprep.subr.mxu0 %v9928_v28  ;;  %v4139_v56 = vsel %vm257_vm2, %v4132_v11, 0 }
 0x13e   : > { %8708 = vmatprep.subr.mxu1 %v9922_v26  ;;  %8680 = vmatpush3.msra.mxu0 %v9928_v28  ;;  %v10110_v28 = vand.u32 4294901760, %v7994_v25  ;;  %v10249_v15 = vand.u32 4294901760, %v4139_v56 }
 0x13f   : > { %8685 = vmatprep.mubr.f32.mxu0 %v9983_v50  ;;  %8709 = vmatpush3.msra.mxu1 %v9922_v26  ;;  %v3154_v26 = vsub.f32 %v10077_v18, %v3153_v1 }
 0x140   : > { %8681 = vmatprep.subr.mxu0 %v9938_v31  ;;  %8710 = vmatprep.subr.mxu1 %v9931_v29 }
 0x141   : > { %8682 = vmatpush3.msra.mxu0 %v9938_v31  ;;  %8711 = vmatpush3.msra.mxu1 %v9931_v29  ;;  %v3163_v29 = vand.u32 4294901760, %v10095_v23  ;;  %v10119_v31 = vand.u32 4294901760, %v7993_v27  ;;  %v3155_v32 = vand.u32 4294901760, %v3154_v26 }
 0x142   : > { %8683 = vmatprep.subr.mxu0 %v9948_v35  ;;  %8713 = vmatmul.mubr.f32.vlgmr.msra.gmra.mxu1 %v9991_v48 }
 0x143   : > { %8724 = vmatprep.subr.mxu1 %v3202_v16  ;;  %8684 = vmatpush3.msra.mxu0 %v9948_v35  ;;  %v3164_v34 = vsub.f32 %v10095_v23, %v3163_v29  ;;  %v10131_v35 = vand.u32 4294901760, %v10116_v30 }
 0x144   : > { %8725 = vmatpush3.msra.mxu1 %v3202_v16  ;;  %8730 = vmatprep.mubr.f32.mxu1 %v10061_v14  ;;  %v4133_v16 = vld [vmem:[#allocation5 + $0xb] sm:$0xff] }
 0x145   : > { %8686 = vmatmul.mubr.f32.vlgmr.msra.gmra.mxu0 %v10001_v63  ;;  %8697 = vmatprep.subr.mxu0 %v9943_v33  ;;  %v4142_v19 = vsel %vm257_vm2, %v4133_v16, 0 }
 0x146   : > { %8726 = vmatprep.subr.mxu1 %v3209_v20  ;;  %8698 = vmatpush3.msra.mxu0 %v9943_v33  ;;  %v10126_v33 = vsub.f32 %v7994_v25, %v10110_v28  ;;  %v10273_v22 = vand.u32 4294901760, %v4142_v19 }
 0x147   : > { %8703 = vmatprep.mubr.f32.mxu0 %v9967_v43  ;;  %8727 = vmatpush3.msra.mxu1 %v3209_v20  ;;  %v3733_v43 = vsub.f32 %v10116_v30, %v10131_v35  ;;  %v10265_v20 = vsub.f32 %v4139_v56, %v10249_v15  ;;  %v5196_v56 = vld [vmem:[#allocation5 + $0x4] sm:$0xff] }
 0x148   : > { %8699 = vmatprep.subr.mxu0 %v9955_v38  ;;  %8728 = vmatprep.subr.mxu1 %v3216_v21  ;;  %v10143_v40 = vand.u32 4294901760, %v10126_v33  ;;  %v10283_v25 = vsub.f32 %v4142_v19, %v10273_v22 }
 0x149   : > { %8700 = vmatpush3.msra.mxu0 %v9955_v38  ;;  %8729 = vmatpush3.msra.mxu1 %v3216_v21  ;;  %v10136_v38 = vsub.f32 %v7993_v27, %v10119_v31  ;;  %v3734_v45 = vand.u32 4294901760, %v3733_v43  ;;  %v8000_v27 = vld [vmem:[%s11075_s1 + $0x68] sm:$0xff] }
 0x14a   : > { %8701 = vmatprep.subr.mxu0 %v9964_v42  ;;  %8731 = vmatmul.mubr.f32.vlgmr.msra.gmra.mxu1 %v10085_v59  ;;  %v3740_v41 = vsub.f32 %v10126_v33, %v10143_v40 }
 0x14b   : > { %8742 = vmatprep.subr.mxu1 %v10003_v61  ;;  %8702 = vmatpush3.msra.mxu0 %v9964_v42  ;;  %v3165_v42 = vand.u32 4294901760, %v3164_v34  ;;  %v10152_v37 = vand.u32 4294901760, %v10136_v38 }
 0x14c   : > { %8743 = vmatpush3.msra.mxu1 %v10003_v61  ;;  %8748 = vmatprep.mubr.f32.mxu1 %v3153_v1  ;;  %v3741_v54 = vand.u32 4294901760, %v3740_v41 }
 0x14d   : > { %8704 = vmatmul.mubr.f32.vlgmr.msra.gmra.mxu0 %v9991_v48  ;;  %8715 = vmatprep.subr.mxu0 %v10003_v61  ;;  %v3747_v50 = vsub.f32 %v10136_v38, %v10152_v37  ;;  %v7998_v48 = vld [vmem:[%s11075_s1 + $0x100] sm:$0x3f] }
 0x14e   : > { %8744 = vmatprep.subr.mxu1 %v10016_v3  ;;  %8716 = vmatpush3.msra.mxu0 %v10003_v61  ;;  %v4145_v63 = vsel %vm429_vm3, %v7998_v48, 0 }
 0x14f   : > { %8721 = vmatprep.mubr.f32.mxu0 %v3155_v32  ;;  %8745 = vmatpush3.msra.mxu1 %v10016_v3  ;;  %v3748_v62 = vand.u32 4294901760, %v3747_v50  ;;  %v10191_v2 = vand.u32 4294901760, %v4145_v63 }
 0x150   : > { %8717 = vmatprep.subr.mxu0 %v10016_v3  ;;  %8746 = vmatprep.subr.mxu1 %v10025_v7 }
 0x151   : > { %8718 = vmatpush3.msra.mxu0 %v10016_v3  ;;  %8747 = vmatpush3.msra.mxu1 %v10025_v7  ;;  %v10210_v8 = vsub.f32 %v4145_v63, %v10191_v2 }
 0x152   : > { %8719 = vmatprep.subr.mxu0 %v10025_v7  ;;  %8749 = vmatmul.mubr.f32.vlgmr.msra.gmra.mxu1 %v3163_v29  ;;  %v7999_v29 = vld [vmem:[%s11075_s1 + $0x60] sm:$0xff] }
 0x153   : > { %8760 = vmatprep.subr.mxu1 %v10003_v61  ;;  %8720 = vmatpush3.msra.mxu0 %v10025_v7 }
 0x154   : > { %8761 = vmatpush3.msra.mxu1 %v10003_v61  ;;  %8766 = vmatprep.mubr.f32.mxu1 %v10061_v14  ;;  %v3685_v61 = vand.u32 4294901760, %v10171_v46 }
 0x155   : > { %8722 = vmatmul.mubr.f32.vlgmr.msra.gmra.mxu0 %v3165_v42  ;;  %8733 = vmatprep.subr.mxu0 %v10022_v6  ;;  %v4671_v42 = vsel %vm257_vm2, %v4664_v39, 0 }
 0x156   : > { %8762 = vmatprep.subr.mxu1 %v10016_v3  ;;  %8734 = vmatpush3.msra.mxu0 %v10022_v6  ;;  %v10204_v6 = vand.u32 4294901760, %v7997_v4  ;;  %v10343_v41 = vand.u32 4294901760, %v4671_v42 }
 0x157   : > { %8739 = vmatprep.mubr.f32.mxu0 %v10077_v18  ;;  %8763 = vmatpush3.msra.mxu1 %v10016_v3  ;;  %v3686_v3 = vsub.f32 %v10171_v46, %v3685_v61 }
 0x158   : > { %8735 = vmatprep.subr.mxu0 %v10032_v49  ;;  %8764 = vmatprep.subr.mxu1 %v10025_v7 }
 0x159   : > { %8736 = vmatpush3.msra.mxu0 %v10032_v49  ;;  %8765 = vmatpush3.msra.mxu1 %v10025_v7  ;;  %v3695_v7 = vand.u32 4294901760, %v10189_v0  ;;  %v10213_v49 = vand.u32 4294901760, %v7996_v5  ;;  %v3687_v51 = vand.u32 4294901760, %v3686_v3 }
 0x15a   : > { %8737 = vmatprep.subr.mxu0 %v10042_v10  ;;  %8767 = vmatmul.mubr.f32.vlgmr.msra.gmra.mxu1 %v10085_v59 }
 0x15b   : > { %8778 = vmatprep.subr.mxu1 %v3734_v45  ;;  %8738 = vmatpush3.msra.mxu0 %v10042_v10  ;;  %v3696_v9 = vsub.f32 %v10189_v0, %v3695_v7  ;;  %v10225_v10 = vand.u32 4294901760, %v10210_v8 }
 0x15c   : > { %8779 = vmatpush3.msra.mxu1 %v3734_v45  ;;  %8784 = vmatprep.mubr.f32.mxu1 %v10155_v44  ;;  %v4665_v45 = vld [vmem:[#allocation4 + $0xc] sm:$0xff] }
 0x15d   : > { %8740 = vmatmul.mubr.f32.vlgmr.msra.gmra.mxu0 %v10095_v23  ;;  %8751 = vmatprep.subr.mxu0 %v10037_v52  ;;  %v4674_v48 = vsel %vm257_vm2, %v4665_v45, 0 }
 0x15e   : > { %8780 = vmatprep.subr.mxu1 %v3741_v54  ;;  %8752 = vmatpush3.msra.mxu0 %v10037_v52  ;;  %v10220_v52 = vsub.f32 %v7997_v4, %v10204_v6  ;;  %v10367_v63 = vand.u32 4294901760, %v4674_v48 }
 0x15f   : > { %8757 = vmatprep.mubr.f32.mxu0 %v10061_v14  ;;  %8781 = vmatpush3.msra.mxu1 %v3741_v54  ;;  %v4265_v14 = vsub.f32 %v10210_v8, %v10225_v10  ;;  %v10359_v54 = vsub.f32 %v4671_v42, %v10343_v41 }
 0x160   : > { %8753 = vmatprep.subr.mxu0 %v10049_v12  ;;  %8782 = vmatprep.subr.mxu1 %v3748_v62  ;;  %v10237_v57 = vand.u32 4294901760, %v10220_v52  ;;  %v10377_v4 = vsub.f32 %v4674_v48, %v10367_v63 }
 0x161   : > { %8754 = vmatpush3.msra.mxu0 %v10049_v12  ;;  %8783 = vmatpush3.msra.mxu1 %v3748_v62  ;;  %v10230_v12 = vsub.f32 %v7996_v5, %v10213_v49  ;;  %v4266_v17 = vand.u32 4294901760, %v4265_v14  ;;  %v8003_v5 = vld [vmem:[%s11075_s1 + $0x110] sm:$0xff] }
 0x162   : > { %8755 = vmatprep.subr.mxu0 %v10058_v13  ;;  %8785 = vmatmul.mubr.f32.vlgmr.msra.gmra.mxu1 %v10179_v58  ;;  %v4272_v55 = vsub.f32 %v10220_v52, %v10237_v57 }
 0x163   : > { %8796 = vmatprep.subr.mxu1 %v10097_v24  ;;  %8756 = vmatpush3.msra.mxu0 %v10058_v13  ;;  %v3697_v13 = vand.u32 4294901760, %v3696_v9  ;;  %v10246_v60 = vand.u32 4294901760, %v10230_v12 }
 0x164   : > { %8797 = vmatpush3.msra.mxu1 %v10097_v24  ;;  %8802 = vmatprep.mubr.f32.mxu1 %v3685_v61  ;;  %v4273_v21 = vand.u32 4294901760, %v4272_v55 }
 0x165   : > { %8758 = vmatmul.mubr.f32.vlgmr.msra.gmra.mxu0 %v10085_v59  ;;  %8769 = vmatprep.subr.mxu0 %v10097_v24  ;;  %v4279_v18 = vsub.f32 %v10230_v12, %v10246_v60  ;;  %v8001_v59 = vld [vmem:[%s11075_s1 + $0x70] sm:$0x3f] }
 0x166   : > { %8798 = vmatprep.subr.mxu1 %v10110_v28  ;;  %8770 = vmatpush3.msra.mxu0 %v10097_v24  ;;  %v4677_v23 = vsel %vm429_vm3, %v8001_v59, 0 }
 0x167   : > { %8775 = vmatprep.mubr.f32.mxu0 %v3687_v51  ;;  %8799 = vmatpush3.msra.mxu1 %v10110_v28  ;;  %v4280_v1 = vand.u32 4294901760, %v4279_v18  ;;  %v10285_v26 = vand.u32 4294901760, %v4677_v23  ;;  %v5197_v18 = vld [vmem:[#allocation5 + $0xc] sm:$0xff] }
 0x168   : > { %8771 = vmatprep.subr.mxu0 %v10110_v28  ;;  %8800 = vmatprep.subr.mxu1 %v10119_v31 }
 0x169   : > { %8772 = vmatpush3.msra.mxu0 %v10110_v28  ;;  %8801 = vmatpush3.msra.mxu1 %v10119_v31  ;;  %v10304_v32 = vsub.f32 %v4677_v23, %v10285_v26 }
 0x16a   : > { %8773 = vmatprep.subr.mxu0 %v10119_v31  ;;  %8803 = vmatmul.mubr.f32.vlgmr.msra.gmra.mxu1 %v3695_v7  ;;  %v8002_v7 = vld [vmem:[%s11075_s1 + $0x108] sm:$0xff] }
 0x16b   : > { %8814 = vmatprep.subr.mxu1 %v10097_v24  ;;  %8774 = vmatpush3.msra.mxu0 %v10119_v31 }
 0x16c   : > { %8815 = vmatpush3.msra.mxu1 %v10097_v24  ;;  %8820 = vmatprep.mubr.f32.mxu1 %v10155_v44  ;;  %v4217_v24 = vand.u32 4294901760, %v10265_v20 }
 0x16d   : > { %8776 = vmatmul.mubr.f32.vlgmr.msra.gmra.mxu0 %v3697_v13  ;;  %8787 = vmatprep.subr.mxu0 %v10116_v30  ;;  %v5203_v13 = vsel %vm257_vm2, %v5196_v56, 0 }
 0x16e   : > { %8816 = vmatprep.subr.mxu1 %v10110_v28  ;;  %8788 = vmatpush3.msra.mxu0 %v10116_v30  ;;  %v10298_v30 = vand.u32 4294901760, %v8000_v27 }
 0x16f   : > { %8793 = vmatprep.mubr.f32.mxu0 %v10171_v46  ;;  %8817 = vmatpush3.msra.mxu1 %v10110_v28  ;;  %v4218_v28 = vsub.f32 %v10265_v20, %v4217_v24 }
 0x170   : > { %8789 = vmatprep.subr.mxu0 %v10126_v33  ;;  %8818 = vmatprep.subr.mxu1 %v10119_v31 }
 0x171   : > { %8790 = vmatpush3.msra.mxu0 %v10126_v33  ;;  %8819 = vmatpush3.msra.mxu1 %v10119_v31  ;;  %v4227_v31 = vand.u32 4294901760, %v10283_v25  ;;  %v10307_v33 = vand.u32 4294901760, %v7999_v29  ;;  %v4219_v34 = vand.u32 4294901760, %v4218_v28 }
 0x172   : > { %8791 = vmatprep.subr.mxu0 %v10136_v38  ;;  %8821 = vmatmul.mubr.f32.vlgmr.msra.gmra.mxu1 %v10179_v58 }
 0x173   : > { %8832 = vmatprep.subr.mxu1 %v4266_v17  ;;  %8792 = vmatpush3.msra.mxu0 %v10136_v38  ;;  %v4228_v36 = vsub.f32 %v10283_v25, %v4227_v31  ;;  %v10319_v38 = vand.u32 4294901760, %v10304_v32 }
 0x174   : > { %8833 = vmatpush3.msra.mxu1 %v4266_v17  ;;  %8838 = vmatprep.mubr.f32.mxu1 %v10249_v15  ;;  %v10437_v17 = vand.u32 4294901760, %v5203_v13 }
 0x175   : > { %8794 = vmatmul.mubr.f32.vlgmr.msra.gmra.mxu0 %v10189_v0  ;;  %8805 = vmatprep.subr.mxu0 %v10131_v35 }
 0x176   : > { %8834 = vmatprep.subr.mxu1 %v4273_v21  ;;  %8806 = vmatpush3.msra.mxu0 %v10131_v35  ;;  %v10314_v35 = vsub.f32 %v8000_v27, %v10298_v30  ;;  %v8007_v27 = vld [vmem:[%s11075_s1 + $0x88] sm:$0x3f] }
 0x177   : > { %8811 = vmatprep.mubr.f32.mxu0 %v10155_v44  ;;  %8835 = vmatpush3.msra.mxu1 %v4273_v21  ;;  %v4797_v44 = vsub.f32 %v10304_v32, %v10319_v38 }
 0x178   : > { %8807 = vmatprep.subr.mxu0 %v10143_v40  ;;  %8836 = vmatprep.subr.mxu1 %v4280_v1  ;;  %v10331_v43 = vand.u32 4294901760, %v10314_v35 }
 0x179   : > { %8808 = vmatpush3.msra.mxu0 %v10143_v40  ;;  %8837 = vmatpush3.msra.mxu1 %v4280_v1  ;;  %v10324_v40 = vsub.f32 %v7999_v29, %v10307_v33  ;;  %v4798_v53 = vand.u32 4294901760, %v4797_v44  ;;  %v8006_v44 = vld [vmem:[%s11075_s1 + $0x80] sm:$0xff] }
 0x17a   : > { %8809 = vmatprep.subr.mxu0 %v10152_v37  ;;  %8839 = vmatmul.mubr.f32.vlgmr.msra.gmra.mxu1 %v10273_v22  ;;  %v4804_v50 = vsub.f32 %v10314_v35, %v10331_v43 }
 0x17b   : > { %8850 = vmatprep.subr.mxu1 %v10191_v2  ;;  %8810 = vmatpush3.msra.mxu0 %v10152_v37  ;;  %v4229_v37 = vand.u32 4294901760, %v4228_v36  ;;  %v10340_v47 = vand.u32 4294901760, %v10324_v40 }
 0x17c   : > { %8851 = vmatpush3.msra.mxu1 %v10191_v2  ;;  %8856 = vmatprep.mubr.f32.mxu1 %v4217_v24  ;;  %v4805_v62 = vand.u32 4294901760, %v4804_v50  ;;  %v5206_v24 = vsel %vm257_vm2, %v5197_v18, 0  ;;  %v5729_v18 = vld [vmem:[#allocation4 + $0xd] sm:$0xff] }
 0x17d   : > { %8812 = vmatmul.mubr.f32.vlgmr.msra.gmra.mxu0 %v10179_v58  ;;  %8823 = vmatprep.subr.mxu0 %v10191_v2  ;;  %v4811_v46 = vsub.f32 %v10324_v40, %v10340_v47  ;;  %v8004_v58 = vld [vmem:[%s11075_s1 + $0x118] sm:$0x3f]  ;;  %v10461_v29 = vand.u32 4294901760, %v5206_v24 }
 0x17e   : > { %8852 = vmatprep.subr.mxu1 %v10204_v6  ;;  %8824 = vmatpush3.msra.mxu0 %v10191_v2  ;;  %v5209_v0 = vsel %vm429_vm3, %v8004_v58, 0 }
 0x17f   : > { %8829 = vmatprep.mubr.f32.mxu0 %v4219_v34  ;;  %8853 = vmatpush3.msra.mxu1 %v10204_v6  ;;  %v4812_v61 = vand.u32 4294901760, %v4811_v46  ;;  %v10379_v3 = vand.u32 4294901760, %v5209_v0  ;;  %v10471_v42 = vsub.f32 %v5206_v24, %v10461_v29 }
 0x180   : > { %8825 = vmatprep.subr.mxu0 %v10204_v6  ;;  %8854 = vmatprep.subr.mxu1 %v10213_v49 }
 0x181   : > { %8826 = vmatpush3.msra.mxu0 %v10204_v6  ;;  %8855 = vmatpush3.msra.mxu1 %v10213_v49  ;;  %v10398_v51 = vsub.f32 %v5209_v0, %v10379_v3 }
 0x182   : > { %8827 = vmatprep.subr.mxu0 %v10213_v49  ;;  %8857 = vmatmul.mubr.f32.vlgmr.msra.gmra.mxu1 %v4227_v31 }
 0x183   : > { %8868 = vmatprep.subr.mxu1 %v10191_v2  ;;  %8828 = vmatpush3.msra.mxu0 %v10213_v49 }
 0x184   : > { %8869 = vmatpush3.msra.mxu1 %v10191_v2  ;;  %8874 = vmatprep.mubr.f32.mxu1 %v10249_v15  ;;  %v4749_v2 = vand.u32 4294901760, %v10359_v54 }
 0x185   : > { %8830 = vmatmul.mubr.f32.vlgmr.msra.gmra.mxu0 %v4229_v37  ;;  %8841 = vmatprep.subr.mxu0 %v10210_v8 }
 0x186   : > { %8870 = vmatprep.subr.mxu1 %v10204_v6  ;;  %8842 = vmatpush3.msra.mxu0 %v10210_v8  ;;  %v10392_v8 = vand.u32 4294901760, %v8003_v5 }
 0x187   : > { %8847 = vmatprep.mubr.f32.mxu0 %v10265_v20  ;;  %8871 = vmatpush3.msra.mxu1 %v10204_v6  ;;  %v4750_v6 = vsub.f32 %v10359_v54, %v4749_v2 }
 0x188   : > { %8843 = vmatprep.subr.mxu0 %v10220_v52  ;;  %8872 = vmatprep.subr.mxu1 %v10213_v49 }
 0x189   : > { %8844 = vmatpush3.msra.mxu0 %v10220_v52  ;;  %8873 = vmatpush3.msra.mxu1 %v10213_v49  ;;  %v4759_v49 = vand.u32 4294901760, %v10377_v4  ;;  %v10401_v52 = vand.u32 4294901760, %v8002_v7  ;;  %v4751_v9 = vand.u32 4294901760, %v4750_v6 }
 0x18a   : > { %8845 = vmatprep.subr.mxu0 %v10230_v12  ;;  %8875 = vmatmul.mubr.f32.vlgmr.msra.gmra.mxu1 %v10273_v22 }
 0x18b   : > { %8886 = vmatprep.subr.mxu1 %v4798_v53  ;;  %8846 = vmatpush3.msra.mxu0 %v10230_v12  ;;  %v4760_v11 = vsub.f32 %v10377_v4, %v4759_v49  ;;  %v10413_v12 = vand.u32 4294901760, %v10398_v51 }
 0x18c   : > { %8887 = vmatpush3.msra.mxu1 %v4798_v53  ;;  %8892 = vmatprep.mubr.f32.mxu1 %v10343_v41  ;;  %v10486_v53 = vand.u32 4294901760, %v8006_v44 }
 0x18d   : > { %8848 = vmatmul.mubr.f32.vlgmr.msra.gmra.mxu0 %v10283_v25  ;;  %8859 = vmatprep.subr.mxu0 %v10225_v10 }
 0x18e   : > { %8888 = vmatprep.subr.mxu1 %v4805_v62  ;;  %8860 = vmatpush3.msra.mxu0 %v10225_v10  ;;  %v10408_v10 = vsub.f32 %v8003_v5, %v10392_v8 }
 0x18f   : > { %8865 = vmatprep.mubr.f32.mxu0 %v10249_v15  ;;  %8889 = vmatpush3.msra.mxu1 %v4805_v62  ;;  %v5329_v15 = vsub.f32 %v10398_v51, %v10413_v12 }
 0x190   : > { %8861 = vmatprep.subr.mxu0 %v10237_v57  ;;  %8890 = vmatprep.subr.mxu1 %v4812_v61  ;;  %v10425_v14 = vand.u32 4294901760, %v10408_v10 }
 0x191   : > { %8862 = vmatpush3.msra.mxu0 %v10237_v57  ;;  %8891 = vmatpush3.msra.mxu1 %v4812_v61  ;;  %v10418_v57 = vsub.f32 %v8002_v7, %v10401_v52  ;;  %v5330_v21 = vand.u32 4294901760, %v5329_v15  ;;  %v5728_v7 = vld [vmem:[#allocation4 + $0x5] sm:$0xff] }
 0x192   : > { %8863 = vmatprep.subr.mxu0 %v10246_v60  ;;  %8893 = vmatmul.mubr.f32.vlgmr.msra.gmra.mxu1 %v10367_v63  ;;  %v5336_v20 = vsub.f32 %v10408_v10, %v10425_v14 }
 0x193   : > { %8904 = vmatprep.subr.mxu1 %v10285_v26  ;;  %8864 = vmatpush3.msra.mxu0 %v10246_v60  ;;  %v4761_v60 = vand.u32 4294901760, %v4760_v11  ;;  %v10434_v55 = vand.u32 4294901760, %v10418_v57  ;;  %v5735_v11 = vsel %vm257_vm2, %v5728_v7, 0 }
 0x194   : > { %8905 = vmatpush3.msra.mxu1 %v10285_v26  ;;  %8910 = vmatprep.mubr.f32.mxu1 %v4749_v2  ;;  %v5337_v28 = vand.u32 4294901760, %v5336_v20 }
 0x195   : > { %8866 = vmatmul.mubr.f32.vlgmr.msra.gmra.mxu0 %v10273_v22  ;;  %8877 = vmatprep.subr.mxu0 %v10285_v26  ;;  %v8462_v16 = vpop.f32.mrf.mxu1  ;;  %v5343_v23 = vsub.f32 %v10418_v57, %v10434_v55 }
 0x196   : > { %8906 = vmatprep.subr.mxu1 %v10298_v30  ;;  %8878 = vmatpush3.msra.mxu0 %v10285_v26 }
 0x197   : > { %8883 = vmatprep.mubr.f32.mxu0 %v4751_v9  ;;  %8907 = vmatpush3.msra.mxu1 %v10298_v30  ;;  %v603_v22 = vpop.f32.mrf.mxu1 }
 0x198   : > { %8879 = vmatprep.subr.mxu0 %v10298_v30  ;;  %8908 = vmatprep.subr.mxu1 %v10307_v33 }
 0x199   : > { %8880 = vmatpush3.msra.mxu0 %v10298_v30  ;;  %8909 = vmatpush3.msra.mxu1 %v10307_v33 }
 0x19a   : > { %8881 = vmatprep.subr.mxu0 %v10307_v33  ;;  %8911 = vmatmul.mubr.f32.vlgmr.msra.gmra.mxu1 %v4759_v49 }
 0x19b   : > { %8922 = vmatprep.subr.mxu1 %v10285_v26  ;;  %8882 = vmatpush3.msra.mxu0 %v10307_v33 }
 0x19c   : > { %8923 = vmatpush3.msra.mxu1 %v10285_v26  ;;  %8928 = vmatprep.mubr.f32.mxu1 %v10343_v41  ;;  %v10453_v26 = vsub.f32 %v5203_v13, %v10437_v17 }
 0x19d   : > { %8884 = vmatmul.mubr.f32.vlgmr.msra.gmra.mxu0 %v4761_v60  ;;  %8895 = vmatprep.subr.mxu0 %v10304_v32  ;;  %v8453_v19 = vpop.f32.mrf.mxu0 }
 0x19e   : > { %8924 = vmatprep.subr.mxu1 %v10298_v30  ;;  %8896 = vmatpush3.msra.mxu0 %v10304_v32  ;;  %v610_v59 = vadd.f32 %v8462_v16, %v8453_v19  ;;  %v5344_v32 = vand.u32 4294901760, %v5343_v23  ;;  %v10531_v16 = vand.u32 4294901760, %v5735_v11 }
 0x19f   : > { %8901 = vmatprep.mubr.f32.mxu0 %v10359_v54  ;;  %8925 = vmatpush3.msra.mxu1 %v10298_v30  ;;  %v507_v1 = vpop.f32.mrf.mxu0  ;;  %v8480_v30 = vpop.f32.mrf.mxu1 }
 0x1a0   : > { %8897 = vmatprep.subr.mxu0 %v10314_v35  ;;  %8926 = vmatprep.subr.mxu1 %v10307_v33  ;;  %v604_v25 = vadd.f32 %v603_v22, %v507_v1  ;;  %v5738_v1 = vsel %vm257_vm2, %v5729_v18, 0  ;;  %v10547_v23 = vsub.f32 %v5735_v11, %v10531_v16 }
 0x1a1   : > { %8898 = vmatpush3.msra.mxu0 %v10314_v35  ;;  %8927 = vmatpush3.msra.mxu1 %v10307_v33  ;;  %v5741_v33 = vsel %vm429_vm3, %v8007_v27, 0  ;;  %v5281_v35 = vand.u32 4294901760, %v10453_v26  ;;  %v770_v45 = vpop.f32.mrf.mxu1 }
 0x1a2   : > { %8899 = vmatprep.subr.mxu0 %v10324_v40  ;;  %8929 = vmatmul.mubr.f32.vlgmr.msra.gmra.mxu1 %v10367_v63  ;;  %v10473_v37 = vand.u32 4294901760, %v5741_v33 }
 0x1a3   : > { %8940 = vmatprep.subr.mxu1 %v5330_v21  ;;  %8900 = vmatpush3.msra.mxu0 %v10324_v40  ;;  %v8471_v31 = vpop.f32.mrf.mxu0  ;;  %v8498_v46 = vpop.f32.mrf.mxu1 }
 0x1a4   : > { %8941 = vmatpush3.msra.mxu1 %v5330_v21  ;;  %8946 = vmatprep.mubr.f32.mxu1 %v10437_v17  ;;  %v695_v34 = vadd.f32 %v8471_v31, %v610_v59  ;;  %v10492_v54 = vsub.f32 %v5741_v33, %v10473_v37  ;;  %v5813_v31 = vand.u32 4294901760, %v10547_v23 }
 0x1a5   : > { %8902 = vmatmul.mubr.f32.vlgmr.msra.gmra.mxu0 %v10377_v4  ;;  %8913 = vmatprep.subr.mxu0 %v10319_v38  ;;  %v687_v36 = vpop.f32.mrf.mxu0  ;;  %v938_v5 = vpop.f32.mrf.mxu1 }
 0x1a6   : > { %8942 = vmatprep.subr.mxu1 %v5337_v28  ;;  %8914 = vmatpush3.msra.mxu0 %v10319_v38  ;;  %v688_v39 = vadd.f32 %v687_v36, %v604_v25  ;;  %v779_v40 = vadd.f32 %v8480_v30, %v695_v34  ;;  %v5282_v38 = vsub.f32 %v10453_v26, %v5281_v35  ;;  %v8009_v36 = vld [vmem:[%s11075_s1 + $0x128] sm:$0xff] }
 0x1a7   : > { %8919 = vmatprep.mubr.f32.mxu0 %v10343_v41  ;;  %8943 = vmatpush3.msra.mxu1 %v5337_v28  ;;  %v8005_v41 = vld [vmem:[%s11075_s1 + $0x78] sm:$0xff] }
 0x1a8   : > { %8915 = vmatprep.subr.mxu0 %v10331_v43  ;;  %8944 = vmatprep.subr.mxu1 %v5344_v32  ;;  %v771_v50 = vadd.f32 %v770_v45, %v688_v39  ;;  %v10495_v62 = vand.u32 4294901760, %v8005_v41  ;;  %v5283_v0 = vand.u32 4294901760, %v5282_v38  ;;  %v10580_v45 = vand.u32 4294901760, %v8009_v36 }
 0x1a9   : > { %8916 = vmatpush3.msra.mxu0 %v10331_v43  ;;  %8945 = vmatpush3.msra.mxu1 %v5344_v32  ;;  %v5291_v43 = vand.u32 4294901760, %v10471_v42 }
 0x1aa   : > { %8917 = vmatprep.subr.mxu0 %v10340_v47  ;;  %8947 = vmatmul.mubr.f32.vlgmr.msra.gmra.mxu1 %v10461_v29  ;;  %v8489_v48 = vpop.f32.mrf.mxu0  ;;  %v10512_v9 = vsub.f32 %v8005_v41, %v10495_v62 }
 0x1ab   : > { %8958 = vmatprep.subr.mxu1 %v10379_v3  ;;  %8918 = vmatpush3.msra.mxu0 %v10340_v47  ;;  %v865_v58 = vadd.f32 %v8489_v48, %v779_v40  ;;  %v10502_v47 = vsub.f32 %v8006_v44, %v10486_v53  ;;  %v5292_v6 = vsub.f32 %v10471_v42, %v5291_v43 }
 0x1ac   : > { %8959 = vmatpush3.msra.mxu1 %v10379_v3  ;;  %8964 = vmatprep.mubr.f32.mxu1 %v5281_v35  ;;  %v858_v61 = vpop.f32.mrf.mxu0  ;;  %v10528_v15 = vand.u32 4294901760, %v10512_v9 }
 0x1ad   : > { %8920 = vmatmul.mubr.f32.vlgmr.msra.gmra.mxu0 %v10367_v63  ;;  %8931 = vmatprep.subr.mxu0 %v10379_v3  ;;  %v859_v2 = vadd.f32 %v858_v61, %v771_v50  ;;  %v945_v4 = vadd.f32 %v8498_v46, %v865_v58  ;;  %v10507_v63 = vand.u32 4294901760, %v10492_v54  ;;  %v10519_v56 = vand.u32 4294901760, %v10502_v47  ;;  %v8516_v19 = vpop.f32.mrf.mxu1 }
 0x1ae   : > { %8960 = vmatprep.subr.mxu1 %v10392_v8  ;;  %8932 = vmatpush3.msra.mxu0 %v10379_v3  ;;  %v5293_v13 = vand.u32 4294901760, %v5292_v6  ;;  %v5875_v22 = vsub.f32 %v10512_v9, %v10528_v15 }
 0x1af   : > { %8937 = vmatprep.mubr.f32.mxu0 %v5283_v0  ;;  %8961 = vmatpush3.msra.mxu1 %v10392_v8  ;;  %v939_v49 = vadd.f32 %v938_v5, %v859_v2  ;;  %v5861_v60 = vsub.f32 %v10492_v54, %v10507_v63  ;;  %v5868_v20 = vsub.f32 %v10502_v47, %v10519_v56  ;;  %v1127_v24 = vpop.f32.mrf.mxu1  ;;  %v6260_v0 = vld [vmem:[#allocation5 + $0x5] sm:$0xff] }
 0x1b0   : > { %8933 = vmatprep.subr.mxu0 %v10392_v8  ;;  %8962 = vmatprep.subr.mxu1 %v10401_v52  ;;  %v5876_v28 = vand.u32 4294901760, %v5875_v22 }
 0x1b1   : > { %8934 = vmatpush3.msra.mxu0 %v10392_v8  ;;  %8963 = vmatpush3.msra.mxu1 %v10401_v52  ;;  %v5862_v59 = vand.u32 4294901760, %v5861_v60  ;;  %v5869_v27 = vand.u32 4294901760, %v5868_v20 }
 0x1b2   : > { %8935 = vmatprep.subr.mxu0 %v10401_v52  ;;  %8965 = vmatmul.mubr.f32.vlgmr.msra.gmra.mxu1 %v5291_v43 }
 0x1b3   : > { %8976 = vmatprep.subr.mxu1 %v10379_v3  ;;  %8936 = vmatpush3.msra.mxu0 %v10401_v52  ;;  %v8534_v32 = vpop.f32.mrf.mxu1 }
 0x1b4   : > { %8977 = vmatpush3.msra.mxu1 %v10379_v3  ;;  %8982 = vmatprep.mubr.f32.mxu1 %v10437_v17 }
 0x1b5   : > { %8938 = vmatmul.mubr.f32.vlgmr.msra.gmra.mxu0 %v5293_v13  ;;  %8949 = vmatprep.subr.mxu0 %v10398_v51  ;;  %v1294_v44 = vpop.f32.mrf.mxu1 }
 0x1b6   : > { %8978 = vmatprep.subr.mxu1 %v10392_v8  ;;  %8950 = vmatpush3.msra.mxu0 %v10398_v51  ;;  %v8507_v3 = vpop.f32.mrf.mxu0 }
 0x1b7   : > { %8955 = vmatprep.mubr.f32.mxu0 %v10453_v26  ;;  %8979 = vmatpush3.msra.mxu1 %v10392_v8  ;;  %v1042_v21 = vadd.f32 %v8507_v3, %v945_v4  ;;  %v8010_v8 = vld [vmem:[%s11075_s1 + $0x130] sm:$0x3f] }
 0x1b8   : > { %8951 = vmatprep.subr.mxu0 %v10408_v10  ;;  %8980 = vmatprep.subr.mxu1 %v10401_v52  ;;  %v1031_v51 = vpop.f32.mrf.mxu0  ;;  %v6273_v30 = vsel %vm429_vm3, %v8010_v8, 0 }
 0x1b9   : > { %8952 = vmatpush3.msra.mxu0 %v10408_v10  ;;  %8981 = vmatpush3.msra.mxu1 %v10401_v52  ;;  %v1032_v25 = vadd.f32 %v1031_v51, %v939_v49  ;;  %v1134_v26 = vadd.f32 %v8516_v19, %v1042_v21  ;;  %v10555_v10 = vand.u32 4294901760, %v5738_v1  ;;  %v10567_v35 = vand.u32 4294901760, %v6273_v30 }
 0x1ba   : > { %8953 = vmatprep.subr.mxu0 %v10418_v57  ;;  %8983 = vmatmul.mubr.f32.vlgmr.msra.gmra.mxu1 %v10461_v29  ;;  %v8552_v48 = vpop.f32.mrf.mxu1  ;;  %v6267_v49 = vsel %vm257_vm2, %v6260_v0, 0 }
 0x1bb   : > { %8994 = vmatprep.subr.mxu1 %v5862_v59  ;;  %8954 = vmatpush3.msra.mxu0 %v10418_v57  ;;  %v1128_v52 = vadd.f32 %v1127_v24, %v1032_v25  ;;  %v10565_v34 = vsub.f32 %v5738_v1, %v10555_v10  ;;  %v10586_v38 = vsub.f32 %v6273_v30, %v10567_v35  ;;  %v10629_v3 = vand.u32 4294901760, %v6267_v49 }
 0x1bc   : > { %8995 = vmatpush3.msra.mxu1 %v5862_v59  ;;  %9000 = vmatprep.mubr.f32.mxu1 %v10531_v16  ;;  %v1462_v7 = vpop.f32.mrf.mxu1  ;;  %v6261_v59 = vld [vmem:[#allocation5 + $0xd] sm:$0xff] }
 0x1bd   : > { %8956 = vmatmul.mubr.f32.vlgmr.msra.gmra.mxu0 %v10471_v42  ;;  %8967 = vmatprep.subr.mxu0 %v10413_v12  ;;  %v8525_v33 = vpop.f32.mrf.mxu0 }
 0x1be   : > { %8996 = vmatprep.subr.mxu1 %v5869_v27  ;;  %8968 = vmatpush3.msra.mxu0 %v10413_v12  ;;  %v1219_v57 = vadd.f32 %v8525_v33, %v1134_v26  ;;  %v5814_v12 = vsub.f32 %v10547_v23, %v5813_v31  ;;  %v8012_v33 = vld [vmem:[%s11075_s1 + $0x98] sm:$0xff] }
 0x1bf   : > { %8973 = vmatprep.mubr.f32.mxu0 %v10437_v17  ;;  %8997 = vmatpush3.msra.mxu1 %v5869_v27  ;;  %v1211_v39 = vpop.f32.mrf.mxu0  ;;  %v8008_v17 = vld [vmem:[%s11075_s1 + $0x120] sm:$0xff] }
 0x1c0   : > { %8969 = vmatprep.subr.mxu0 %v10425_v14  ;;  %8998 = vmatprep.subr.mxu1 %v5876_v28  ;;  %v1212_v40 = vadd.f32 %v1211_v39, %v1128_v52  ;;  %v1303_v42 = vadd.f32 %v8534_v32, %v1219_v57  ;;  %v10589_v41 = vand.u32 4294901760, %v8008_v17  ;;  %v5815_v46 = vand.u32 4294901760, %v5814_v12 }
 0x1c1   : > { %8970 = vmatpush3.msra.mxu0 %v10425_v14  ;;  %8999 = vmatpush3.msra.mxu1 %v5876_v28  ;;  %v5823_v14 = vand.u32 4294901760, %v10565_v34 }
 0x1c2   : > { %8971 = vmatprep.subr.mxu0 %v10434_v55  ;;  %9001 = vmatmul.mubr.f32.vlgmr.msra.gmra.mxu1 %v10555_v10  ;;  %v1295_v50 = vadd.f32 %v1294_v44, %v1212_v40  ;;  %v10606_v4 = vsub.f32 %v8008_v17, %v10589_v41  ;;  %v8570_v19 = vpop.f32.mrf.mxu1  ;;  %v10678_v40 = vand.u32 4294901760, %v8012_v33 }
 0x1c3   : > { %9012 = vmatprep.subr.mxu1 %v10473_v37  ;;  %8972 = vmatpush3.msra.mxu0 %v10434_v55  ;;  %v10596_v55 = vsub.f32 %v8009_v36, %v10580_v45  ;;  %v5824_v61 = vsub.f32 %v10565_v34, %v5823_v14 }
 0x1c4   : > { %9013 = vmatpush3.msra.mxu1 %v10473_v37  ;;  %9018 = vmatprep.mubr.f32.mxu1 %v5813_v31  ;;  %v10626_v20 = vand.u32 4294901760, %v10606_v4  ;;  %v1657_v51 = vpop.f32.mrf.mxu1 }
 0x1c5   : > { %8974 = vmatmul.mubr.f32.vlgmr.msra.gmra.mxu0 %v10461_v29  ;;  %8985 = vmatprep.subr.mxu0 %v10473_v37  ;;  %v8543_v43 = vpop.f32.mrf.mxu0  ;;  %v10601_v29 = vand.u32 4294901760, %v10586_v38  ;;  %v10615_v11 = vand.u32 4294901760, %v10596_v55  ;;  %v5825_v60 = vand.u32 4294901760, %v5824_v61 }
 0x1c6   : > { %9014 = vmatprep.subr.mxu1 %v10486_v53  ;;  %8986 = vmatpush3.msra.mxu0 %v10473_v37  ;;  %v1389_v58 = vadd.f32 %v8543_v43, %v1303_v42  ;;  %v6407_v24 = vsub.f32 %v10606_v4, %v10626_v20  ;;  %v6792_v43 = vld [vmem:[#allocation4 + $0x6] sm:$0xff] }
 0x1c7   : > { %8991 = vmatprep.mubr.f32.mxu0 %v5815_v46  ;;  %9015 = vmatpush3.msra.mxu1 %v10486_v53  ;;  %v1382_v2 = vpop.f32.mrf.mxu0  ;;  %v6393_v18 = vsub.f32 %v10586_v38, %v10601_v29  ;;  %v6400_v22 = vsub.f32 %v10596_v55, %v10615_v11 }
 0x1c8   : > { %8987 = vmatprep.subr.mxu0 %v10486_v53  ;;  %9016 = vmatprep.subr.mxu1 %v10495_v62  ;;  %v10608_v5 = vadd.f32 %v8552_v48, %v1389_v58  ;;  %v1383_v6 = vadd.f32 %v1382_v2, %v1295_v50 }
 0x1c9   : > { %8988 = vmatpush3.msra.mxu0 %v10486_v53  ;;  %9017 = vmatpush3.msra.mxu1 %v10495_v62  ;;  %v6394_v1 = vand.u32 4294901760, %v6393_v18  ;;  %v6401_v26 = vand.u32 4294901760, %v6400_v22 }
 0x1ca   : > { %8989 = vmatprep.subr.mxu0 %v10495_v62  ;;  %9019 = vmatmul.mubr.f32.vlgmr.msra.gmra.mxu1 %v5823_v14  ;;  %v10617_v13 = vadd.f32 %v1462_v7, %v1383_v6  ;;  %v8588_v28 = vpop.f32.mrf.mxu1  ;;  %v6799_v7 = vsel %vm257_vm2, %v6792_v43, 0 }
 0x1cb   : > { %9030 = vmatprep.subr.mxu1 %v10473_v37  ;;  %8990 = vmatpush3.msra.mxu0 %v10495_v62 }
 0x1cc   : > { %9031 = vmatpush3.msra.mxu1 %v10473_v37  ;;  %9036 = vmatprep.mubr.f32.mxu1 %v10531_v16  ;;  %v1824_v39 = vpop.f32.mrf.mxu1 }
 0x1cd   : > { %8992 = vmatmul.mubr.f32.vlgmr.msra.gmra.mxu0 %v5825_v60  ;;  %9003 = vmatprep.subr.mxu0 %v10492_v54  ;;  %v8561_v21 = vpop.f32.mrf.mxu0 }
 0x1ce   : > { %9032 = vmatprep.subr.mxu1 %v10486_v53  ;;  %9004 = vmatpush3.msra.mxu0 %v10492_v54  ;;  %v1664_v37 = vadd.f32 %v8570_v19, %v8561_v21  ;;  %v6270_v54 = vsel %vm257_vm2, %v6261_v59, 0 }
 0x1cf   : > { %9009 = vmatprep.mubr.f32.mxu0 %v10547_v23  ;;  %9033 = vmatpush3.msra.mxu1 %v10486_v53  ;;  %v1561_v8 = vpop.f32.mrf.mxu0  ;;  %v10645_v23 = vsub.f32 %v6267_v49, %v10629_v3  ;;  %v8013_v53 = vld [vmem:[%s11075_s1 + $0xa0] sm:$0x3f]  ;;  %v10653_v27 = vand.u32 4294901760, %v6270_v54 }
 0x1d0   : > { %9005 = vmatprep.subr.mxu0 %v10502_v47  ;;  %9034 = vmatprep.subr.mxu1 %v10495_v62  ;;  %v1658_v25 = vadd.f32 %v1657_v51, %v1561_v8 }
 0x1d1   : > { %9006 = vmatpush3.msra.mxu0 %v10502_v47  ;;  %9035 = vmatpush3.msra.mxu1 %v10495_v62  ;;  %v6408_v62 = vand.u32 4294901760, %v6407_v24  ;;  %v6805_v47 = vsel %vm429_vm3, %v8013_v53, 0  ;;  %v6345_v52 = vand.u32 4294901760, %v10645_v23  ;;  %v10663_v31 = vsub.f32 %v6270_v54, %v10653_v27 }
 0x1d2   : > { %9007 = vmatprep.subr.mxu0 %v10512_v9  ;;  %9037 = vmatmul.mubr.f32.vlgmr.msra.gmra.mxu1 %v10555_v10  ;;  %v10665_v32 = vand.u32 4294901760, %v6805_v47  ;;  %v8606_v50 = vpop.f32.mrf.mxu1 }
 0x1d3   : > { %9048 = vmatprep.subr.mxu1 %v6394_v1  ;;  %9008 = vmatpush3.msra.mxu0 %v10512_v9 }
 0x1d4   : > { %9049 = vmatpush3.msra.mxu1 %v6394_v1  ;;  %9054 = vmatprep.mubr.f32.mxu1 %v10629_v3  ;;  %v10684_v12 = vsub.f32 %v6805_v47, %v10665_v32  ;;  %v1992_v6 = vpop.f32.mrf.mxu1  ;;  %v6793_v1 = vld [vmem:[#allocation4 + $0xe] sm:$0xff] }
 0x1d5   : > { %9010 = vmatmul.mubr.f32.vlgmr.msra.gmra.mxu0 %v10565_v34  ;;  %9021 = vmatprep.subr.mxu0 %v10507_v63  ;;  %v8579_v30 = vpop.f32.mrf.mxu0 }
 0x1d6   : > { %9050 = vmatprep.subr.mxu1 %v6401_v26  ;;  %9022 = vmatpush3.msra.mxu0 %v10507_v63  ;;  %v1749_v9 = vadd.f32 %v8579_v30, %v1664_v37  ;;  %v6346_v63 = vsub.f32 %v10645_v23, %v6345_v52  ;;  %v10729_v37 = vand.u32 4294901760, %v6799_v7 }
 0x1d7   : > { %9027 = vmatprep.mubr.f32.mxu0 %v10531_v16  ;;  %9051 = vmatpush3.msra.mxu1 %v6401_v26  ;;  %v1741_v57 = vpop.f32.mrf.mxu0  ;;  %v8011_v16 = vld [vmem:[%s11075_s1 + $0x90] sm:$0xff] }
 0x1d8   : > { %9023 = vmatprep.subr.mxu0 %v10519_v56  ;;  %9052 = vmatprep.subr.mxu1 %v6408_v62  ;;  %v1742_v34 = vadd.f32 %v1741_v57, %v1658_v25  ;;  %v1833_v36 = vadd.f32 %v8588_v28, %v1749_v9  ;;  %v10687_v17 = vand.u32 4294901760, %v8011_v16  ;;  %v6347_v44 = vand.u32 4294901760, %v6346_v63 }
 0x1d9   : > { %9024 = vmatpush3.msra.mxu0 %v10519_v56  ;;  %9053 = vmatpush3.msra.mxu1 %v6408_v62  ;;  %v6355_v56 = vand.u32 4294901760, %v10663_v31 }
 0x1da   : > { %9025 = vmatprep.subr.mxu0 %v10528_v15  ;;  %9055 = vmatmul.mubr.f32.vlgmr.msra.gmra.mxu1 %v10653_v27  ;;  %v1825_v42 = vadd.f32 %v1824_v39, %v1742_v34  ;;  %v10704_v61 = vsub.f32 %v8011_v16, %v10687_v17  ;;  %v8624_v21 = vpop.f32.mrf.mxu1 }
 0x1db   : > { %9066 = vmatprep.subr.mxu1 %v10567_v35  ;;  %9026 = vmatpush3.msra.mxu0 %v10528_v15  ;;  %v10694_v15 = vsub.f32 %v8012_v33, %v10678_v40  ;;  %v6356_v48 = vsub.f32 %v10663_v31, %v6355_v56 }
 0x1dc   : > { %9067 = vmatpush3.msra.mxu1 %v10567_v35  ;;  %9072 = vmatprep.mubr.f32.mxu1 %v6345_v52  ;;  %v10723_v22 = vand.u32 4294901760, %v10704_v61  ;;  %v2189_v24 = vpop.f32.mrf.mxu1 }
 0x1dd   : > { %9028 = vmatmul.mubr.f32.vlgmr.msra.gmra.mxu0 %v10555_v10  ;;  %9039 = vmatprep.subr.mxu0 %v10567_v35  ;;  %v8597_v14 = vpop.f32.mrf.mxu0  ;;  %v10699_v10 = vand.u32 4294901760, %v10684_v12  ;;  %v10711_v49 = vand.u32 4294901760, %v10694_v15  ;;  %v6357_v19 = vand.u32 4294901760, %v6356_v48  ;;  %v7324_v48 = vld [vmem:[#allocation5 + $0x6] sm:$0xff] }
 0x1de   : > { %9068 = vmatprep.subr.mxu1 %v10580_v45  ;;  %9040 = vmatpush3.msra.mxu0 %v10567_v35  ;;  %v1919_v46 = vadd.f32 %v8597_v14, %v1833_v36  ;;  %v6939_v25 = vsub.f32 %v10704_v61, %v10723_v22 }
 0x1df   : > { %9045 = vmatprep.mubr.f32.mxu0 %v6347_v44  ;;  %9069 = vmatpush3.msra.mxu1 %v10580_v45  ;;  %v1912_v58 = vpop.f32.mrf.mxu0  ;;  %v6925_v59 = vsub.f32 %v10684_v12, %v10699_v10 }
 0x1e0   : > { %9041 = vmatprep.subr.mxu0 %v10580_v45  ;;  %9070 = vmatprep.subr.mxu1 %v10589_v41  ;;  %v1999_v0 = vadd.f32 %v8606_v50, %v1919_v46  ;;  %v1913_v2 = vadd.f32 %v1912_v58, %v1825_v42 }
 0x1e1   : > { %9042 = vmatpush3.msra.mxu0 %v10580_v45  ;;  %9071 = vmatpush3.msra.mxu1 %v10589_v41 }
 0x1e2   : > { %9043 = vmatprep.subr.mxu0 %v10589_v41  ;;  %9073 = vmatmul.mubr.f32.vlgmr.msra.gmra.mxu1 %v6355_v56  ;;  %v10714_v60 = vadd.f32 %v1999_v0, %v10608_v5  ;;  %v1993_v18 = vadd.f32 %v1992_v6, %v1913_v2  ;;  %v8642_v52 = vpop.f32.mrf.mxu1 }
 0x1e3   : > { %9084 = vmatprep.subr.mxu1 %v10567_v35  ;;  %9044 = vmatpush3.msra.mxu0 %v10589_v41 }
 0x1e4   : > { %9085 = vmatpush3.msra.mxu1 %v10567_v35  ;;  %9090 = vmatprep.mubr.f32.mxu1 %v10629_v3  ;;  %v10726_v5 = vadd.f32 %v1993_v18, %v10617_v13  ;;  %v6932_v35 = vsub.f32 %v10694_v15, %v10711_v49  ;;  %v6926_v13 = vand.u32 4294901760, %v6925_v59  ;;  %v2356_v36 = vpop.f32.mrf.mxu1 }
 0x1e5   : > { %9046 = vmatmul.mubr.f32.vlgmr.msra.gmra.mxu0 %v6357_v19  ;;  %9057 = vmatprep.subr.mxu0 %v10586_v38  ;;  %v8615_v51 = vpop.f32.mrf.mxu0 }
 0x1e6   : > { %9086 = vmatprep.subr.mxu1 %v10580_v45  ;;  %9058 = vmatpush3.msra.mxu0 %v10586_v38  ;;  %v2196_v8 = vadd.f32 %v8624_v21, %v8615_v51  ;;  %v6802_v38 = vsel %vm257_vm2, %v6793_v1, 0  ;;  %v6933_v26 = vand.u32 4294901760, %v6932_v35 }
 0x1e7   : > { %9063 = vmatprep.mubr.f32.mxu0 %v10645_v23  ;;  %9087 = vmatpush3.msra.mxu1 %v10580_v45  ;;  %v2093_v54 = vpop.f32.mrf.mxu0  ;;  %v10745_v23 = vsub.f32 %v6799_v7, %v10729_v37  ;;  %v8016_v45 = vld [vmem:[%s11075_s1 + $0x148] sm:$0x3f]  ;;  %v10753_v62 = vand.u32 4294901760, %v6802_v38  ;;  %v7331_v7 = vsel %vm257_vm2, %v7324_v48, 0 }
 0x1e8   : > { %9059 = vmatprep.subr.mxu0 %v10596_v55  ;;  %9088 = vmatprep.subr.mxu1 %v10589_v41  ;;  %v2190_v53 = vadd.f32 %v2189_v24, %v2093_v54 }
 0x1e9   : > { %9060 = vmatpush3.msra.mxu0 %v10596_v55  ;;  %9089 = vmatpush3.msra.mxu1 %v10589_v41  ;;  %v6940_v41 = vand.u32 4294901760, %v6939_v25  ;;  %v7337_v55 = vsel %vm429_vm3, %v8016_v45, 0  ;;  %v6877_v47 = vand.u32 4294901760, %v10745_v23  ;;  %v10763_v30 = vsub.f32 %v6802_v38, %v10753_v62 }
 0x1ea   : > { %9061 = vmatprep.subr.mxu0 %v10606_v4  ;;  %9091 = vmatmul.mubr.f32.vlgmr.msra.gmra.mxu1 %v10653_v27  ;;  %v10765_v9 = vand.u32 4294901760, %v7337_v55  ;;  %v8660_v44 = vpop.f32.mrf.mxu1 }
 0x1eb   : > { %9102 = vmatprep.subr.mxu1 %v6926_v13  ;;  %9062 = vmatpush3.msra.mxu0 %v10606_v4 }
 0x1ec   : > { %9103 = vmatpush3.msra.mxu1 %v6926_v13  ;;  %9108 = vmatprep.mubr.f32.mxu1 %v10729_v37  ;;  %v10784_v39 = vsub.f32 %v7337_v55, %v10765_v9  ;;  %v2524_v6 = vpop.f32.mrf.mxu1  ;;  %v7325_v13 = vld [vmem:[#allocation5 + $0xe] sm:$0xff] }
 0x1ed   : > { %9064 = vmatmul.mubr.f32.vlgmr.msra.gmra.mxu0 %v10663_v31  ;;  %9075 = vmatprep.subr.mxu0 %v10601_v29  ;;  %v8633_v28 = vpop.f32.mrf.mxu0  ;;  %v8015_v31 = vld [vmem:[%s11075_s1 + $0x140] sm:$0xff] }
 0x1ee   : > { %9104 = vmatprep.subr.mxu1 %v6933_v26  ;;  %9076 = vmatpush3.msra.mxu0 %v10601_v29  ;;  %v2281_v4 = vadd.f32 %v8633_v28, %v2196_v8  ;;  %v6878_v29 = vsub.f32 %v10745_v23, %v6877_v47  ;;  %v10778_v63 = vand.u32 4294901760, %v8015_v31  ;;  %v10829_v8 = vand.u32 4294901760, %v7331_v7 }
 0x1ef   : > { %9081 = vmatprep.mubr.f32.mxu0 %v10629_v3  ;;  %9105 = vmatpush3.msra.mxu1 %v6933_v26  ;;  %v2273_v33 = vpop.f32.mrf.mxu0  ;;  %v8014_v3 = vld [vmem:[%s11075_s1 + $0x138] sm:$0xff] }
 0x1f0   : > { %9077 = vmatprep.subr.mxu0 %v10615_v11  ;;  %9106 = vmatprep.subr.mxu1 %v6940_v41  ;;  %v2274_v57 = vadd.f32 %v2273_v33, %v2190_v53  ;;  %v2365_v34 = vadd.f32 %v8642_v52, %v2281_v4  ;;  %v10787_v42 = vand.u32 4294901760, %v8014_v3  ;;  %v6879_v56 = vand.u32 4294901760, %v6878_v29 }
 0x1f1   : > { %9078 = vmatpush3.msra.mxu0 %v10615_v11  ;;  %9107 = vmatpush3.msra.mxu1 %v6940_v41  ;;  %v6887_v11 = vand.u32 4294901760, %v10763_v30 }
 0x1f2   : > { %9079 = vmatprep.subr.mxu0 %v10626_v20  ;;  %9109 = vmatmul.mubr.f32.vlgmr.msra.gmra.mxu1 %v10753_v62  ;;  %v2357_v16 = vadd.f32 %v2356_v36, %v2274_v57  ;;  %v10804_v58 = vsub.f32 %v8014_v3, %v10787_v42  ;;  %v8678_v51 = vpop.f32.mrf.mxu1 }
 0x1f3   : > { %9120 = vmatprep.subr.mxu1 %v10665_v32  ;;  %9080 = vmatpush3.msra.mxu0 %v10626_v20  ;;  %v10794_v20 = vsub.f32 %v8015_v31, %v10778_v63  ;;  %v6888_v46 = vsub.f32 %v10763_v30, %v6887_v11 }
 0x1f4   : > { %9121 = vmatpush3.msra.mxu1 %v10665_v32  ;;  %9126 = vmatprep.mubr.f32.mxu1 %v6877_v47  ;;  %v10823_v35 = vand.u32 4294901760, %v10804_v58  ;;  %v2721_v25 = vpop.f32.mrf.mxu1 }
 0x1f5   : > { %9082 = vmatmul.mubr.f32.vlgmr.msra.gmra.mxu0 %v10653_v27  ;;  %9093 = vmatprep.subr.mxu0 %v10665_v32  ;;  %v8651_v50 = vpop.f32.mrf.mxu0  ;;  %v10799_v27 = vand.u32 4294901760, %v10784_v39  ;;  %v10811_v18 = vand.u32 4294901760, %v10794_v20  ;;  %v6889_v21 = vand.u32 4294901760, %v6888_v46 }
 0x1f6   : > { %9122 = vmatprep.subr.mxu1 %v10678_v40  ;;  %9094 = vmatpush3.msra.mxu0 %v10665_v32  ;;  %v2451_v14 = vadd.f32 %v8651_v50, %v2365_v34  ;;  %v7471_v53 = vsub.f32 %v10804_v58, %v10823_v35 }
 0x1f7   : > { %9099 = vmatprep.mubr.f32.mxu0 %v6879_v56  ;;  %9123 = vmatpush3.msra.mxu1 %v10678_v40  ;;  %v2444_v43 = vpop.f32.mrf.mxu0  ;;  %v7457_v1 = vsub.f32 %v10784_v39, %v10799_v27 }
 0x1f8   : > { %9095 = vmatprep.subr.mxu0 %v10678_v40  ;;  %9124 = vmatprep.subr.mxu1 %v10687_v17  ;;  %v2531_v0 = vadd.f32 %v8660_v44, %v2451_v14  ;;  %v2445_v2 = vadd.f32 %v2444_v43, %v2357_v16  ;;  %v7472_v41 = vand.u32 4294901760, %v7471_v53 }
 0x1f9   : > { %9096 = vmatpush3.msra.mxu0 %v10678_v40  ;;  %9125 = vmatpush3.msra.mxu1 %v10687_v17 }
 0x1fa   : > { %9097 = vmatprep.subr.mxu0 %v10687_v17  ;;  %9127 = vmatmul.mubr.f32.vlgmr.msra.gmra.mxu1 %v6887_v11  ;;  %v10814_v19 = vadd.f32 %v2531_v0, %v10714_v60  ;;  %v2525_v59 = vadd.f32 %v2524_v6, %v2445_v2 }
 0x1fb   : > { %9138 = vmatprep.subr.mxu1 %v10665_v32  ;;  %9098 = vmatpush3.msra.mxu0 %v10687_v17 }
 0x1fc   : > { %9139 = vmatpush3.msra.mxu1 %v10665_v32  ;;  %9144 = vmatprep.mubr.f32.mxu1 %v10729_v37  ;;  %v10826_v60 = vadd.f32 %v2525_v59, %v10726_v5  ;;  %v7464_v32 = vsub.f32 %v10794_v20, %v10811_v18  ;;  %v7458_v5 = vand.u32 4294901760, %v7457_v1 }
 0x1fd   : > { %9100 = vmatmul.mubr.f32.vlgmr.msra.gmra.mxu0 %v6889_v21  ;;  %9111 = vmatprep.subr.mxu0 %v10684_v12  ;;  %v8669_v24 = vpop.f32.mrf.mxu0 }
 0x1fe   : > { %9140 = vmatprep.subr.mxu1 %v10678_v40  ;;  %9112 = vmatpush3.msra.mxu0 %v10684_v12  ;;  %v2728_v54 = vadd.f32 %v8678_v51, %v8669_v24  ;;  %v7334_v12 = vsel %vm257_vm2, %v7325_v13, 0 }
 0x1ff   : > { %9117 = vmatprep.mubr.f32.mxu0 %v10745_v23  ;;  %9141 = vmatpush3.msra.mxu1 %v10678_v40  ;;  %v2625_v38 = vpop.f32.mrf.mxu0  ;;  %v10845_v23 = vsub.f32 %v7331_v7, %v10829_v8  ;;  %v7465_v40 = vand.u32 4294901760, %v7464_v32  ;;  %v10850_v26 = vand.u32 4294901760, %v7334_v12 }
 0x200   : > { %9113 = vmatprep.subr.mxu0 %v10694_v15  ;;  %9142 = vmatprep.subr.mxu1 %v10687_v17  ;;  %v2722_v45 = vadd.f32 %v2721_v25, %v2625_v38 }
 0x201   : > { %9114 = vmatpush3.msra.mxu0 %v10694_v15  ;;  %9143 = vmatpush3.msra.mxu1 %v10687_v17  ;;  %v7409_v17 = vand.u32 4294901760, %v10845_v23  ;;  %v8696_v15 = vpop.f32.mrf.mxu1 }
 0x202   : > { %9115 = vmatprep.subr.mxu0 %v10704_v61  ;;  %9145 = vmatmul.mubr.f32.vlgmr.msra.gmra.mxu1 %v10753_v62 }
 0x203   : > { %9156 = vmatprep.subr.mxu1 %v7458_v5  ;;  %9116 = vmatpush3.msra.mxu0 %v10704_v61  ;;  %v10859_v61 = vsub.f32 %v7334_v12, %v10850_v26  ;;  %v2888_v31 = vpop.f32.mrf.mxu1 }
 0x204   : > { %9157 = vmatpush3.msra.mxu1 %v7458_v5  ;;  %9162 = vmatprep.mubr.f32.mxu1 %v10829_v8 }
 0x205   : > { %9118 = vmatmul.mubr.f32.vlgmr.msra.gmra.mxu0 %v10763_v30  ;;  %9129 = vmatprep.subr.mxu0 %v10699_v10  ;;  %v8687_v55 = vpop.f32.mrf.mxu0  ;;  %v7410_v30 = vsub.f32 %v10845_v23, %v7409_v17  ;;  %v8714_v33 = vpop.f32.mrf.mxu1 }
 0x206   : > { %9158 = vmatprep.subr.mxu1 %v7465_v40  ;;  %9130 = vmatpush3.msra.mxu0 %v10699_v10  ;;  %v2813_v47 = vadd.f32 %v8687_v55, %v2728_v54 }
 0x207   : > { %9135 = vmatprep.mubr.f32.mxu0 %v10729_v37  ;;  %9159 = vmatpush3.msra.mxu1 %v7465_v40  ;;  %v2805_v52 = vpop.f32.mrf.mxu0  ;;  %v7419_v37 = vand.u32 4294901760, %v10859_v61  ;;  %v3056_v36 = vpop.f32.mrf.mxu1 }
 0x208   : > { %9131 = vmatprep.subr.mxu0 %v10711_v49  ;;  %9160 = vmatprep.subr.mxu1 %v7472_v41  ;;  %v2806_v28 = vadd.f32 %v2805_v52, %v2722_v45  ;;  %v2897_v4 = vadd.f32 %v8696_v15, %v2813_v47 }
 0x209   : > { %9132 = vmatpush3.msra.mxu0 %v10711_v49  ;;  %9161 = vmatpush3.msra.mxu1 %v7472_v41  ;;  %v7411_v49 = vand.u32 4294901760, %v7410_v30 }
 0x20a   : > { %9133 = vmatprep.subr.mxu0 %v10723_v22  ;;  %9163 = vmatmul.mubr.f32.vlgmr.msra.gmra.mxu1 %v10850_v26  ;;  %v2889_v10 = vadd.f32 %v2888_v31, %v2806_v28  ;;  %v8732_v44 = vpop.f32.mrf.mxu1 }
 0x20b   : > { %9174 = vmatprep.subr.mxu1 %v10765_v9  ;;  %9134 = vmatpush3.msra.mxu0 %v10723_v22  ;;  %v7420_v22 = vsub.f32 %v10859_v61, %v7419_v37 }
 0x20c   : > { %9175 = vmatpush3.msra.mxu1 %v10765_v9  ;;  %9180 = vmatprep.mubr.f32.mxu1 %v7409_v17  ;;  %v3253_v48 = vpop.f32.mrf.mxu1 }
 0x20d   : > { %9136 = vmatmul.mubr.f32.vlgmr.msra.gmra.mxu0 %v10753_v62  ;;  %9147 = vmatprep.subr.mxu0 %v10765_v9  ;;  %v8705_v57 = vpop.f32.mrf.mxu0  ;;  %v7421_v56 = vand.u32 4294901760, %v7420_v22 }
 0x20e   : > { %9176 = vmatprep.subr.mxu1 %v10778_v63  ;;  %9148 = vmatpush3.msra.mxu0 %v10765_v9  ;;  %v2983_v34 = vadd.f32 %v8705_v57, %v2897_v4 }
 0x20f   : > { %9153 = vmatprep.mubr.f32.mxu0 %v7411_v49  ;;  %9177 = vmatpush3.msra.mxu1 %v10778_v63  ;;  %v2976_v29 = vpop.f32.mrf.mxu0 }
 0x210   : > { %9149 = vmatprep.subr.mxu0 %v10778_v63  ;;  %9178 = vmatprep.subr.mxu1 %v10787_v42  ;;  %v3063_v62 = vadd.f32 %v8714_v33, %v2983_v34  ;;  %v2977_v3 = vadd.f32 %v2976_v29, %v2889_v10 }
 0x211   : > { %9150 = vmatpush3.msra.mxu0 %v10778_v63  ;;  %9179 = vmatpush3.msra.mxu1 %v10787_v42 }
 0x212   : > { %9151 = vmatprep.subr.mxu0 %v10787_v42  ;;  %9181 = vmatmul.mubr.f32.vlgmr.msra.gmra.mxu1 %v7419_v37  ;;  %v3067_v16 = vadd.f32 %v3063_v62, %v10814_v19  ;;  %v3057_v11 = vadd.f32 %v3056_v36, %v2977_v3 }
 0x213   : > { %9192 = vmatprep.subr.mxu1 %v10765_v9  ;;  %9152 = vmatpush3.msra.mxu0 %v10787_v42 }
 0x214   : > { %9193 = vmatpush3.msra.mxu1 %v10765_v9  ;;  %9198 = vmatprep.mubr.f32.mxu1 %v10829_v8  ;;  %v3066_v50 = vadd.f32 %v3057_v11, %v10826_v60 }
 0x215   : > { %9154 = vmatmul.mubr.f32.vlgmr.msra.gmra.mxu0 %v7421_v56  ;;  %9165 = vmatprep.subr.mxu0 %v10784_v39  ;;  %v8723_v14 = vpop.f32.mrf.mxu0 }
 0x216   : > { %9194 = vmatprep.subr.mxu1 %v10778_v63  ;;  %9166 = vmatpush3.msra.mxu0 %v10784_v39  ;;  %v3260_v46 = vadd.f32 %v8732_v44, %v8723_v14 }
 0x217   : > { %9171 = vmatprep.mubr.f32.mxu0 %v10845_v23  ;;  %9195 = vmatpush3.msra.mxu1 %v10778_v63  ;;  %v3157_v43 = vpop.f32.mrf.mxu0  ;;  %v8750_v63 = vpop.f32.mrf.mxu1 }
 0x218   : > { %9167 = vmatprep.subr.mxu0 %v10794_v20  ;;  %9196 = vmatprep.subr.mxu1 %v10787_v42  ;;  %v3254_v9 = vadd.f32 %v3253_v48, %v3157_v43 }
 0x219   : > { %9168 = vmatpush3.msra.mxu0 %v10794_v20  ;;  %9197 = vmatpush3.msra.mxu1 %v10787_v42  ;;  %v3420_v2 = vpop.f32.mrf.mxu1 }
 0x21a   : > { %9169 = vmatprep.subr.mxu0 %v10804_v58  ;;  %9199 = vmatmul.mubr.f32.vlgmr.msra.gmra.mxu1 %v10850_v26 }
 0x21b   : > { %9170 = vmatpush3.msra.mxu0 %v10804_v58  ;;  %v8768_v6 = vpop.f32.mrf.mxu1 }
 0x21c   : > { %9172 = vmatmul.mubr.f32.vlgmr.msra.gmra.mxu0 %v10859_v61  ;;  %9183 = vmatprep.subr.mxu0 %v10799_v27 }
 0x21d   : > { %9184 = vmatpush3.msra.mxu0 %v10799_v27  ;;  %9189 = vmatprep.mubr.f32.mxu0 %v10829_v8  ;;  %v8741_v39 = vpop.f32.mrf.mxu0  ;;  %v3588_v51 = vpop.f32.mrf.mxu1 }
 0x21e   : > { %9185 = vmatprep.subr.mxu0 %v10811_v18  ;;  %v3345_v20 = vadd.f32 %v8741_v39, %v3260_v46 }
 0x21f   : > { %9186 = vmatpush3.msra.mxu0 %v10811_v18  ;;  %v3337_v42 = vpop.f32.mrf.mxu0 }
 0x220   : > { %9187 = vmatprep.subr.mxu0 %v10823_v35  ;;  %v3338_v0 = vadd.f32 %v3337_v42, %v3254_v9  ;;  %v3429_v58 = vadd.f32 %v8750_v63, %v3345_v20 }
 0x221   : > { %9188 = vmatpush3.msra.mxu0 %v10823_v35 }
 0x222   : > { %9190 = vmatmul.mubr.f32.vlgmr.msra.gmra.mxu0 %v10850_v26  ;;  %v3421_v27 = vadd.f32 %v3420_v2, %v3338_v0  ;;  %v8786_v8 = vpop.f32.mrf.mxu1 }
 0x224   : > { %v3785_v54 = vpop.f32.mrf.mxu1 }
 0x225   : > { %v8759_v7 = vpop.f32.mrf.mxu0 }
 0x226   : > { %v3515_v19 = vadd.f32 %v8759_v7, %v3429_v58 }
 0x227   : > { %v3508_v59 = vpop.f32.mrf.mxu0 }
 0x228   : > { %v3595_v21 = vadd.f32 %v8768_v6, %v3515_v19  ;;  %v3509_v1 = vadd.f32 %v3508_v59, %v3421_v27 }
 0x22a   : > { %v3599_v60 = vadd.f32 %v3595_v21, %v3067_v16  ;;  %v3589_v18 = vadd.f32 %v3588_v51, %v3509_v1  ;;  %v8804_v25 = vpop.f32.mrf.mxu1 }
 0x22c   : > { %v3598_v13 = vadd.f32 %v3589_v18, %v3066_v50  ;;  %v3952_v40 = vpop.f32.mrf.mxu1 }
 0x22d   : > { %v8777_v24 = vpop.f32.mrf.mxu0 }
 0x22e   : > { %v3792_v32 = vadd.f32 %v8786_v8, %v8777_v24 }
 0x22f   : > { %v3689_v5 = vpop.f32.mrf.mxu0 }
 0x230   : > { %v3786_v35 = vadd.f32 %v3785_v54, %v3689_v5 }
 0x232   : > { %v8822_v41 = vpop.f32.mrf.mxu1 }
 0x234   : > { %v4120_v52 = vpop.f32.mrf.mxu1 }
 0x235   : > { %v8795_v38 = vpop.f32.mrf.mxu0 }
 0x236   : > { %v3877_v53 = vadd.f32 %v8795_v38, %v3792_v32 }
 0x237   : > { %v3869_v12 = vpop.f32.mrf.mxu0 }
 0x238   : > { %v3870_v45 = vadd.f32 %v3869_v12, %v3786_v35  ;;  %v3961_v23 = vadd.f32 %v8804_v25, %v3877_v53 }
 0x23a   : > { %v3953_v26 = vadd.f32 %v3952_v40, %v3870_v45  ;;  %v8840_v31 = vpop.f32.mrf.mxu1 }
 0x23c   : > { %v10912_v37 = vpop.f32.mrf.mxu1 }
 0x23d   : > { %v8813_v17 = vpop.f32.mrf.mxu0 }
 0x23e   : > { %v4047_v15 = vadd.f32 %v8813_v17, %v3961_v23 }
 0x23f   : > { %v4040_v55 = vpop.f32.mrf.mxu0 }
 0x240   : > { %v4127_v47 = vadd.f32 %v8822_v41, %v4047_v15  ;;  %v4041_v61 = vadd.f32 %v4040_v55, %v3953_v26 }
 0x242   : > { %v10908_v28 = vadd.f32 %v4127_v47, %v3599_v60  ;;  %v4121_v4 = vadd.f32 %v4120_v52, %v4041_v61  ;;  %v10914_v33 = vpop.f32.mrf.mxu1 }
 0x244   : > { %11079 = vst [vmem:[#allocation9_spill] sm:$0xff] %v10908_v28  ;;  %v10910_v30 = vadd.f32 %v4121_v4, %v3598_v13  ;;  %v10916_v34 = vpop.f32.mrf.mxu1 }
 0x245   : > { %v8831_v10 = vpop.f32.mrf.mxu0 }
 0x246   : > { %11080 = vst [vmem:[#allocation10_spill] sm:$0xff] %v10910_v30 }
 0x247   : > { %v4221_v49 = vpop.f32.mrf.mxu0 }
 0x24a   : > { %v10918_v29 = vpop.f32.mrf.mxu1 }
 0x24c   : > { %v10922_v3 = vpop.f32.mrf.mxu1 }
 0x24d   : > { %v8849_v57 = vpop.f32.mrf.mxu0 }
 0x24f   : > { %v4401_v22 = vpop.f32.mrf.mxu0 }
 0x252   : > { %v8894_v16 = vpop.f32.mrf.mxu1 }
 0x254   : > { %v4849_v56 = vpop.f32.mrf.mxu1 }
 0x255   : > { %v10920_v62 = vpop.f32.mrf.mxu0 }
 0x257   : > { %v10924_v36 = vpop.f32.mrf.mxu0 }
 0x25a   : > { %v10926_v50 = vpop.f32.mrf.mxu1 }
 0x25c   : > { %v10928_v46 = vpop.f32.mrf.mxu1 }
 0x25d   : > { %v8885_v11 = vpop.f32.mrf.mxu0 }
 0x25f   : > { %v4753_v44 = vpop.f32.mrf.mxu0 }
 0x260   : > { %v4850_v28 = vadd.f32 %v4849_v56, %v4753_v44 }
 0x262   : > { %v10930_v43 = vpop.f32.mrf.mxu1 }
 0x263   : > { %11081 = vst [vmem:[#allocation11_spill] sm:$0xff] %v10930_v43 }
 0x264   : > { %v10934_v63 = vpop.f32.mrf.mxu1 }
 0x265   : > { %v8903_v14 = vpop.f32.mrf.mxu0  ;;  %11082 = vst [vmem:[#allocation12_spill] sm:$0xff] %v10934_v63 }
 0x267   : > { %v4933_v48 = vpop.f32.mrf.mxu0 }
 0x26a   : > { %v8948_v20 = vpop.f32.mrf.mxu1 }
 0x26c   : > { %v5381_v0 = vpop.f32.mrf.mxu1 }
 0x26d   : > { %v10932_v9 = vpop.f32.mrf.mxu0 }
 0x26f   : > { %v10936_v39 = vpop.f32.mrf.mxu0 }
 0x272   : > { %v10938_v2 = vpop.f32.mrf.mxu1 }
 0x274   : > { %v10940_v6 = vpop.f32.mrf.mxu1 }
 0x275   : > { %v8939_v42 = vpop.f32.mrf.mxu0 }
 0x277   : > { %v5285_v58 = vpop.f32.mrf.mxu0 }
 0x27a   : > { %v10942_v19 = vpop.f32.mrf.mxu1 }
 0x27b   : > { %11083 = vst [vmem:[#allocation13_spill] sm:$0xff] %v10942_v19  ;;  %v4318_v19 = vadd.f32 %v10912_v37, %v4221_v49 }
 0x27c   : > { %v10946_v21 = vpop.f32.mrf.mxu1 }
 0x27d   : > { %v8957_v27 = vpop.f32.mrf.mxu0  ;;  %11084 = vst [vmem:[#allocation14_spill] sm:$0xff] %v10946_v21 }
 0x27f   : > { %v5465_v7 = vpop.f32.mrf.mxu0 }
 0x282   : > { %v9002_v51 = vpop.f32.mrf.mxu1 }
 0x284   : > { %v5913_v18 = vpop.f32.mrf.mxu1 }
 0x285   : > { %v10944_v59 = vpop.f32.mrf.mxu0 }
 0x287   : > { %v10948_v1 = vpop.f32.mrf.mxu0 }
 0x288   : > { %11085 = vst [vmem:[#allocation15_spill] sm:$0xff] %v10948_v1  ;;  %v5382_v1 = vadd.f32 %v5381_v0, %v5285_v58 }
 0x28a   : > { %v10950_v13 = vpop.f32.mrf.mxu1 }
 0x28c   : > { %v10952_v32 = vpop.f32.mrf.mxu1 }
 0x28d   : > { %v8993_v60 = vpop.f32.mrf.mxu0  ;;  %11086 = vst [vmem:[#allocation16_spill] sm:$0xff] %v10952_v32 }
 0x28e   : > { %v5920_v43 = vadd.f32 %v9002_v51, %v8993_v60  ;;  %v11097_v60 = vld [vmem:[#allocation11_spill] sm:$0xff] }
 0x28f   : > { %v5817_v8 = vpop.f32.mrf.mxu0 }
 0x292   : > { %v10954_v5 = vpop.f32.mrf.mxu1 }
 0x293   : > { %11087 = vst [vmem:[#allocation17_spill] sm:$0xff] %v10954_v5 }
 0x294   : > { %v10958_v25 = vpop.f32.mrf.mxu1 }
 0x295   : > { %v9011_v24 = vpop.f32.mrf.mxu0  ;;  %11089 = vst [vmem:[#allocation19_spill] sm:$0xff] %v10958_v25  ;;  %v4324_v25 = vadd.f32 %v8840_v31, %v8831_v10  ;;  %v5388_v31 = vadd.f32 %v8948_v20, %v8939_v42  ;;  %v4934_v10 = vadd.f32 %v4933_v48, %v4850_v28 }
 0x296   : > { %v6005_v56 = vadd.f32 %v9011_v24, %v5920_v43 }
 0x297   : > { %v5997_v54 = vpop.f32.mrf.mxu0  ;;  %v5017_v28 = vadd.f32 %v10928_v46, %v4934_v10 }
 0x29a   : > { %v9056_v53 = vpop.f32.mrf.mxu1 }
 0x29c   : > { %v6445_v45 = vpop.f32.mrf.mxu1 }
 0x29d   : > { %v10956_v35 = vpop.f32.mrf.mxu0 }
 0x29e   : > { %11088 = vst [vmem:[#allocation18_spill] sm:$0xff] %v10956_v35 }
 0x29f   : > { %v10960_v38 = vpop.f32.mrf.mxu0 }
 0x2a0   : > { %11090 = vst [vmem:[#allocation20_spill] sm:$0xff] %v10960_v38  ;;  %v4409_v38 = vadd.f32 %v8849_v57, %v4324_v25 }
 0x2a2   : > { %v10962_v40 = vpop.f32.mrf.mxu1 }
 0x2a3   : > { %11091 = vst [vmem:[#allocation21_spill] sm:$0xff] %v10962_v40  ;;  %v4856_v40 = vadd.f32 %v8894_v16, %v8885_v11  ;;  %v5466_v16 = vadd.f32 %v5465_v7, %v5382_v1  ;;  %v5914_v11 = vadd.f32 %v5913_v18, %v5817_v8 }
 0x2a4   : > { %v10964_v41 = vpop.f32.mrf.mxu1 }
 0x2a5   : > { %v9047_v12 = vpop.f32.mrf.mxu0  ;;  %11092 = vst [vmem:[#allocation22_spill] sm:$0xff] %v10964_v41  ;;  %v4402_v41 = vadd.f32 %v4401_v22, %v4318_v19  ;;  %v5473_v22 = vadd.f32 %v8957_v27, %v5388_v31  ;;  %v5105_v27 = vadd.f32 %v10936_v39, %v5017_v28  ;;  %v5549_v43 = vadd.f32 %v10940_v6, %v5466_v16  ;;  %v11101_v39 = vld [vmem:[#allocation9_spill] sm:$0xff]  ;;  %v11109_v31 = vld [vmem:[#allocation14_spill] sm:$0xff] }
 0x2a7   : > { %v6349_v23 = vpop.f32.mrf.mxu0  ;;  %v4485_v35 = vadd.f32 %v10916_v34, %v4402_v41  ;;  %v11107_v41 = vld [vmem:[#allocation13_spill] sm:$0xff] }
 0x2a8   : > { %v6446_v48 = vadd.f32 %v6445_v45, %v6349_v23  ;;  %v11104_v45 = vld [vmem:[#allocation12_spill] sm:$0xff] }
 0x2a9   : > { %v4573_v57 = vadd.f32 %v10924_v36, %v4485_v35  ;;  %v5557_v36 = vadd.f32 %v10938_v2, %v5473_v22  ;;  %v11099_v2 = vld [vmem:[#allocation18_spill] sm:$0xff]  ;;  %v5185_v23 = vadd.f32 %v11104_v45, %v5105_v27 }
 0x2aa   : > { %v10966_v15 = vpop.f32.mrf.mxu1  ;;  %v11102_v6 = vld [vmem:[#allocation21_spill] sm:$0xff] }
 0x2ab   : > { %11093 = vst [vmem:[#allocation23_spill] sm:$0xff] %v10966_v15  ;;  %v4493_v15 = vadd.f32 %v10914_v33, %v4409_v38  ;;  %v4653_v0 = vadd.f32 %v10922_v3, %v4573_v57  ;;  %v5643_v46 = vadd.f32 %v10944_v59, %v5557_v36  ;;  %v11098_v3 = vld [vmem:[#allocation15_spill] sm:$0xff]  ;;  %v11105_v59 = vld [vmem:[#allocation20_spill] sm:$0xff] }
 0x2ac   : > { %v10970_v47 = vpop.f32.mrf.mxu1  ;;  %v5637_v8 = vadd.f32 %v11098_v3, %v5549_v43 }
 0x2ad   : > { %v9065_v26 = vpop.f32.mrf.mxu0  ;;  %11095 = vst [vmem:[#allocation25_spill] sm:$0xff] %v10970_v47 }
 0x2ae   : > { %v5717_v10 = vadd.f32 %v11109_v31, %v5637_v8 }
 0x2af   : > { %v6529_v17 = vpop.f32.mrf.mxu0 }
 0x2b0   : > { %v6530_v7 = vadd.f32 %v6529_v17, %v6446_v48  ;;  %v5723_v17 = vadd.f32 %v11107_v41, %v5643_v46 }
 0x2b2   : > { %v9110_v52 = vpop.f32.mrf.mxu1 }
 0x2b4   : > { %v6977_v5 = vpop.f32.mrf.mxu1 }
 0x2b5   : > { %v10968_v55 = vpop.f32.mrf.mxu0 }
 0x2b6   : > { %11094 = vst [vmem:[#allocation24_spill] sm:$0xff] %v10968_v55  ;;  %v4941_v55 = vadd.f32 %v8903_v14, %v4856_v40  ;;  %v5998_v14 = vadd.f32 %v5997_v54, %v5914_v11  ;;  %v11100_v54 = vld [vmem:[#allocation16_spill] sm:$0xff] }
 0x2b7   : > { %v10972_v61 = vpop.f32.mrf.mxu0 }
 0x2b8   : > { %11096 = vst [vmem:[#allocation26_spill] sm:$0xff] %v10972_v61  ;;  %v4579_v61 = vadd.f32 %v10920_v62, %v4493_v15  ;;  %v5025_v33 = vadd.f32 %v10926_v50, %v4941_v55  ;;  %v6452_v62 = vadd.f32 %v9056_v53, %v9047_v12  ;;  %v6081_v35 = vadd.f32 %v11100_v54, %v5998_v14  ;;  %v11103_v53 = vld [vmem:[#allocation10_spill] sm:$0xff]  ;;  %v11112_v14 = vld [vmem:[#allocation19_spill] sm:$0xff] }
 0x2b9   : > { %v4662_v12 = vadd.f32 %v4653_v0, %v11103_v53 }
 0x2ba   : > { %v9128_v63 = vpop.f32.mrf.mxu1  ;;  %v4659_v44 = vadd.f32 %v10918_v29, %v4579_v61  ;;  %v5111_v34 = vadd.f32 %v10932_v9, %v5025_v33  ;;  %v6537_v58 = vadd.f32 %v9065_v26, %v6452_v62  ;;  %v6089_v29 = vadd.f32 %v10950_v13, %v6005_v56 }
 0x2bb   : > { %v5194_v28 = vadd.f32 %v5185_v23, %v4662_v12 }
 0x2bc   : > { %v7144_v32 = vpop.f32.mrf.mxu1  ;;  %v5191_v18 = vadd.f32 %v11097_v60, %v5111_v34  ;;  %v6175_v24 = vadd.f32 %v11099_v2, %v6089_v29  ;;  %v4663_v25 = vadd.f32 %v4659_v44, %v11101_v39  ;;  %v6621_v38 = vadd.f32 %v11102_v6, %v6537_v58 }
 0x2bd   : > { %v9101_v4 = vpop.f32.mrf.mxu0  ;;  %v11108_v15 = vld [vmem:[#allocation24_spill] sm:$0xff]  ;;  %v5726_v43 = vadd.f32 %v5717_v10, %v5194_v28 }
 0x2be   : > { %v6984_v50 = vadd.f32 %v9110_v52, %v9101_v4  ;;  %v6707_v55 = vadd.f32 %v11108_v15, %v6621_v38  ;;  %v5195_v4 = vadd.f32 %v5191_v18, %v4663_v25 }
 0x2bf   : > { %v6881_v21 = vpop.f32.mrf.mxu0  ;;  %v11111_v22 = vld [vmem:[#allocation26_spill] sm:$0xff] }
 0x2c0   : > { %v6978_v1 = vadd.f32 %v6977_v5, %v6881_v21  ;;  %v6169_v21 = vadd.f32 %v11105_v59, %v6081_v35  ;;  %v5727_v36 = vadd.f32 %v5723_v17, %v5195_v4 }
 0x2c2   : > { %v10978_v37 = vpop.f32.mrf.mxu1  ;;  %v6249_v48 = vadd.f32 %v11112_v14, %v6169_v21 }
 0x2c4   : > { %v7312_v20 = vpop.f32.mrf.mxu1 }
 0x2c5   : > { %v9119_v30 = vpop.f32.mrf.mxu0 }
 0x2c6   : > { %v7069_v51 = vadd.f32 %v9119_v30, %v6984_v50  ;;  %v11106_v30 = vld [vmem:[#allocation22_spill] sm:$0xff] }
 0x2c7   : > { %v7061_v47 = vpop.f32.mrf.mxu0  ;;  %v6613_v5 = vadd.f32 %v11106_v30, %v6530_v7 }
 0x2c8   : > { %v7062_v13 = vadd.f32 %v7061_v47, %v6978_v1  ;;  %v7153_v61 = vadd.f32 %v9128_v63, %v7069_v51  ;;  %v11110_v47 = vld [vmem:[#allocation17_spill] sm:$0xff]  ;;  %v11113_v63 = vld [vmem:[#allocation23_spill] sm:$0xff] }
 0x2c9   : > { %v6255_v57 = vadd.f32 %v11110_v47, %v6175_v24  ;;  %v6701_v33 = vadd.f32 %v11111_v22, %v6613_v5  ;;  %v6787_v58 = vadd.f32 %v11113_v63, %v6707_v55 }
 0x2ca   : > { %v9164_v9 = vpop.f32.mrf.mxu1  ;;  %v7145_v44 = vadd.f32 %v7144_v32, %v7062_v13  ;;  %v6258_v32 = vadd.f32 %v6249_v48, %v5726_v43 }
 0x2cb   : > { %v6259_v7 = vadd.f32 %v6255_v57, %v5727_v36 }
 0x2cc   : > { %v7509_v40 = vpop.f32.mrf.mxu1 }
 0x2cd   : > { %v9137_v49 = vpop.f32.mrf.mxu0  ;;  %v6791_v60 = vadd.f32 %v6787_v58, %v6259_v7 }
 0x2ce   : > { %v7239_v56 = vadd.f32 %v9137_v49, %v7153_v61 }
 0x2cf   : > { %v7232_v42 = vpop.f32.mrf.mxu0 }
 0x2d0   : > { %v7233_v50 = vadd.f32 %v7232_v42, %v7145_v44  ;;  %v7319_v46 = vadd.f32 %v10978_v37, %v7239_v56 }
 0x2d2   : > { %v9182_v16 = vpop.f32.mrf.mxu1  ;;  %v7313_v18 = vadd.f32 %v7312_v20, %v7233_v50  ;;  %v7323_v54 = vadd.f32 %v7319_v46, %v6791_v60 }
 0x2d4   : > { %v7676_v29 = vpop.f32.mrf.mxu1 }
 0x2d5   : > { %v9155_v19 = vpop.f32.mrf.mxu0 }
 0x2d6   : > { %v7516_v52 = vadd.f32 %v9164_v9, %v9155_v19  ;;  %v11114_v9 = vld [vmem:[#allocation25_spill] sm:$0xff] }
 0x2d7   : > { %v7413_v26 = vpop.f32.mrf.mxu0  ;;  %v6781_v19 = vadd.f32 %v11114_v9, %v6701_v33 }
 0x2d8   : > { %v7510_v62 = vadd.f32 %v7509_v40, %v7413_v26 }
 0x2d9   : > { %v6790_v24 = vadd.f32 %v6781_v19, %v6258_v32 }
 0x2da   : > { %v9200_v1 = vpop.f32.mrf.mxu1 }
 0x2db   : > { %v7322_v25 = vadd.f32 %v7313_v18, %v6790_v24 }
 0x2dc   : > { %v9173_v11 = vpop.f32.mrf.mxu0  ;;  %v7844_v39 = vpop.f32.mrf.mxu1 }
 0x2dd   : > { %v7601_v34 = vadd.f32 %v9173_v11, %v7516_v52 }
 0x2de   : > { %v7593_v0 = vpop.f32.mrf.mxu0 }
 0x2df   : > { %v7594_v27 = vadd.f32 %v7593_v0, %v7510_v62  ;;  %v7685_v49 = vadd.f32 %v9182_v16, %v7601_v34 }
 0x2e1   : > { %v7677_v8 = vadd.f32 %v7676_v29, %v7594_v27 }
 0x2e2   : > { %v9191_v51 = vpop.f32.mrf.mxu0 }
 0x2e3   : > { %v7771_v3 = vadd.f32 %v9191_v51, %v7685_v49 }
 0x2e4   : > { %v7764_v2 = vpop.f32.mrf.mxu0 }
 0x2e5   : > { %v7851_v42 = vadd.f32 %v9200_v1, %v7771_v3  ;;  %v7765_v35 = vadd.f32 %v7764_v2, %v7677_v8 }
 0x2e7   : > { %v7855_v6 = vadd.f32 %v7851_v42, %v7323_v54  ;;  %v7845_v38 = vadd.f32 %v7844_v39, %v7765_v35 }
 0x2e9   : > { %v8018_v37 = vmul.f32 -1.442695, %v7855_v6  ;;  %v7854_v13 = vadd.f32 %v7845_v38, %v7322_v25 }
 0x2eb   : > { %9286 = vpow2.f32 %v8018_v37  ;;  %v8017_v53 = vmul.f32 -1.442695, %v7854_v13 }
 0x2ed   : > { %9288 = vpow2.f32 %v8017_v53 }
 0x2f8   : > { %v9287_v12 = vpop.eup %9286 }
 0x2f9   : > { %v7863_v20 = vadd.f32 1.0, %v9287_v12 }
 0x2fa   : > { %v9289_v45 = vpop.eup %9288 }
 0x2fb   : > { %9290 = vrcp.f32 %v7863_v20  ;;  %v7862_v23 = vadd.f32 1.0, %v9289_v45 }
 0x2fd   : > { %9292 = vrcp.f32 %v7862_v23 }
 0x308   : > { %v9291_v59 = vpop.eup %9290 }
 0x309   : > { %7870 = vst.msk [vmem:[%s9497_s17 + $0x8] sm:$0xff] %vm7868_vm6, %v9291_v59 }
 0x30a   : > { %v9293_v21 = vpop.eup %9292 }
 0x30b   : > { %7869 = vst.msk [vmem:[%s9497_s17] sm:$0xff] %vm7868_vm6, %v9293_v21 }
 0x30c PF: > { %s8024_s3 = sshll.u32 %s9374_s13, 8  ;;  %s7885_s7 = sshll.u32 %s9497_s17, 4  ;;  %s11019_s7 = int_to_ptr.vmem [resolvable:$true] %s7885_s7 }
 0x30d   : > { %s11016_s6 = scalar_lea.hbm %s11076_s2, %s8024_s3  ;;  %s11023_s8 = scalar_lea.sflag [#allocation7], %s156_s26 }
 0x30e   : > { %s9294_s12 = scalar_lea.vmem %s11019_s7, 256  ;;  %s9400_s13 = smov [#allocation6]  }
 0x30f   : > { %p9295_p2 = scmp.ne.s32.totalorder %s11019_s7, %s9294_s12  ;;  %s9298_s18 = sshll.u32 %s9400_s13, 4  ;;  %s9299_s18 = int_to_ptr.vmem [resolvable:$false] %s9298_s18 }
 0x310   : > { %s9300_s23 = scalar_lea.vmem %s9299_s18, 512  ;;  %p9301_p6 = scmp.lt.s32.totalorder %s11019_s7, %s9299_s18 }
 0x311   : > { %p9296_p4 = pnand %p9295_p2, %p9467_p3  ;;  %p9302_p7 = scmp.lt.s32.totalorder %s9300_s23, %s9294_s12 }
 0x313   : > { %p9297_p5 = pneg %p9296_p4  ;;  %p9303_p8 = por %p9302_p7, %p9301_p6 }
 0x315   : > { %p9304_p10 = pnand %p9303_p8, %p9297_p5 }
 0x317   : > { %9307 = shalt.err (!%p9304_p10)
}
 0x318   : > { %s9308_s26 = scalar_lea.hbm %s11016_s6, 256  ;;  %s9312_s27 = scalar_lea.hbm %s11076_s2, 512 }
 0x319   : > { %p9309_p11 = scmp.ne.s32.totalorder %s11016_s6, %s9308_s26  ;;  %p9313_p0 = scmp.lt.s32.totalorder %s11016_s6, %s11076_s2 }
 0x31a   : > { %p9314_p1 = scmp.lt.s32.totalorder %s9312_s27, %s9308_s26 }
 0x31b   : > { %p9310_p12 = pnand %p9309_p11, %p9467_p3 }
 0x31c   : > { %p9315_p2 = por %p9314_p1, %p9313_p0 }
 0x31d   : > { %p9311_p13 = pneg %p9310_p12 }
 0x31f   : > { %p9316_p4 = pnand %p9315_p2, %p9311_p13 }
 0x321   : > { %9319 = shalt.err (!%p9316_p4)
}
 0x322   : > { %s9401_s30 = smov 128   ;;  %s9402_s3 = smov 8  }
 0x323   : > { %9201 = dma.vmem_to_hbm [thread:$0]  (%p9467_p3), %s11019_s7, 256, %s11016_s6, %s11023_s8, %s9401_s30, %s9401_s30, %s9402_s3  }
 0x324 PF: > { %p9207_p5 = scmp.ge.s32.totalorder %s9386_s16, 2  ;;  %s7900_s4 = sand.u32 1, %s9358_s9  }
 0x325   : > { %s7901_s5 = scalar_lea.sflag [#allocation7], %s7900_s4 }
 0x326   : > { %p9204_p6 = pnand %p9207_p5, %p9477_p9 }
 0x328   : > { %p9205_p7 = pneg %p9204_p6 }
 0x32a   : > { %9353 = dma.done.wait (%p9205_p7), %s7901_s5, 256  }
 0x32b   : > { %9355 = vsyncadd (%p9205_p7), %s7901_s5, 4294967040  ;;  %s15_s16 = sadd.s32 1, %s9386_s16   ;;  %s11115_s9 = smov %s9362_s10 }
 0x32c   : > { %p12_p8 = scmp.ge.s32.totalorder %s15_s16, 6   ;;  %s11116_s10 = smov %s9366_s11 }
 0x32d   : > { %s11117_s11 = smov %s9485_s25  ;;  %s11118_s12 = smov %s9378_s14 }
 0x32e   : > { %s11119_s13 = smov %s9382_s15  ;;  %s11120_s14 = smov %s11123_s19 }
 0x32f   : > { %s11121_s15 = smov %s11127_s20  ;;  %14 = sbr.rel (!%p12_p8) target bundleno = 5 (0x5), region = 84 }
 0x334   :  { %7906 = vsyncpa [#allocation7], 1 }
 0x335   :  { %7908 = vsyncpa [#allocation7 + $0x1], 1 }

</bundles_post_ra>
